<compile_context>
chip_gen: v7x
topology: tpu7x:2x2x1
jax: 0.10.0
libtpu: 0.0.40
codegen_flags: <defaults>
</compile_context>

<pallas_src>
from functools import partial

import jax
import jax.numpy as jnp
from jax.experimental import pallas as pl
from jax.experimental.pallas import tpu as pltpu


# --------------------------------------------------------------------------- #
# Small helpers                                                               #
# --------------------------------------------------------------------------- #
def _cdiv(a, b):
    return -(-a // b)


def _round_up(x, m):
    return _cdiv(x, m) * m


# --------------------------------------------------------------------------- #
# Pallas kernels                                                              #
# --------------------------------------------------------------------------- #
def _gemm_kernel(x_ref, w_ref, b_ref, o_ref, acc_ref, *, apply_relu):
    """One (tile_m, tile_k) x (tile_k, N) step of y = relu(x @ w + b)."""
    k = pl.program_id(1)

    @pl.when(k == 0)
    def _():
        acc_ref[...] = jnp.zeros_like(acc_ref)

    acc_ref[...] += jnp.dot(x_ref[...], w_ref[...],
                            preferred_element_type=jnp.float32)

    @pl.when(k == pl.num_programs(1) - 1)
    def _():
        y = acc_ref[...] + b_ref[...]
        if apply_relu:
            y = jnp.maximum(y, 0.0)
        o_ref[...] = y.astype(o_ref.dtype)


def pallas_gemm_bias_act(x, w, b, apply_relu, out_dtype,
                         max_tile_m=256, max_tile_k=1024):
    """y = (relu)(x @ w + b); bf16 operands, f32 accumulation.

    M is tiled (parallel axis, megacore-shardable), K is tiled (arbitrary axis,
    VMEM f32 accumulator), weights stay resident per K-tile, N is kept whole.
    M/K are zero-padded so every block is full (K padded to a multiple of 128).
    """
    M, K = x.shape
    K2, N = w.shape
    assert K == K2
    x = x.astype(jnp.bfloat16)
    w = w.astype(jnp.bfloat16)
    b = b.reshape(1, N).astype(jnp.float32)

    tile_m = min(_round_up(M, 16), max_tile_m)          # multiple of 16 (bf16 sublane pack)
    Mp = _round_up(M, tile_m)
    Kp = _round_up(K, 128)
    nk = _cdiv(Kp, max_tile_k)
    tile_k = _round_up(_cdiv(Kp, nk), 128)
    Kp = nk * tile_k
    nm = Mp // tile_m

    if Mp != M or Kp != K:
        x = jnp.pad(x, ((0, Mp - M), (0, Kp - K)))
    if Kp != K:
        w = jnp.pad(w, ((0, Kp - K), (0, 0)))

    out = pl.pallas_call(
        partial(_gemm_kernel, apply_relu=apply_relu),
        out_shape=jax.ShapeDtypeStruct((Mp, N), out_dtype),
        grid=(nm, nk),
        in_specs=[
            pl.BlockSpec((tile_m, tile_k), lambda i, k: (i, k)),
            pl.BlockSpec((tile_k, N), lambda i, k: (k, 0)),
            pl.BlockSpec((1, N), lambda i, k: (0, 0)),
        ],
        out_specs=pl.BlockSpec((tile_m, N), lambda i, k: (i, 0)),
        scratch_shapes=[pltpu.VMEM((tile_m, N), jnp.float32)],
        compiler_params=pltpu.CompilerParams(
            dimension_semantics=("parallel", "arbitrary")),
    )(x, w, b)
    return out[:M] if Mp != M else out


def _dueling_head_kernel(ha_ref, hv_ref, wa_ref, ba_ref, wv_ref, bv_ref, o_ref):
    # adv = ha @ wa + ba ; val = hv @ wv + bv ; q = val + adv - mean(adv, axis=1)
    adv = jnp.dot(ha_ref[...], wa_ref[...],
                  preferred_element_type=jnp.float32) + ba_ref[...]
    val = jnp.dot(hv_ref[...], wv_ref[...],
                  preferred_element_type=jnp.float32) + bv_ref[...]
    q = val + adv - jnp.mean(adv, axis=1, keepdims=True)
    o_ref[...] = q.astype(o_ref.dtype)


def pallas_dueling_head(h_adv, h_val, wa, ba, wv, bv):
    """Fused fc2(advantage) + fc2(value) + dueling combine, one launch."""
    B, H = h_adv.shape
    A = wa.shape[1]
    h_adv = h_adv.astype(jnp.bfloat16)
    h_val = h_val.astype(jnp.bfloat16)
    return pl.pallas_call(
        _dueling_head_kernel,
        out_shape=jax.ShapeDtypeStruct((B, A), jnp.float32),
        grid=(1,),
        in_specs=[
            pl.BlockSpec((B, H), lambda i: (0, 0)),
            pl.BlockSpec((B, H), lambda i: (0, 0)),
            pl.BlockSpec((H, A), lambda i: (0, 0)),
            pl.BlockSpec((1, A), lambda i: (0, 0)),
            pl.BlockSpec((H, 1), lambda i: (0, 0)),
            pl.BlockSpec((1, 1), lambda i: (0, 0)),
        ],
        out_specs=pl.BlockSpec((B, A), lambda i: (0, 0)),
    )(h_adv, h_val,
      wa.astype(jnp.bfloat16), ba.reshape(1, A).astype(jnp.float32),
      wv.astype(jnp.bfloat16), bv.reshape(1, 1).astype(jnp.float32))


# --------------------------------------------------------------------------- #
# Conv-as-GEMM glue (plain JAX: patch extraction / reshapes only)             #
# --------------------------------------------------------------------------- #
def im2col(x_nhwc, kh, kw, stride):
    """(N,H,W,C) -> (N*OH*OW, KH*KW*C), patch channel ordering (kh, kw, c)."""
    N, H, W, C = x_nhwc.shape
    oh = (H - kh) // stride + 1
    ow = (W - kw) // stride + 1
    cols = []
    for i in range(kh):
        for j in range(kw):
            cols.append(x_nhwc[:, i:i + stride * oh:stride,
                               j:j + stride * ow:stride, :])
    patches = jnp.concatenate(cols, axis=-1)            # (N, OH, OW, KH*KW*C)
    return patches.reshape(N * oh * ow, kh * kw * C), (N, oh, ow)


# --------------------------------------------------------------------------- #
# One-time parameter preparation (fuse / transpose / permute / cast to bf16)  #
# --------------------------------------------------------------------------- #
def prepare_params(params):
    """PyTorch-layout params -> fused / (K,N)-transposed / bf16 kernel layout."""
    adv, val = params["advantage"], params["value"]

    def conv_w2d(w):   # (OC,IC,KH,KW) -> (KH*KW*IC, OC), matches im2col (kh,kw,c)
        OC, IC, KH, KW = w.shape
        return jnp.transpose(w, (2, 3, 1, 0)).reshape(KH * KW * IC, OC)

    prep = {}
    # conv1 fused across the two subnets (they consume the same input).
    prep["conv1_w"] = jnp.concatenate(
        [conv_w2d(adv["conv1_w"]), conv_w2d(val["conv1_w"])],
        axis=1).astype(jnp.bfloat16)
    prep["conv1_b"] = jnp.concatenate(
        [adv["conv1_b"], val["conv1_b"]]).astype(jnp.float32)

    for name, sp in (("adv", adv), ("val", val)):
        prep[f"{name}_conv2_w"] = conv_w2d(sp["conv2_w"]).astype(jnp.bfloat16)
        prep[f"{name}_conv2_b"] = sp["conv2_b"].astype(jnp.float32)
        prep[f"{name}_conv3_w"] = conv_w2d(sp["conv3_w"]).astype(jnp.bfloat16)
        prep[f"{name}_conv3_b"] = sp["conv3_b"].astype(jnp.float32)
        # fc1: PyTorch weight is (512, 64*7*7) over an NCHW (c,h,w) flatten.
        # Permute its input rows to NHWC (h,w,c) flatten and store as (K, N)
        # so the kernel consumes the conv3 output with no transpose at all.
        w1 = sp["fc1_w"].reshape(512, 64, 7, 7)
        w1 = jnp.transpose(w1, (2, 3, 1, 0)).reshape(7 * 7 * 64, 512)
        prep[f"{name}_fc1_w"] = w1.astype(jnp.bfloat16)
        prep[f"{name}_fc1_b"] = sp["fc1_b"].astype(jnp.float32)
        prep[f"{name}_fc2_w"] = sp["fc2_w"].T.astype(jnp.bfloat16)
        prep[f"{name}_fc2_b"] = sp["fc2_b"].astype(jnp.float32)
    return prep


# --------------------------------------------------------------------------- #
# Forward pass                                                                #
# --------------------------------------------------------------------------- #
def qnetwork_forward(state_nchw, prep, *,
                     gemm=pallas_gemm_bias_act, head=pallas_dueling_head):
    x = jnp.transpose(state_nchw, (0, 2, 3, 1)).astype(jnp.bfloat16)  # NCHW->NHWC

    # conv1: shared im2col + fused (adv|val) output channels, single GEMM.
    patches, (B, oh, ow) = im2col(x, 8, 8, 4)
    h = gemm(patches, prep["conv1_w"], prep["conv1_b"], True, jnp.bfloat16)
    h = h.reshape(B, oh, ow, 64)
    h_adv, h_val = h[..., :32], h[..., 32:]

    def trunk(h, name):
        p, (B, oh, ow) = im2col(h, 4, 4, 2)
        h = gemm(p, prep[f"{name}_conv2_w"], prep[f"{name}_conv2_b"],
                 True, jnp.bfloat16).reshape(B, oh, ow, 64)
        p, (B, oh, ow) = im2col(h, 3, 3, 1)
        h = gemm(p, prep[f"{name}_conv3_w"], prep[f"{name}_conv3_b"],
                 True, jnp.bfloat16)
        h = h.reshape(B, oh * ow * 64)        # NHWC flatten (fc1_w rows permuted to match)
        return gemm(h, prep[f"{name}_fc1_w"], prep[f"{name}_fc1_b"],
                    True, jnp.bfloat16)

    ha = trunk(h_adv, "adv")                  # (B, 512)
    hv = trunk(h_val, "val")                  # (B, 512)
    return head(ha, hv, prep["adv_fc2_w"], prep["adv_fc2_b"],
                prep["val_fc2_w"], prep["val_fc2_b"])


# --------------------------------------------------------------------------- #
# References                                                                  #
# --------------------------------------------------------------------------- #
def _jnp_gemm(x, w, b, apply_relu, out_dtype):
    """bf16-emulating GEMM (same casts as the Pallas path), for tight checking."""
    y = jnp.dot(x.astype(jnp.bfloat16), w.astype(jnp.bfloat16),
                preferred_element_type=jnp.float32)
    y = y + b.reshape(1, -1).astype(jnp.float32)
    if apply_relu:
        y = jnp.maximum(y, 0.0)
    return y.astype(out_dtype)


def _jnp_head(ha, hv, wa, ba, wv, bv):
    adv = jnp.dot(ha.astype(jnp.bfloat16), wa.astype(jnp.bfloat16),
                  preferred_element_type=jnp.float32) + ba.reshape(1, -1)
    val = jnp.dot(hv.astype(jnp.bfloat16), wv.astype(jnp.bfloat16),
                  preferred_element_type=jnp.float32) + bv.reshape(1, -1)
    return val + adv - jnp.mean(adv, axis=1, keepdims=True)


def _ref_subnet_f32(x_nchw, p):
    """Pure f32 PyTorch-semantics reference on PyTorch-layout params."""
    def conv(x, w, b, s):
        OC, IC, KH, KW = w.shape
        patches, (N, oh, ow) = im2col(x, KH, KW, s)
        w2d = jnp.transpose(w, (2, 3, 1, 0)).reshape(KH * KW * IC, OC)
        y = jnp.maximum(patches @ w2d + b.reshape(1, -1), 0.0)
        return y.reshape(N, oh, ow, OC)

    x = jnp.transpose(x_nchw, (0, 2, 3, 1)).astype(jnp.float32)
    h = conv(x, p["conv1_w"], p["conv1_b"], 4)
    h = conv(h, p["conv2_w"], p["conv2_b"], 2)
    h = conv(h, p["conv3_w"], p["conv3_b"], 1)
    h = jnp.transpose(h, (0, 3, 1, 2)).reshape(h.shape[0], -1)   # PyTorch NCHW flatten
    h = jnp.maximum(h @ p["fc1_w"].T + p["fc1_b"], 0.0)
    return h @ p["fc2_w"].T + p["fc2_b"]


def _ref_qnetwork_f32(x, params):
    adv = _ref_subnet_f32(x, params["advantage"])
    val = _ref_subnet_f32(x, params["value"])
    return val + (adv - adv.mean(axis=1, keepdims=True))


# --------------------------------------------------------------------------- #
# Deterministic parameter init (PyTorch-Conv/Linear style uniform bounds)     #
# --------------------------------------------------------------------------- #
def _uniform(key, shape, fan_in):
    bound = 1.0 / (fan_in ** 0.5)
    return jax.random.uniform(key, shape, jnp.float32, -bound, bound)


def init_subnet(key, in_channels, out_size):
    ks = jax.random.split(key, 10)
    p = {}
    p["conv1_w"] = _uniform(ks[0], (32, in_channels, 8, 8), in_channels * 64)
    p["conv1_b"] = _uniform(ks[1], (32,), in_channels * 64)
    p["conv2_w"] = _uniform(ks[2], (64, 32, 4, 4), 32 * 16)
    p["conv2_b"] = _uniform(ks[3], (64,), 32 * 16)
    p["conv3_w"] = _uniform(ks[4], (64, 64, 3, 3), 64 * 9)
    p["conv3_b"] = _uniform(ks[5], (64,), 64 * 9)
    p["fc1_w"] = _uniform(ks[6], (512, 7 * 7 * 64), 7 * 7 * 64)
    p["fc1_b"] = _uniform(ks[7], (512,), 7 * 7 * 64)
    p["fc2_w"] = _uniform(ks[8], (out_size, 512), 512)
    p["fc2_b"] = _uniform(ks[9], (out_size,), 512)
    return p


def init_qnetwork(key, in_channels, action_size):
    ka, kv = jax.random.split(key)
    return {
        "advantage": init_subnet(ka, in_channels, action_size),
        "value": init_subnet(kv, in_channels, 1),
    }


# --------------------------------------------------------------------------- #
if __name__ == "__main__":
    key = jax.random.PRNGKey(0)
    k_param, k_state = jax.random.split(key)

    # state_size = (4, 84, 84): fc1's 7*7*64 input hard-codes 84x84 spatial.
    batch, channels, spatial, action_size = 2, 4, 84, 6
    params = init_qnetwork(k_param, channels, action_size)
    prep = prepare_params(params)
    state = jax.random.normal(k_state, (batch, channels, spatial, spatial),
                              jnp.float32)

    q_vals = jax.jit(qnetwork_forward)(state, prep)
    q_vals = jax.block_until_ready(q_vals)
    assert q_vals.shape == (batch, action_size)

    # Tight check vs a bf16-emulating reference of the same math.
    q_bf16_ref = qnetwork_forward(state, prep, gemm=_jnp_gemm, head=_jnp_head)
    assert jnp.allclose(q_vals, q_bf16_ref, rtol=1e-2, atol=1e-2), \
        "mismatch vs bf16 reference"

    # Loose semantic check vs the pure-f32, PyTorch-layout reference.
    q_ref = _ref_qnetwork_f32(state, params)
    assert jnp.allclose(q_vals, q_ref, rtol=1e-1, atol=1e-1), \
        "mismatch vs f32 PyTorch-semantics reference"

    print("KERNEL_OK")
</pallas_src>

<mosaic_0001>
module attributes {stable_mosaic.version = 11 : i64} {
  func.func @_gemm_kernel(%arg0: i32, %arg1: i32, %arg2: memref<256x256xbf16, #tpu.memory_space<vmem>>, %arg3: memref<256x64xbf16, #tpu.memory_space<vmem>>, %arg4: memref<1x64xf32, #tpu.memory_space<vmem>>, %arg5: memref<256x64xbf16, #tpu.memory_space<vmem>>, %arg6: memref<256x64xf32, #tpu.memory_space<vmem>>) attributes {dimension_semantics = [#tpu.dimension_semantics<parallel>, #tpu.dimension_semantics<arbitrary>], iteration_bounds = array<i64: 4, 1>, scalar_prefetch = 0 : i64, scratch_operands = 1 : i64, tpu.core_type = #tpu.core_type<tc>, window_params = [{transform_indices = @transform_0, window_bounds = array<i64: 256, 256>}, {transform_indices = @transform_1, window_bounds = array<i64: 256, 64>}, {pipeline_mode = #tpu.pipeline_mode<synchronous>, transform_indices = @transform_2, window_bounds = array<i64: 1, 64>}, {transform_indices = @transform_3, window_bounds = array<i64: 256, 64>}]} {
    %c0_i32 = arith.constant 0 : i32
    %0 = arith.cmpi eq, %arg1, %c0_i32 : i32
    %1 = arith.extui %0 : i1 to i32
    %c0_i32_0 = arith.constant 0 : i32
    %2 = arith.cmpi ne, %1, %c0_i32_0 : i32
    scf.if %2 {
      %cst_10 = arith.constant 0.000000e+00 : f32
      %12 = vector.broadcast %cst_10 : f32 to vector<256x64xf32>
      %c0_11 = arith.constant 0 : index
      %c0_12 = arith.constant 0 : index
      %13 = vector.load %arg6[%c0_11, %c0_12] : memref<256x64xf32, #tpu.memory_space<vmem>>, vector<256x64xf32>
      tpu.vector_store %arg6[%c0_11, %c0_12], %12 {strides = array<i32>} : memref<256x64xf32, #tpu.memory_space<vmem>>, vector<256x64xf32>,
    } else {
    }
    %c0 = arith.constant 0 : index
    %c0_1 = arith.constant 0 : index
    %3 = vector.load %arg6[%c0, %c0_1] : memref<256x64xf32, #tpu.memory_space<vmem>>, vector<256x64xf32>
    %c0_2 = arith.constant 0 : index
    %c0_3 = arith.constant 0 : index
    %4 = vector.load %arg2[%c0_2, %c0_3] : memref<256x256xbf16, #tpu.memory_space<vmem>>, vector<256x256xbf16>
    %c0_4 = arith.constant 0 : index
    %c0_5 = arith.constant 0 : index
    %5 = vector.load %arg3[%c0_4, %c0_5] : memref<256x64xbf16, #tpu.memory_space<vmem>>, vector<256x64xbf16>
    %cst = arith.constant dense<0.000000e+00> : vector<256x64xf32>
    %6 = tpu.matmul %4, %5, %cst {dimension_numbers = #tpu.dot_dimension_numbers<[1], [0], [0], [1], [0, 0, 1, 1], [], []>} : vector<256x256xbf16>, vector<256x64xbf16>, vector<256x64xf32> -> vector<256x64xf32>
    %7 = arith.addf %3, %6 : vector<256x64xf32>
    %c0_6 = arith.constant 0 : index
    %c0_7 = arith.constant 0 : index
    %8 = vector.load %arg6[%c0_6, %c0_7] : memref<256x64xf32, #tpu.memory_space<vmem>>, vector<256x64xf32>
    tpu.vector_store %arg6[%c0_6, %c0_7], %7 {strides = array<i32>} : memref<256x64xf32, #tpu.memory_space<vmem>>, vector<256x64xf32>,
    %c0_i32_8 = arith.constant 0 : i32
    %9 = arith.cmpi eq, %arg1, %c0_i32_8 : i32
    %10 = arith.extui %9 : i1 to i32
    %c0_i32_9 = arith.constant 0 : i32
    %11 = arith.cmpi ne, %10, %c0_i32_9 : i32
    scf.if %11 {
      %c0_10 = arith.constant 0 : index
      %c0_11 = arith.constant 0 : index
      %12 = vector.load %arg6[%c0_10, %c0_11] : memref<256x64xf32, #tpu.memory_space<vmem>>, vector<256x64xf32>
      %c0_12 = arith.constant 0 : index
      %c0_13 = arith.constant 0 : index
      %13 = vector.load %arg4[%c0_12, %c0_13] : memref<1x64xf32, #tpu.memory_space<vmem>>, vector<1x64xf32>
      %14 = vector.broadcast %13 : vector<1x64xf32> to vector<256x64xf32>
      %15 = arith.addf %12, %14 : vector<256x64xf32>
      %cst_14 = arith.constant 0.000000e+00 : f32
      %16 = vector.broadcast %cst_14 : f32 to vector<256x64xf32>
      %17 = arith.maximumf %15, %16 : vector<256x64xf32>
      %18 = arith.truncf %17 : vector<256x64xf32> to vector<256x64xbf16>
      %c0_15 = arith.constant 0 : index
      %c0_16 = arith.constant 0 : index
      %19 = vector.load %arg5[%c0_15, %c0_16] : memref<256x64xbf16, #tpu.memory_space<vmem>>, vector<256x64xbf16>
      tpu.vector_store %arg5[%c0_15, %c0_16], %18 {strides = array<i32>} : memref<256x64xbf16, #tpu.memory_space<vmem>>, vector<256x64xbf16>,
    } else {
    }
    return
  }
  func.func @transform_0(%arg0: i32, %arg1: i32) -> (i32, i32) {
    %c0_i32 = arith.constant 0 : i32
    return %arg0, %arg1 : i32, i32
  }
  func.func @transform_1(%arg0: i32, %arg1: i32) -> (i32, i32) {
    %c0_i32 = arith.constant 0 : i32
    %c0_i32_0 = arith.constant 0 : i32
    return %arg1, %c0_i32 : i32, i32
  }
  func.func @transform_2(%arg0: i32, %arg1: i32) -> (i32, i32) {
    %c0_i32 = arith.constant 0 : i32
    %c0_i32_0 = arith.constant 0 : i32
    %c0_i32_1 = arith.constant 0 : i32
    return %c0_i32, %c0_i32_0 : i32, i32
  }
  func.func @transform_3(%arg0: i32, %arg1: i32) -> (i32, i32) {
    %c0_i32 = arith.constant 0 : i32
    %c0_i32_0 = arith.constant 0 : i32
    return %arg0, %c0_i32 : i32, i32
  }
}

module attributes {stable_mosaic.version = 11 : i64} {
  func.func @_gemm_kernel(%arg0: i32, %arg1: i32, %arg2: memref<176x512xbf16, #tpu.memory_space<vmem>>, %arg3: memref<512x64xbf16, #tpu.memory_space<vmem>>, %arg4: memref<1x64xf32, #tpu.memory_space<vmem>>, %arg5: memref<176x64xbf16, #tpu.memory_space<vmem>>, %arg6: memref<176x64xf32, #tpu.memory_space<vmem>>) attributes {dimension_semantics = [#tpu.dimension_semantics<parallel>, #tpu.dimension_semantics<arbitrary>], iteration_bounds = array<i64: 1, 1>, scalar_prefetch = 0 : i64, scratch_operands = 1 : i64, tpu.core_type = #tpu.core_type<tc>, window_params = [{transform_indices = @transform_0, window_bounds = array<i64: 176, 512>}, {transform_indices = @transform_1, window_bounds = array<i64: 512, 64>}, {pipeline_mode = #tpu.pipeline_mode<synchronous>, transform_indices = @transform_2, window_bounds = array<i64: 1, 64>}, {transform_indices = @transform_3, window_bounds = array<i64: 176, 64>}]} {
    %c0_i32 = arith.constant 0 : i32
    %0 = arith.cmpi eq, %arg1, %c0_i32 : i32
    %1 = arith.extui %0 : i1 to i32
    %c0_i32_0 = arith.constant 0 : i32
    %2 = arith.cmpi ne, %1, %c0_i32_0 : i32
    scf.if %2 {
      %cst_10 = arith.constant 0.000000e+00 : f32
      %12 = vector.broadcast %cst_10 : f32 to vector<176x64xf32>
      %c0_11 = arith.constant 0 : index
      %c0_12 = arith.constant 0 : index
      %13 = vector.load %arg6[%c0_11, %c0_12] : memref<176x64xf32, #tpu.memory_space<vmem>>, vector<176x64xf32>
      tpu.vector_store %arg6[%c0_11, %c0_12], %12 {strides = array<i32>} : memref<176x64xf32, #tpu.memory_space<vmem>>, vector<176x64xf32>,
    } else {
    }
    %c0 = arith.constant 0 : index
    %c0_1 = arith.constant 0 : index
    %3 = vector.load %arg6[%c0, %c0_1] : memref<176x64xf32, #tpu.memory_space<vmem>>, vector<176x64xf32>
    %c0_2 = arith.constant 0 : index
    %c0_3 = arith.constant 0 : index
    %4 = vector.load %arg2[%c0_2, %c0_3] : memref<176x512xbf16, #tpu.memory_space<vmem>>, vector<176x512xbf16>
    %c0_4 = arith.constant 0 : index
    %c0_5 = arith.constant 0 : index
    %5 = vector.load %arg3[%c0_4, %c0_5] : memref<512x64xbf16, #tpu.memory_space<vmem>>, vector<512x64xbf16>
    %cst = arith.constant dense<0.000000e+00> : vector<176x64xf32>
    %6 = tpu.matmul %4, %5, %cst {dimension_numbers = #tpu.dot_dimension_numbers<[1], [0], [0], [1], [0, 0, 1, 1], [], []>} : vector<176x512xbf16>, vector<512x64xbf16>, vector<176x64xf32> -> vector<176x64xf32>
    %7 = arith.addf %3, %6 : vector<176x64xf32>
    %c0_6 = arith.constant 0 : index
    %c0_7 = arith.constant 0 : index
    %8 = vector.load %arg6[%c0_6, %c0_7] : memref<176x64xf32, #tpu.memory_space<vmem>>, vector<176x64xf32>
    tpu.vector_store %arg6[%c0_6, %c0_7], %7 {strides = array<i32>} : memref<176x64xf32, #tpu.memory_space<vmem>>, vector<176x64xf32>,
    %c0_i32_8 = arith.constant 0 : i32
    %9 = arith.cmpi eq, %arg1, %c0_i32_8 : i32
    %10 = arith.extui %9 : i1 to i32
    %c0_i32_9 = arith.constant 0 : i32
    %11 = arith.cmpi ne, %10, %c0_i32_9 : i32
    scf.if %11 {
      %c0_10 = arith.constant 0 : index
      %c0_11 = arith.constant 0 : index
      %12 = vector.load %arg6[%c0_10, %c0_11] : memref<176x64xf32, #tpu.memory_space<vmem>>, vector<176x64xf32>
      %c0_12 = arith.constant 0 : index
      %c0_13 = arith.constant 0 : index
      %13 = vector.load %arg4[%c0_12, %c0_13] : memref<1x64xf32, #tpu.memory_space<vmem>>, vector<1x64xf32>
      %14 = vector.broadcast %13 : vector<1x64xf32> to vector<176x64xf32>
      %15 = arith.addf %12, %14 : vector<176x64xf32>
      %cst_14 = arith.constant 0.000000e+00 : f32
      %16 = vector.broadcast %cst_14 : f32 to vector<176x64xf32>
      %17 = arith.maximumf %15, %16 : vector<176x64xf32>
      %18 = arith.truncf %17 : vector<176x64xf32> to vector<176x64xbf16>
      %c0_15 = arith.constant 0 : index
      %c0_16 = arith.constant 0 : index
      %19 = vector.load %arg5[%c0_15, %c0_16] : memref<176x64xbf16, #tpu.memory_space<vmem>>, vector<176x64xbf16>
      tpu.vector_store %arg5[%c0_15, %c0_16], %18 {strides = array<i32>} : memref<176x64xbf16, #tpu.memory_space<vmem>>, vector<176x64xbf16>,
    } else {
    }
    return
  }
  func.func @transform_0(%arg0: i32, %arg1: i32) -> (i32, i32) {
    %c0_i32 = arith.constant 0 : i32
    return %arg0, %arg1 : i32, i32
  }
  func.func @transform_1(%arg0: i32, %arg1: i32) -> (i32, i32) {
    %c0_i32 = arith.constant 0 : i32
    %c0_i32_0 = arith.constant 0 : i32
    return %arg1, %c0_i32 : i32, i32
  }
  func.func @transform_2(%arg0: i32, %arg1: i32) -> (i32, i32) {
    %c0_i32 = arith.constant 0 : i32
    %c0_i32_0 = arith.constant 0 : i32
    %c0_i32_1 = arith.constant 0 : i32
    return %c0_i32, %c0_i32_0 : i32, i32
  }
  func.func @transform_3(%arg0: i32, %arg1: i32) -> (i32, i32) {
    %c0_i32 = arith.constant 0 : i32
    %c0_i32_0 = arith.constant 0 : i32
    return %arg0, %c0_i32 : i32, i32
  }
}

module attributes {stable_mosaic.version = 11 : i64} {
  func.func @_gemm_kernel(%arg0: i32, %arg1: i32, %arg2: memref<112x640xbf16, #tpu.memory_space<vmem>>, %arg3: memref<640x64xbf16, #tpu.memory_space<vmem>>, %arg4: memref<1x64xf32, #tpu.memory_space<vmem>>, %arg5: memref<112x64xbf16, #tpu.memory_space<vmem>>, %arg6: memref<112x64xf32, #tpu.memory_space<vmem>>) attributes {dimension_semantics = [#tpu.dimension_semantics<parallel>, #tpu.dimension_semantics<arbitrary>], iteration_bounds = array<i64: 1, 1>, scalar_prefetch = 0 : i64, scratch_operands = 1 : i64, tpu.core_type = #tpu.core_type<tc>, window_params = [{transform_indices = @transform_0, window_bounds = array<i64: 112, 640>}, {transform_indices = @transform_1, window_bounds = array<i64: 640, 64>}, {pipeline_mode = #tpu.pipeline_mode<synchronous>, transform_indices = @transform_2, window_bounds = array<i64: 1, 64>}, {transform_indices = @transform_3, window_bounds = array<i64: 112, 64>}]} {
    %c0_i32 = arith.constant 0 : i32
    %0 = arith.cmpi eq, %arg1, %c0_i32 : i32
    %1 = arith.extui %0 : i1 to i32
    %c0_i32_0 = arith.constant 0 : i32
    %2 = arith.cmpi ne, %1, %c0_i32_0 : i32
    scf.if %2 {
      %cst_10 = arith.constant 0.000000e+00 : f32
      %12 = vector.broadcast %cst_10 : f32 to vector<112x64xf32>
      %c0_11 = arith.constant 0 : index
      %c0_12 = arith.constant 0 : index
      %13 = vector.load %arg6[%c0_11, %c0_12] : memref<112x64xf32, #tpu.memory_space<vmem>>, vector<112x64xf32>
      tpu.vector_store %arg6[%c0_11, %c0_12], %12 {strides = array<i32>} : memref<112x64xf32, #tpu.memory_space<vmem>>, vector<112x64xf32>,
    } else {
    }
    %c0 = arith.constant 0 : index
    %c0_1 = arith.constant 0 : index
    %3 = vector.load %arg6[%c0, %c0_1] : memref<112x64xf32, #tpu.memory_space<vmem>>, vector<112x64xf32>
    %c0_2 = arith.constant 0 : index
    %c0_3 = arith.constant 0 : index
    %4 = vector.load %arg2[%c0_2, %c0_3] : memref<112x640xbf16, #tpu.memory_space<vmem>>, vector<112x640xbf16>
    %c0_4 = arith.constant 0 : index
    %c0_5 = arith.constant 0 : index
    %5 = vector.load %arg3[%c0_4, %c0_5] : memref<640x64xbf16, #tpu.memory_space<vmem>>, vector<640x64xbf16>
    %cst = arith.constant dense<0.000000e+00> : vector<112x64xf32>
    %6 = tpu.matmul %4, %5, %cst {dimension_numbers = #tpu.dot_dimension_numbers<[1], [0], [0], [1], [0, 0, 1, 1], [], []>} : vector<112x640xbf16>, vector<640x64xbf16>, vector<112x64xf32> -> vector<112x64xf32>
    %7 = arith.addf %3, %6 : vector<112x64xf32>
    %c0_6 = arith.constant 0 : index
    %c0_7 = arith.constant 0 : index
    %8 = vector.load %arg6[%c0_6, %c0_7] : memref<112x64xf32, #tpu.memory_space<vmem>>, vector<112x64xf32>
    tpu.vector_store %arg6[%c0_6, %c0_7], %7 {strides = array<i32>} : memref<112x64xf32, #tpu.memory_space<vmem>>, vector<112x64xf32>,
    %c0_i32_8 = arith.constant 0 : i32
    %9 = arith.cmpi eq, %arg1, %c0_i32_8 : i32
    %10 = arith.extui %9 : i1 to i32
    %c0_i32_9 = arith.constant 0 : i32
    %11 = arith.cmpi ne, %10, %c0_i32_9 : i32
    scf.if %11 {
      %c0_10 = arith.constant 0 : index
      %c0_11 = arith.constant 0 : index
      %12 = vector.load %arg6[%c0_10, %c0_11] : memref<112x64xf32, #tpu.memory_space<vmem>>, vector<112x64xf32>
      %c0_12 = arith.constant 0 : index
      %c0_13 = arith.constant 0 : index
      %13 = vector.load %arg4[%c0_12, %c0_13] : memref<1x64xf32, #tpu.memory_space<vmem>>, vector<1x64xf32>
      %14 = vector.broadcast %13 : vector<1x64xf32> to vector<112x64xf32>
      %15 = arith.addf %12, %14 : vector<112x64xf32>
      %cst_14 = arith.constant 0.000000e+00 : f32
      %16 = vector.broadcast %cst_14 : f32 to vector<112x64xf32>
      %17 = arith.maximumf %15, %16 : vector<112x64xf32>
      %18 = arith.truncf %17 : vector<112x64xf32> to vector<112x64xbf16>
      %c0_15 = arith.constant 0 : index
      %c0_16 = arith.constant 0 : index
      %19 = vector.load %arg5[%c0_15, %c0_16] : memref<112x64xbf16, #tpu.memory_space<vmem>>, vector<112x64xbf16>
      tpu.vector_store %arg5[%c0_15, %c0_16], %18 {strides = array<i32>} : memref<112x64xbf16, #tpu.memory_space<vmem>>, vector<112x64xbf16>,
    } else {
    }
    return
  }
  func.func @transform_0(%arg0: i32, %arg1: i32) -> (i32, i32) {
    %c0_i32 = arith.constant 0 : i32
    return %arg0, %arg1 : i32, i32
  }
  func.func @transform_1(%arg0: i32, %arg1: i32) -> (i32, i32) {
    %c0_i32 = arith.constant 0 : i32
    %c0_i32_0 = arith.constant 0 : i32
    return %arg1, %c0_i32 : i32, i32
  }
  func.func @transform_2(%arg0: i32, %arg1: i32) -> (i32, i32) {
    %c0_i32 = arith.constant 0 : i32
    %c0_i32_0 = arith.constant 0 : i32
    %c0_i32_1 = arith.constant 0 : i32
    return %c0_i32, %c0_i32_0 : i32, i32
  }
  func.func @transform_3(%arg0: i32, %arg1: i32) -> (i32, i32) {
    %c0_i32 = arith.constant 0 : i32
    %c0_i32_0 = arith.constant 0 : i32
    return %arg0, %c0_i32 : i32, i32
  }
}

module attributes {stable_mosaic.version = 11 : i64} {
  func.func @_gemm_kernel(%arg0: i32, %arg1: i32, %arg2: memref<16x896xbf16, #tpu.memory_space<vmem>>, %arg3: memref<896x512xbf16, #tpu.memory_space<vmem>>, %arg4: memref<1x512xf32, #tpu.memory_space<vmem>>, %arg5: memref<16x512xbf16, #tpu.memory_space<vmem>>, %arg6: memref<16x512xf32, #tpu.memory_space<vmem>>) attributes {dimension_semantics = [#tpu.dimension_semantics<parallel>, #tpu.dimension_semantics<arbitrary>], iteration_bounds = array<i64: 1, 4>, scalar_prefetch = 0 : i64, scratch_operands = 1 : i64, tpu.core_type = #tpu.core_type<tc>, window_params = [{transform_indices = @transform_0, window_bounds = array<i64: 16, 896>}, {transform_indices = @transform_1, window_bounds = array<i64: 896, 512>}, {pipeline_mode = #tpu.pipeline_mode<synchronous>, transform_indices = @transform_2, window_bounds = array<i64: 1, 512>}, {transform_indices = @transform_3, window_bounds = array<i64: 16, 512>}]} {
    %c0_i32 = arith.constant 0 : i32
    %0 = arith.cmpi eq, %arg1, %c0_i32 : i32
    %1 = arith.extui %0 : i1 to i32
    %c0_i32_0 = arith.constant 0 : i32
    %2 = arith.cmpi ne, %1, %c0_i32_0 : i32
    scf.if %2 {
      %cst_9 = arith.constant 0.000000e+00 : f32
      %12 = vector.broadcast %cst_9 : f32 to vector<16x512xf32>
      %c0_10 = arith.constant 0 : index
      %c0_11 = arith.constant 0 : index
      %13 = vector.load %arg6[%c0_10, %c0_11] : memref<16x512xf32, #tpu.memory_space<vmem>>, vector<16x512xf32>
      tpu.vector_store %arg6[%c0_10, %c0_11], %12 {strides = array<i32>} : memref<16x512xf32, #tpu.memory_space<vmem>>, vector<16x512xf32>,
    } else {
    }
    %c0 = arith.constant 0 : index
    %c0_1 = arith.constant 0 : index
    %3 = vector.load %arg6[%c0, %c0_1] : memref<16x512xf32, #tpu.memory_space<vmem>>, vector<16x512xf32>
    %c0_2 = arith.constant 0 : index
    %c0_3 = arith.constant 0 : index
    %4 = vector.load %arg2[%c0_2, %c0_3] : memref<16x896xbf16, #tpu.memory_space<vmem>>, vector<16x896xbf16>
    %c0_4 = arith.constant 0 : index
    %c0_5 = arith.constant 0 : index
    %5 = vector.load %arg3[%c0_4, %c0_5] : memref<896x512xbf16, #tpu.memory_space<vmem>>, vector<896x512xbf16>
    %cst = arith.constant dense<0.000000e+00> : vector<16x512xf32>
    %6 = tpu.matmul %4, %5, %cst {dimension_numbers = #tpu.dot_dimension_numbers<[1], [0], [0], [1], [0, 0, 1, 1], [], []>} : vector<16x896xbf16>, vector<896x512xbf16>, vector<16x512xf32> -> vector<16x512xf32>
    %7 = arith.addf %3, %6 : vector<16x512xf32>
    %c0_6 = arith.constant 0 : index
    %c0_7 = arith.constant 0 : index
    %8 = vector.load %arg6[%c0_6, %c0_7] : memref<16x512xf32, #tpu.memory_space<vmem>>, vector<16x512xf32>
    tpu.vector_store %arg6[%c0_6, %c0_7], %7 {strides = array<i32>} : memref<16x512xf32, #tpu.memory_space<vmem>>, vector<16x512xf32>,
    %c3_i32 = arith.constant 3 : i32
    %9 = arith.cmpi eq, %arg1, %c3_i32 : i32
    %10 = arith.extui %9 : i1 to i32
    %c0_i32_8 = arith.constant 0 : i32
    %11 = arith.cmpi ne, %10, %c0_i32_8 : i32
    scf.if %11 {
      %c0_9 = arith.constant 0 : index
      %c0_10 = arith.constant 0 : index
      %12 = vector.load %arg6[%c0_9, %c0_10] : memref<16x512xf32, #tpu.memory_space<vmem>>, vector<16x512xf32>
      %c0_11 = arith.constant 0 : index
      %c0_12 = arith.constant 0 : index
      %13 = vector.load %arg4[%c0_11, %c0_12] : memref<1x512xf32, #tpu.memory_space<vmem>>, vector<1x512xf32>
      %14 = vector.broadcast %13 : vector<1x512xf32> to vector<16x512xf32>
      %15 = arith.addf %12, %14 : vector<16x512xf32>
      %cst_13 = arith.constant 0.000000e+00 : f32
      %16 = vector.broadcast %cst_13 : f32 to vector<16x512xf32>
      %17 = arith.maximumf %15, %16 : vector<16x512xf32>
      %18 = arith.truncf %17 : vector<16x512xf32> to vector<16x512xbf16>
      %c0_14 = arith.constant 0 : index
      %c0_15 = arith.constant 0 : index
      %19 = vector.load %arg5[%c0_14, %c0_15] : memref<16x512xbf16, #tpu.memory_space<vmem>>, vector<16x512xbf16>
      tpu.vector_store %arg5[%c0_14, %c0_15], %18 {strides = array<i32>} : memref<16x512xbf16, #tpu.memory_space<vmem>>, vector<16x512xbf16>,
    } else {
    }
    return
  }
  func.func @transform_0(%arg0: i32, %arg1: i32) -> (i32, i32) {
    %c0_i32 = arith.constant 0 : i32
    return %arg0, %arg1 : i32, i32
  }
  func.func @transform_1(%arg0: i32, %arg1: i32) -> (i32, i32) {
    %c0_i32 = arith.constant 0 : i32
    %c0_i32_0 = arith.constant 0 : i32
    return %arg1, %c0_i32 : i32, i32
  }
  func.func @transform_2(%arg0: i32, %arg1: i32) -> (i32, i32) {
    %c0_i32 = arith.constant 0 : i32
    %c0_i32_0 = arith.constant 0 : i32
    %c0_i32_1 = arith.constant 0 : i32
    return %c0_i32, %c0_i32_0 : i32, i32
  }
  func.func @transform_3(%arg0: i32, %arg1: i32) -> (i32, i32) {
    %c0_i32 = arith.constant 0 : i32
    %c0_i32_0 = arith.constant 0 : i32
    return %arg0, %c0_i32 : i32, i32
  }
}

module attributes {stable_mosaic.version = 11 : i64} {
  func.func @_dueling_head_kernel(%arg0: i32, %arg1: memref<2x512xbf16, #tpu.memory_space<vmem>>, %arg2: memref<2x512xbf16, #tpu.memory_space<vmem>>, %arg3: memref<512x6xbf16, #tpu.memory_space<vmem>>, %arg4: memref<1x6xf32, #tpu.memory_space<vmem>>, %arg5: memref<512x1xbf16, #tpu.memory_space<vmem>>, %arg6: memref<1x1xf32, #tpu.memory_space<vmem>>, %arg7: memref<2x6xf32, #tpu.memory_space<vmem>>) attributes {dimension_semantics = [#tpu.dimension_semantics<arbitrary>], iteration_bounds = array<i64: 1>, scalar_prefetch = 0 : i64, scratch_operands = 0 : i64, tpu.core_type = #tpu.core_type<tc>, window_params = [{pipeline_mode = #tpu.pipeline_mode<synchronous>, transform_indices = @transform_0, window_bounds = array<i64: 2, 512>}, {pipeline_mode = #tpu.pipeline_mode<synchronous>, transform_indices = @transform_1, window_bounds = array<i64: 2, 512>}, {pipeline_mode = #tpu.pipeline_mode<synchronous>, transform_indices = @transform_2, window_bounds = array<i64: 512, 6>}, {pipeline_mode = #tpu.pipeline_mode<synchronous>, transform_indices = @transform_3, window_bounds = array<i64: 1, 6>}, {pipeline_mode = #tpu.pipeline_mode<synchronous>, transform_indices = @transform_4, window_bounds = array<i64: 512, 1>}, {pipeline_mode = #tpu.pipeline_mode<synchronous>, transform_indices = @transform_5, window_bounds = array<i64: 1, 1>}, {pipeline_mode = #tpu.pipeline_mode<synchronous>, transform_indices = @transform_6, window_bounds = array<i64: 2, 6>}]} {
    %c0 = arith.constant 0 : index
    %c0_0 = arith.constant 0 : index
    %0 = vector.load %arg1[%c0, %c0_0] : memref<2x512xbf16, #tpu.memory_space<vmem>>, vector<2x512xbf16>
    %c0_1 = arith.constant 0 : index
    %c0_2 = arith.constant 0 : index
    %1 = vector.load %arg3[%c0_1, %c0_2] : memref<512x6xbf16, #tpu.memory_space<vmem>>, vector<512x6xbf16>
    %cst = arith.constant dense<0.000000e+00> : vector<2x6xf32>
    %2 = tpu.matmul %0, %1, %cst {dimension_numbers = #tpu.dot_dimension_numbers<[1], [0], [0], [1], [0, 0, 1, 1], [], []>} : vector<2x512xbf16>, vector<512x6xbf16>, vector<2x6xf32> -> vector<2x6xf32>
    %c0_3 = arith.constant 0 : index
    %c0_4 = arith.constant 0 : index
    %3 = vector.load %arg4[%c0_3, %c0_4] : memref<1x6xf32, #tpu.memory_space<vmem>>, vector<1x6xf32>
    %4 = vector.broadcast %3 : vector<1x6xf32> to vector<2x6xf32>
    %5 = arith.addf %2, %4 : vector<2x6xf32>
    %c0_5 = arith.constant 0 : index
    %c0_6 = arith.constant 0 : index
    %6 = vector.load %arg2[%c0_5, %c0_6] : memref<2x512xbf16, #tpu.memory_space<vmem>>, vector<2x512xbf16>
    %c0_7 = arith.constant 0 : index
    %c0_8 = arith.constant 0 : index
    %7 = vector.load %arg5[%c0_7, %c0_8] : memref<512x1xbf16, #tpu.memory_space<vmem>>, vector<512x1xbf16>
    %cst_9 = arith.constant dense<0.000000e+00> : vector<2x1xf32>
    %8 = tpu.matmul %6, %7, %cst_9 {dimension_numbers = #tpu.dot_dimension_numbers<[1], [0], [0], [1], [0, 0, 1, 1], [], []>} : vector<2x512xbf16>, vector<512x1xbf16>, vector<2x1xf32> -> vector<2x1xf32>
    %c0_10 = arith.constant 0 : index
    %c0_11 = arith.constant 0 : index
    %9 = vector.load %arg6[%c0_10, %c0_11] : memref<1x1xf32, #tpu.memory_space<vmem>>, vector<1x1xf32>
    %10 = vector.broadcast %9 : vector<1x1xf32> to vector<2x1xf32>
    %11 = arith.addf %8, %10 : vector<2x1xf32>
    %12 = vector.broadcast %11 : vector<2x1xf32> to vector<2x6xf32>
    %13 = arith.addf %12, %5 : vector<2x6xf32>
    %cst_12 = arith.constant dense<0.000000e+00> : vector<2xf32>
    %14 = vector.multi_reduction <add>, %5, %cst_12 [1] : vector<2x6xf32> to vector<2xf32>
    %15 = vector.shape_cast %14 : vector<2xf32> to vector<2x1xf32>
    %cst_13 = arith.constant 6.000000e+00 : f32
    %16 = vector.broadcast %cst_13 : f32 to vector<2x1xf32>
    %17 = arith.divf %15, %16 : vector<2x1xf32>
    %18 = vector.broadcast %17 : vector<2x1xf32> to vector<2x6xf32>
    %19 = arith.subf %13, %18 : vector<2x6xf32>
    %c0_14 = arith.constant 0 : index
    %c0_15 = arith.constant 0 : index
    %20 = vector.load %arg7[%c0_14, %c0_15] : memref<2x6xf32, #tpu.memory_space<vmem>>, vector<2x6xf32>
    tpu.vector_store %arg7[%c0_14, %c0_15], %19 {strides = array<i32>} : memref<2x6xf32, #tpu.memory_space<vmem>>, vector<2x6xf32>,
    return
  }
  func.func @transform_0(%arg0: i32) -> (i32, i32) {
    %c0_i32 = arith.constant 0 : i32
    %c0_i32_0 = arith.constant 0 : i32
    %c0_i32_1 = arith.constant 0 : i32
    return %c0_i32, %c0_i32_0 : i32, i32
  }
  func.func @transform_1(%arg0: i32) -> (i32, i32) {
    %c0_i32 = arith.constant 0 : i32
    %c0_i32_0 = arith.constant 0 : i32
    %c0_i32_1 = arith.constant 0 : i32
    return %c0_i32, %c0_i32_0 : i32, i32
  }
  func.func @transform_2(%arg0: i32) -> (i32, i32) {
    %c0_i32 = arith.constant 0 : i32
    %c0_i32_0 = arith.constant 0 : i32
    %c0_i32_1 = arith.constant 0 : i32
    return %c0_i32, %c0_i32_0 : i32, i32
  }
  func.func @transform_3(%arg0: i32) -> (i32, i32) {
    %c0_i32 = arith.constant 0 : i32
    %c0_i32_0 = arith.constant 0 : i32
    %c0_i32_1 = arith.constant 0 : i32
    return %c0_i32, %c0_i32_0 : i32, i32
  }
  func.func @transform_4(%arg0: i32) -> (i32, i32) {
    %c0_i32 = arith.constant 0 : i32
    %c0_i32_0 = arith.constant 0 : i32
    %c0_i32_1 = arith.constant 0 : i32
    return %c0_i32, %c0_i32_0 : i32, i32
  }
  func.func @transform_5(%arg0: i32) -> (i32, i32) {
    %c0_i32 = arith.constant 0 : i32
    %c0_i32_0 = arith.constant 0 : i32
    %c0_i32_1 = arith.constant 0 : i32
    return %c0_i32, %c0_i32_0 : i32, i32
  }
  func.func @transform_6(%arg0: i32) -> (i32, i32) {
    %c0_i32 = arith.constant 0 : i32
    %c0_i32_0 = arith.constant 0 : i32
    %c0_i32_1 = arith.constant 0 : i32
    return %c0_i32, %c0_i32_0 : i32, i32
  }
}

</mosaic_0001>

<bundles_post_ra>
// kernel: qnetwork_forward.8
= control target key start
LH: loop header
LB: loop body
LE: loop exit
PB: predicated region body
PF: predicated region fallthrough
CT: control target
= control target key end

     0   :  { %s1585_s12 = smov 0   ;;  %s1587_s13 = smov 0   ;;  %s1871_s0 = inlined_call_operand.vmem [shape: bf16[1024,256], index: 0, kind: input, shape index: {}]   ;;  %s1872_s1 = inlined_call_operand.vmem [shape: bf16[256,64], index: 1, kind: input, shape index: {}]   ;;  %s1873_s2 = inlined_call_operand.vmem [shape: f32[1,64], index: 2, kind: input, shape index: {}]   ;;  %s1874_s3 = inlined_call_operand.vmem [shape: bf16[1024,64], index: 3, kind: output, shape index: {}]  }
   0x1   :  { %s1589_s14 = smov 0  }
   0x2 LB: > { %s25_s15 = sadd.s32 1, %s1558_s13  ;;  %p1201_p0 = scmp.ge.s32.totalorder %s1562_s14, 1  ;;  %s1562_s14 = sphi %s1589_s14, %s13_s14   ;;  %s1558_s13 = sphi %s1587_s13, %s1876_s13   ;;  %s1554_s12 = sphi %s1585_s12, %s1875_s12  }
   0x3   : > { %p27_p1 = scmp.ge.s32.totalorder %s25_s15, 4  ;;  %p169_p2 = scmp.lt.s32.totalorder %s1562_s14, 5 }
   0x5   : > { %s1878_s15 = smov (%p27_p1, %s25_s15), 0  ;;  %p170_p3 = pnand %p1201_p0, %p169_p2 }
   0x6   : > { %v1476_v0 = vld [vmem:[%s1872_s1 + $0x40] sm:$0xff] (!%p170_p3)   ;;  %s1202_s18 = sshll.u32 (!%p170_p3), %s1554_s12, 5  ;;  %v1478_v2 = vld [vmem:[%s1872_s1 + $0x48] sm:$0xff] (!%p170_p3)   ;;  %v1480_v4 = vld [vmem:[%s1872_s1 + $0x50] sm:$0xff] (!%p170_p3)   ;;  %vm232_vm0 = vcmask (!%p170_p3), 523264   ;;  %v1564_v48 = vmov (!%p170_p3), 0.0  }
   0x7   : > { %173 = sbr.rel (%p170_p3) target bundleno = 332 (0x14c), region = 32  ;;  %v1477_v1 = vld [vmem:[%s1872_s1] sm:$0xff] (!%p170_p3)   ;;  %1323 = vmatprep.subr.bf16.mxu0 (!%p170_p3), %v1476_v0  ;;  %1435 = vmatprep.subr.bf16.mxu1 (!%p170_p3), %v1476_v0  ;;  %v1479_v3 = vld [vmem:[%s1872_s1 + $0x8] sm:$0xff] (!%p170_p3)   ;;  %p205_p4 = scmp.lt.s32.totalorder (!%p170_p3), %s1202_s18, 127  ;;  %v1481_v5 = vld [vmem:[%s1872_s1 + $0x10] sm:$0xff] (!%p170_p3)   ;;  %233 = vst.msk [vmem:[#allocation2] sm:$0xff] (!%p170_p3), %vm232_vm0, %v1564_v48 }
   0x8   : > { %1324 = vmatpush3.bf16.msra.mxu0 (!%p170_p3), %v1477_v1  ;;  %1443 = vmatpush3.bf16.msra.mxu1 (!%p170_p3), %v1477_v1  ;;  %v1482_v6 = vld [vmem:[%s1872_s1 + $0x58] sm:$0xff] (!%p170_p3)   ;;  %v1484_v8 = vld [vmem:[%s1872_s1 + $0x60] sm:$0xff] (!%p170_p3)   ;;  %v1486_v10 = vld [vmem:[%s1872_s1 + $0x68] sm:$0xff] (!%p170_p3)   ;;  %234 = vst.msk [vmem:[#allocation2 + $0x8] sm:$0xff] (!%p170_p3), %vm232_vm0, %v1564_v48  ;;  %vm1077_vm1 = vcmask (!%p170_p3), 519168  }
   0x9   : > { %1325 = vmatprep.subr.bf16.mxu0 (!%p170_p3), %v1478_v2  ;;  %1436 = vmatprep.subr.bf16.mxu1 (!%p170_p3), %v1478_v2  ;;  %v1483_v7 = vld [vmem:[%s1872_s1 + $0x18] sm:$0xff] (!%p170_p3)   ;;  %v1485_v9 = vld [vmem:[%s1872_s1 + $0x20] sm:$0xff] (!%p170_p3)   ;;  %v1487_v13 = vld [vmem:[%s1872_s1 + $0x28] sm:$0xff] (!%p170_p3)   ;;  %235 = vst.msk [vmem:[#allocation2 + $0x10] sm:$0xff] (!%p170_p3), %vm232_vm0, %v1564_v48 }
   0xa   : > { %v1488_v14 = vld [vmem:[%s1872_s1 + $0x70] sm:$0xff] (!%p170_p3)   ;;  %v1490_v16 = vld [vmem:[%s1872_s1 + $0x78] sm:$0xff] (!%p170_p3)   ;;  %236 = vst.msk [vmem:[#allocation2 + $0x18] sm:$0xff] (!%p170_p3), %vm232_vm0, %v1564_v48  ;;  %237 = vst.msk [vmem:[#allocation2 + $0x20] sm:$0xff] (!%p170_p3), %vm232_vm0, %v1564_v48 }
   0xb   : > { %v1489_v15 = vld [vmem:[%s1872_s1 + $0x30] sm:$0xff] (!%p170_p3)   ;;  %v1491_v17 = vld [vmem:[%s1872_s1 + $0x38] sm:$0xff] (!%p170_p3)   ;;  %238 = vst.msk [vmem:[#allocation2 + $0x28] sm:$0xff] (!%p170_p3), %vm232_vm0, %v1564_v48  ;;  %239 = vst.msk [vmem:[#allocation2 + $0x30] sm:$0xff] (!%p170_p3), %vm232_vm0, %v1564_v48 }
   0xc   : > { %1326 = vmatpush3.bf16.msra.mxu0 (!%p170_p3), %v1479_v3  ;;  %1444 = vmatpush3.bf16.msra.mxu1 (!%p170_p3), %v1479_v3  ;;  %240 = vst.msk [vmem:[#allocation2 + $0x38] sm:$0xff] (!%p170_p3), %vm232_vm0, %v1564_v48  ;;  %241 = vst.msk [vmem:[#allocation2 + $0x40] sm:$0xff] (!%p170_p3), %vm232_vm0, %v1564_v48 }
   0xd   : > { %1327 = vmatprep.subr.bf16.mxu0 (!%p170_p3), %v1480_v4  ;;  %1437 = vmatprep.subr.bf16.mxu1 (!%p170_p3), %v1480_v4  ;;  %242 = vst.msk [vmem:[#allocation2 + $0x48] sm:$0xff] (!%p170_p3), %vm232_vm0, %v1564_v48  ;;  %243 = vst.msk [vmem:[#allocation2 + $0x50] sm:$0xff] (!%p170_p3), %vm232_vm0, %v1564_v48 }
   0xe   : > { %s1880_s18 = smov (!%p205_p4, %s1202_s18), 127  ;;  %244 = vst.msk [vmem:[#allocation2 + $0x58] sm:$0xff] %vm232_vm0, %v1564_v48  ;;  %245 = vst.msk [vmem:[#allocation2 + $0x60] sm:$0xff] %vm232_vm0, %v1564_v48  ;;  %v265_v51 = vld [vmem:[#allocation2] sm:$0xff] }
   0xf   : > { %s1290_s6 = sshll.u32 %s1880_s18, 3  ;;  %246 = vst.msk [vmem:[#allocation2 + $0x68] sm:$0xff] %vm232_vm0, %v1564_v48  ;;  %247 = vst.msk [vmem:[#allocation2 + $0x70] sm:$0xff] %vm232_vm0, %v1564_v48  ;;  %v266_v59 = vld [vmem:[#allocation2 + $0x8] sm:$0xff]  ;;  %s1206_s5 = sshll.u32 %s1880_s18, 2 }
  0x10   : > { %1328 = vmatpush3.bf16.msra.mxu0 %v1481_v5  ;;  %1445 = vmatpush3.bf16.msra.mxu1 %v1481_v5  ;;  %s1636_s11 = scalar_lea.vmem %s1871_s0, %s1290_s6  ;;  %248 = vst.msk [vmem:[#allocation2 + $0x78] sm:$0xff] %vm232_vm0, %v1564_v48  ;;  %249 = vst.msk [vmem:[#allocation2 + $0x80] sm:$0xff] %vm232_vm0, %v1564_v48  ;;  %s1744_s7 = scalar_lea.vmem %s1874_s3, %s1206_s5 }
  0x11   : > { %1329 = vmatprep.subr.bf16.mxu0 %v1482_v6  ;;  %1438 = vmatprep.subr.bf16.mxu1 %v1482_v6  ;;  %v1494_v11 = vld [vmem:[%s1636_s11 + $0x4] ss:$8 sps:$4 sm:$0xff]   ;;  %v1492_v18 = vld [vmem:[%s1636_s11] ss:$8 sps:$4 sm:$0xff]   ;;  %v1498_v20 = vld [vmem:[%s1636_s11 + $0x14] ss:$8 sps:$4 sm:$0xff]  }
  0x12   : > { %v1497_v12 = vld [vmem:[%s1636_s11 + $0x84] ss:$8 sps:$4 sm:$0xff]   ;;  %649 = vmatprep.mubr.bf16.mxu0 %v1494_v11  ;;  %v1495_v19 = vld [vmem:[%s1636_s11 + $0x80] ss:$8 sps:$4 sm:$0xff]   ;;  %v1500_v21 = vld [vmem:[%s1636_s11 + $0x94] ss:$8 sps:$4 sm:$0xff]  }
  0x13   : > { %713 = vmatprep.mubr.bf16.mxu1 %v1497_v12  ;;  %v1502_v22 = vld [vmem:[%s1636_s11 + $0x10] ss:$8 sps:$4 sm:$0xff]   ;;  %v1504_v24 = vld [vmem:[%s1636_s11 + $0x24] ss:$8 sps:$4 sm:$0xff]   ;;  %v1508_v26 = vld [vmem:[%s1636_s11 + $0x20] ss:$8 sps:$4 sm:$0xff]  }
  0x14   : > { %1330 = vmatpush3.bf16.msra.mxu0 %v1483_v7  ;;  %1446 = vmatpush3.bf16.msra.mxu1 %v1483_v7  ;;  %v1503_v23 = vld [vmem:[%s1636_s11 + $0x90] ss:$8 sps:$4 sm:$0xff]   ;;  %v1506_v25 = vld [vmem:[%s1636_s11 + $0xa4] ss:$8 sps:$4 sm:$0xff]   ;;  %v1509_v27 = vld [vmem:[%s1636_s11 + $0xa0] ss:$8 sps:$4 sm:$0xff]  }
  0x15   : > { %1331 = vmatprep.subr.bf16.mxu0 %v1484_v8  ;;  %1439 = vmatprep.subr.bf16.mxu1 %v1484_v8  ;;  %v1510_v28 = vld [vmem:[%s1636_s11 + $0x34] ss:$8 sps:$4 sm:$0xff]   ;;  %v1514_v30 = vld [vmem:[%s1636_s11 + $0x30] ss:$8 sps:$4 sm:$0xff]   ;;  %v1516_v32 = vld [vmem:[%s1636_s11 + $0x44] ss:$8 sps:$4 sm:$0xff]  }
  0x16   : > { %v1512_v29 = vld [vmem:[%s1636_s11 + $0xb4] ss:$8 sps:$4 sm:$0xff]   ;;  %v1515_v31 = vld [vmem:[%s1636_s11 + $0xb0] ss:$8 sps:$4 sm:$0xff]   ;;  %v1518_v33 = vld [vmem:[%s1636_s11 + $0xc4] ss:$8 sps:$4 sm:$0xff]  }
  0x17   : > { %v1520_v34 = vld [vmem:[%s1636_s11 + $0x40] ss:$8 sps:$4 sm:$0xff]   ;;  %v1522_v36 = vld [vmem:[%s1636_s11 + $0x54] ss:$8 sps:$4 sm:$0xff]   ;;  %v1526_v38 = vld [vmem:[%s1636_s11 + $0x50] ss:$8 sps:$4 sm:$0xff]  }
  0x18   : > { %1332 = vmatpush3.bf16.msra.mxu0 %v1485_v9  ;;  %1447 = vmatpush3.bf16.msra.mxu1 %v1485_v9  ;;  %v1521_v35 = vld [vmem:[%s1636_s11 + $0xc0] ss:$8 sps:$4 sm:$0xff]   ;;  %v1524_v37 = vld [vmem:[%s1636_s11 + $0xd4] ss:$8 sps:$4 sm:$0xff]   ;;  %v1527_v39 = vld [vmem:[%s1636_s11 + $0xd0] ss:$8 sps:$4 sm:$0xff]  }
  0x19   : > { %1333 = vmatprep.subr.bf16.mxu0 %v1486_v10  ;;  %1440 = vmatprep.subr.bf16.mxu1 %v1486_v10  ;;  %v1528_v40 = vld [vmem:[%s1636_s11 + $0x64] ss:$8 sps:$4 sm:$0xff]   ;;  %v1532_v42 = vld [vmem:[%s1636_s11 + $0x60] ss:$8 sps:$4 sm:$0xff]   ;;  %v1534_v44 = vld [vmem:[%s1636_s11 + $0x74] ss:$8 sps:$4 sm:$0xff]  }
  0x1a   : > { %v1530_v41 = vld [vmem:[%s1636_s11 + $0xe4] ss:$8 sps:$4 sm:$0xff]   ;;  %v1533_v43 = vld [vmem:[%s1636_s11 + $0xe0] ss:$8 sps:$4 sm:$0xff]   ;;  %v1536_v45 = vld [vmem:[%s1636_s11 + $0xf4] ss:$8 sps:$4 sm:$0xff]  }
  0x1b   : > { %v1538_v46 = vld [vmem:[%s1636_s11 + $0x70] ss:$8 sps:$4 sm:$0xff]   ;;  %250 = vst.msk [vmem:[#allocation2 + $0x88] sm:$0xff] %vm232_vm0, %v1564_v48  ;;  %251 = vst.msk [vmem:[#allocation2 + $0x90] sm:$0xff] %vm232_vm0, %v1564_v48  ;;  %v281_v53 = vld [vmem:[#allocation2 + $0x80] sm:$0xff] }
  0x1c   : > { %1334 = vmatpush3.bf16.msra.mxu0 %v1487_v13  ;;  %1448 = vmatpush3.bf16.msra.mxu1 %v1487_v13  ;;  %v1539_v47 = vld [vmem:[%s1636_s11 + $0xf0] ss:$8 sps:$4 sm:$0xff]   ;;  %252 = vst.msk [vmem:[#allocation2 + $0x98] sm:$0xff] %vm232_vm0, %v1564_v48  ;;  %253 = vst.msk [vmem:[#allocation2 + $0xa0] sm:$0xff] %vm232_vm0, %v1564_v48 }
  0x1d   : > { %1335 = vmatprep.subr.bf16.mxu0 %v1488_v14  ;;  %1441 = vmatprep.subr.bf16.mxu1 %v1488_v14  ;;  %254 = vst.msk [vmem:[#allocation2 + $0xa8] sm:$0xff] %vm232_vm0, %v1564_v48  ;;  %255 = vst.msk [vmem:[#allocation2 + $0xb0] sm:$0xff] %vm232_vm0, %v1564_v48  ;;  %v267_v7 = vld [vmem:[#allocation2 + $0x10] sm:$0xff] }
  0x1e   : > { %256 = vst.msk [vmem:[#allocation2 + $0xb8] sm:$0xff] %vm232_vm0, %v1564_v48  ;;  %257 = vst.msk [vmem:[#allocation2 + $0xc0] sm:$0xff] %vm232_vm0, %v1564_v48 }
  0x1f   : > { %258 = vst.msk [vmem:[#allocation2 + $0xc8] sm:$0xff] %vm232_vm0, %v1564_v48  ;;  %259 = vst.msk [vmem:[#allocation2 + $0xd0] sm:$0xff] %vm232_vm0, %v1564_v48 }
  0x20   : > { %1336 = vmatpush3.bf16.msra.mxu0 %v1489_v15  ;;  %1449 = vmatpush3.bf16.msra.mxu1 %v1489_v15  ;;  %260 = vst.msk [vmem:[#allocation2 + $0xd8] sm:$0xff] %vm232_vm0, %v1564_v48  ;;  %261 = vst.msk [vmem:[#allocation2 + $0xe0] sm:$0xff] %vm232_vm0, %v1564_v48  ;;  %v1730_v15 = vld [vmem:[%s1873_s2] ss:$0 sm:$0xff] }
  0x21   : > { %1337 = vmatprep.subr.bf16.mxu0 %v1490_v16  ;;  %1442 = vmatprep.subr.bf16.mxu1 %v1490_v16  ;;  %262 = vst.msk [vmem:[#allocation2 + $0xe8] sm:$0xff] %vm232_vm0, %v1564_v48  ;;  %263 = vst.msk [vmem:[#allocation2 + $0xf0] sm:$0xff] %vm232_vm0, %v1564_v48  ;;  %v268_v16 = vld [vmem:[#allocation2 + $0x18] sm:$0xff] }
  0x22   : > { %264 = vst.msk [vmem:[#allocation2 + $0xf8] sm:$0xff] %vm232_vm0, %v1564_v48  ;;  %v282_v61 = vld [vmem:[#allocation2 + $0x88] sm:$0xff]  ;;  %v283_v9 = vld [vmem:[#allocation2 + $0x90] sm:$0xff] }
  0x24   : > { %1338 = vmatpush3.bf16.msra.mxu0 %v1491_v17  ;;  %1450 = vmatpush3.bf16.msra.mxu1 %v1491_v17 }
  0x27   : > { %650 = vmatmul.mubr.bf16.vlgmr.msra.gmra.mrb[0].mxu0 %v1492_v18  ;;  %714 = vmatmul.mubr.bf16.vlgmr.msra.gmra.mrb[0].mxu1 %v1495_v19  ;;  %v284_v18 = vld [vmem:[#allocation2 + $0x98] sm:$0xff] }
  0x28   : > { %657 = vmatprep.mubr.bf16.mxu0 %v1498_v20  ;;  %721 = vmatprep.mubr.bf16.mxu1 %v1500_v21 }
  0x2f   : > { %658 = vmatmul.mubr.bf16.gmra.mrb[4].mxu0 %v1502_v22  ;;  %722 = vmatmul.mubr.bf16.gmra.mrb[4].mxu1 %v1503_v23 }
  0x30   : > { %665 = vmatprep.mubr.bf16.mxu0 %v1504_v24  ;;  %729 = vmatprep.mubr.bf16.mxu1 %v1506_v25 }
  0x37   : > { %666 = vmatmul.mubr.bf16.gmra.mrb[8].mxu0 %v1508_v26  ;;  %730 = vmatmul.mubr.bf16.gmra.mrb[8].mxu1 %v1509_v27 }
  0x38   : > { %673 = vmatprep.mubr.bf16.mxu0 %v1510_v28  ;;  %737 = vmatprep.mubr.bf16.mxu1 %v1512_v29 }
  0x3f   : > { %674 = vmatmul.mubr.bf16.gmra.mrb[12].mxu0 %v1514_v30  ;;  %738 = vmatmul.mubr.bf16.gmra.mrb[12].mxu1 %v1515_v31 }
  0x40   : > { %681 = vmatprep.mubr.bf16.mxu0 %v1516_v32  ;;  %745 = vmatprep.mubr.bf16.mxu1 %v1518_v33 }
  0x47   : > { %682 = vmatmul.mubr.bf16.gmra.mrb[16].mxu0 %v1520_v34  ;;  %746 = vmatmul.mubr.bf16.gmra.mrb[16].mxu1 %v1521_v35 }
  0x48   : > { %689 = vmatprep.mubr.bf16.mxu0 %v1522_v36  ;;  %753 = vmatprep.mubr.bf16.mxu1 %v1524_v37 }
  0x4f   : > { %690 = vmatmul.mubr.bf16.gmra.mrb[20].mxu0 %v1526_v38  ;;  %754 = vmatmul.mubr.bf16.gmra.mrb[20].mxu1 %v1527_v39 }
  0x50   : > { %697 = vmatprep.mubr.bf16.mxu0 %v1528_v40  ;;  %761 = vmatprep.mubr.bf16.mxu1 %v1530_v41 }
  0x57   : > { %698 = vmatmul.mubr.bf16.gmra.mrb[24].mxu0 %v1532_v42  ;;  %762 = vmatmul.mubr.bf16.gmra.mrb[24].mxu1 %v1533_v43 }
  0x58   : > { %705 = vmatprep.mubr.bf16.mxu0 %v1534_v44  ;;  %769 = vmatprep.mubr.bf16.mxu1 %v1536_v45  ;;  %v269_v44 = vld [vmem:[#allocation2 + $0x20] sm:$0xff] }
  0x59   : > { %v285_v45 = vld [vmem:[#allocation2 + $0xa0] sm:$0xff] }
  0x5f   : > { %706 = vmatmul.mubr.bf16.gmra.mrb[28].mxu0 %v1538_v46  ;;  %770 = vmatmul.mubr.bf16.gmra.mrb[28].mxu1 %v1539_v47 }
  0xfa   : > { %v1339_v49 = vpop.f32.mrb[0].mxu0  ;;  %v1387_v50 = vpop.f32.mrb[0].mxu1 }
  0xfb   : > { %v1340_v52 = vpop.f32.mrb[1].mxu0  ;;  %v1388_v54 = vpop.f32.mrb[1].mxu1 }
  0xfc   : > { %v1341_v55 = vadd.f32 %v1340_v52, %v1339_v49  ;;  %v1389_v56 = vadd.f32 %v1388_v54, %v1387_v50  ;;  %v1342_v57 = vpop.f32.mrb[2].mxu0  ;;  %v1390_v58 = vpop.f32.mrb[2].mxu1  ;;  %v270_v50 = vld [vmem:[#allocation2 + $0x28] sm:$0xff] }
  0xfd   : > { %v1343_v60 = vpop.f32.mrb[3].mxu0  ;;  %v1391_v62 = vpop.f32.mrb[3].mxu1  ;;  %v286_v52 = vld [vmem:[#allocation2 + $0xa8] sm:$0xff] }
  0xfe   : > { %v778_v63 = vadd.f32 %v1341_v55, %v265_v51  ;;  %v794_v0 = vadd.f32 %v1389_v56, %v281_v53  ;;  %v1344_v1 = vadd.f32 %v1343_v60, %v1342_v57  ;;  %v1392_v2 = vadd.f32 %v1391_v62, %v1390_v58 }
 0x100   : > { %811 = vst.msk [vmem:[#allocation2] sm:$0xff] %vm232_vm0, %v778_v63  ;;  %827 = vst.msk [vmem:[#allocation2 + $0x80] sm:$0xff] %vm232_vm0, %v794_v0  ;;  %v779_v3 = vadd.f32 %v1344_v1, %v266_v59  ;;  %v795_v4 = vadd.f32 %v1392_v2, %v282_v61 }
 0x102   : > { %812 = vst.msk [vmem:[#allocation2 + $0x8] sm:$0xff] %vm232_vm0, %v779_v3  ;;  %828 = vst.msk [vmem:[#allocation2 + $0x88] sm:$0xff] %vm232_vm0, %v795_v4  ;;  %v1345_v5 = vpop.f32.mrb[4].mxu0  ;;  %v1393_v6 = vpop.f32.mrb[4].mxu1 }
 0x103   : > { %v1346_v8 = vpop.f32.mrb[5].mxu0  ;;  %v1394_v10 = vpop.f32.mrb[5].mxu1 }
 0x104   : > { %v1347_v11 = vadd.f32 %v1346_v8, %v1345_v5  ;;  %v1395_v12 = vadd.f32 %v1394_v10, %v1393_v6  ;;  %v1348_v13 = vpop.f32.mrb[6].mxu0  ;;  %v1396_v14 = vpop.f32.mrb[6].mxu1 }
 0x105   : > { %v1349_v17 = vpop.f32.mrb[7].mxu0  ;;  %v1397_v19 = vpop.f32.mrb[7].mxu1 }
 0x106   : > { %v780_v20 = vadd.f32 %v1347_v11, %v267_v7  ;;  %v796_v21 = vadd.f32 %v1395_v12, %v283_v9  ;;  %v1350_v22 = vadd.f32 %v1349_v17, %v1348_v13  ;;  %v1398_v23 = vadd.f32 %v1397_v19, %v1396_v14  ;;  %v271_v17 = vld [vmem:[#allocation2 + $0x30] sm:$0xff] }
 0x107   : > { %v846_v24 = vld [vmem:[#allocation2] sm:$0xff] }
 0x108   : > { %v862_v25 = vld [vmem:[#allocation2 + $0x80] sm:$0xff]  ;;  %v885_v26 = vadd.f32 %v1730_v15, %v846_v24  ;;  %813 = vst.msk [vmem:[#allocation2 + $0x10] sm:$0xff] %vm232_vm0, %v780_v20  ;;  %829 = vst.msk [vmem:[#allocation2 + $0x90] sm:$0xff] %vm232_vm0, %v796_v21  ;;  %v781_v28 = vadd.f32 %v1350_v22, %v268_v16  ;;  %v797_v29 = vadd.f32 %v1398_v23, %v284_v18  ;;  %v287_v18 = vld [vmem:[#allocation2 + $0xb0] sm:$0xff] }
 0x109   : > { %v901_v27 = vadd.f32 %v1730_v15, %v862_v25  ;;  %v847_v30 = vld [vmem:[#allocation2 + $0x8] sm:$0xff]  ;;  %v272_v23 = vld [vmem:[#allocation2 + $0x38] sm:$0xff] }
 0x10a   : > { %v863_v31 = vld [vmem:[#allocation2 + $0x88] sm:$0xff]  ;;  %v917_v32 = vmax.f32 %v885_v26, 0.0  ;;  %v886_v34 = vadd.f32 %v1730_v15, %v847_v30  ;;  %814 = vst.msk [vmem:[#allocation2 + $0x18] sm:$0xff] %vm232_vm0, %v781_v28  ;;  %830 = vst.msk [vmem:[#allocation2 + $0x98] sm:$0xff] %vm232_vm0, %v797_v29  ;;  %v1351_v36 = vpop.f32.mrb[8].mxu0  ;;  %v1399_v37 = vpop.f32.mrb[8].mxu1 }
 0x10b   : > { %v933_v33 = vmax.f32 %v901_v27, 0.0  ;;  %v902_v35 = vadd.f32 %v1730_v15, %v863_v31  ;;  %v1352_v38 = vpop.f32.mrb[9].mxu0  ;;  %v1400_v39 = vpop.f32.mrb[9].mxu1  ;;  %v288_v25 = vld [vmem:[#allocation2 + $0xb8] sm:$0xff] }
 0x10c   : > { %v1291_v40 = vpack.c.bf16 %v917_v32, %v917_v32  ;;  %v918_v42 = vmax.f32 %v886_v34, 0.0  ;;  %v1354_v46 = vpop.f32.mrb[10].mxu0  ;;  %v1402_v47 = vpop.f32.mrb[10].mxu1  ;;  %v1353_v48 = vadd.f32 %v1352_v38, %v1351_v36  ;;  %v1401_v49 = vadd.f32 %v1400_v39, %v1399_v37 }
 0x10d   : > { %v1307_v41 = vpack.c.bf16 %v933_v33, %v933_v33  ;;  %v934_v43 = vmax.f32 %v902_v35, 0.0  ;;  %v1355_v51 = vpop.f32.mrb[11].mxu0  ;;  %v1403_v53 = vpop.f32.mrb[11].mxu1 }
 0x10e   : > { %1078 = vst.msk [vmem:[%s1744_s7] sm:$0xf] %vm1077_vm1, %v1291_v40  ;;  %v1292_v54 = vpack.c.bf16 %v918_v42, %v918_v42  ;;  %v1356_v56 = vadd.f32 %v1355_v51, %v1354_v46  ;;  %v1404_v57 = vadd.f32 %v1403_v53, %v1402_v47  ;;  %v782_v60 = vadd.f32 %v1353_v48, %v269_v44  ;;  %v273_v47 = vld [vmem:[#allocation2 + $0x40] sm:$0xff] }
 0x10f   : > { %1094 = vst.msk [vmem:[%s1744_s7 + $0x40] sm:$0xf] %vm1077_vm1, %v1307_v41  ;;  %v1308_v55 = vpack.c.bf16 %v934_v43, %v934_v43  ;;  %v848_v58 = vld [vmem:[#allocation2 + $0x10] sm:$0xff]  ;;  %v798_v61 = vadd.f32 %v1401_v49, %v285_v45  ;;  %v289_v49 = vld [vmem:[#allocation2 + $0xc0] sm:$0xff] }
 0x110   : > { %v864_v59 = vld [vmem:[#allocation2 + $0x90] sm:$0xff]  ;;  %1079 = vst.msk [vmem:[%s1744_s7 + $0x4] sm:$0xf] %vm1077_vm1, %v1292_v54  ;;  %v887_v62 = vadd.f32 %v1730_v15, %v848_v58  ;;  %v783_v0 = vadd.f32 %v1356_v56, %v270_v50  ;;  %v799_v1 = vadd.f32 %v1404_v57, %v286_v52 }
 0x111   : > { %1095 = vst.msk [vmem:[%s1744_s7 + $0x44] sm:$0xf] %vm1077_vm1, %v1308_v55  ;;  %v903_v63 = vadd.f32 %v1730_v15, %v864_v59  ;;  %v849_v2 = vld [vmem:[#allocation2 + $0x18] sm:$0xff] }
 0x112   : > { %v865_v3 = vld [vmem:[#allocation2 + $0x98] sm:$0xff]  ;;  %815 = vst.msk [vmem:[#allocation2 + $0x20] sm:$0xff] %vm232_vm0, %v782_v60  ;;  %831 = vst.msk [vmem:[#allocation2 + $0xa0] sm:$0xff] %vm232_vm0, %v798_v61  ;;  %v919_v4 = vmax.f32 %v887_v62, 0.0  ;;  %v888_v6 = vadd.f32 %v1730_v15, %v849_v2  ;;  %v1357_v8 = vpop.f32.mrb[12].mxu0  ;;  %v1405_v9 = vpop.f32.mrb[12].mxu1 }
 0x113   : > { %v935_v5 = vmax.f32 %v903_v63, 0.0  ;;  %v904_v7 = vadd.f32 %v1730_v15, %v865_v3  ;;  %816 = vst.msk [vmem:[#allocation2 + $0x28] sm:$0xff] %vm232_vm0, %v783_v0  ;;  %832 = vst.msk [vmem:[#allocation2 + $0xa8] sm:$0xff] %vm232_vm0, %v799_v1  ;;  %v1358_v10 = vpop.f32.mrb[13].mxu0  ;;  %v1406_v11 = vpop.f32.mrb[13].mxu1  ;;  %v274_v1 = vld [vmem:[#allocation2 + $0x48] sm:$0xff] }
 0x114   : > { %v1293_v12 = vpack.c.bf16 %v919_v4, %v919_v4  ;;  %v920_v14 = vmax.f32 %v888_v6, 0.0  ;;  %v1360_v19 = vpop.f32.mrb[14].mxu0  ;;  %v1408_v20 = vpop.f32.mrb[14].mxu1  ;;  %v1359_v21 = vadd.f32 %v1358_v10, %v1357_v8  ;;  %v1407_v22 = vadd.f32 %v1406_v11, %v1405_v9  ;;  %v290_v2 = vld [vmem:[#allocation2 + $0xc8] sm:$0xff] }
 0x115   : > { %v1309_v13 = vpack.c.bf16 %v935_v5, %v935_v5  ;;  %v936_v16 = vmax.f32 %v904_v7, 0.0  ;;  %v1361_v24 = vpop.f32.mrb[15].mxu0  ;;  %v1409_v26 = vpop.f32.mrb[15].mxu1 }
 0x116   : > { %1080 = vst.msk [vmem:[%s1744_s7 + $0x8] sm:$0xf] %vm1077_vm1, %v1293_v12  ;;  %v1294_v27 = vpack.c.bf16 %v920_v14, %v920_v14  ;;  %v1362_v29 = vadd.f32 %v1361_v24, %v1360_v19  ;;  %v1410_v30 = vadd.f32 %v1409_v26, %v1408_v20  ;;  %v784_v31 = vadd.f32 %v1359_v21, %v271_v17  ;;  %v275_v20 = vld [vmem:[#allocation2 + $0x50] sm:$0xff] }
 0x117   : > { %1096 = vst.msk [vmem:[%s1744_s7 + $0x48] sm:$0xf] %vm1077_vm1, %v1309_v13  ;;  %v1310_v28 = vpack.c.bf16 %v936_v16, %v936_v16  ;;  %v800_v32 = vadd.f32 %v1407_v22, %v287_v18  ;;  %v291_v22 = vld [vmem:[#allocation2 + $0xd0] sm:$0xff] }
 0x118   : > { %1081 = vst.msk [vmem:[%s1744_s7 + $0xc] sm:$0xf] %vm1077_vm1, %v1294_v27  ;;  %v785_v35 = vadd.f32 %v1362_v29, %v272_v23  ;;  %v801_v36 = vadd.f32 %v1410_v30, %v288_v25 }
 0x119   : > { %1097 = vst.msk [vmem:[%s1744_s7 + $0x4c] sm:$0xf] %vm1077_vm1, %v1310_v28  ;;  %v850_v33 = vld [vmem:[#allocation2 + $0x20] sm:$0xff] }
 0x11a   : > { %v866_v34 = vld [vmem:[#allocation2 + $0xa0] sm:$0xff]  ;;  %v889_v37 = vadd.f32 %v1730_v15, %v850_v33  ;;  %v851_v39 = vld [vmem:[#allocation2 + $0x28] sm:$0xff]  ;;  %817 = vst.msk [vmem:[#allocation2 + $0x30] sm:$0xff] %vm232_vm0, %v784_v31  ;;  %833 = vst.msk [vmem:[#allocation2 + $0xb0] sm:$0xff] %vm232_vm0, %v800_v32  ;;  %v1363_v43 = vpop.f32.mrb[16].mxu0  ;;  %v1411_v44 = vpop.f32.mrb[16].mxu1 }
 0x11b   : > { %v905_v38 = vadd.f32 %v1730_v15, %v866_v34  ;;  %v867_v40 = vld [vmem:[#allocation2 + $0xa8] sm:$0xff]  ;;  %v890_v41 = vadd.f32 %v1730_v15, %v851_v39  ;;  %818 = vst.msk [vmem:[#allocation2 + $0x38] sm:$0xff] %vm232_vm0, %v785_v35  ;;  %834 = vst.msk [vmem:[#allocation2 + $0xb8] sm:$0xff] %vm232_vm0, %v801_v36  ;;  %v1364_v48 = vpop.f32.mrb[17].mxu0  ;;  %v1412_v50 = vpop.f32.mrb[17].mxu1  ;;  %v292_v39 = vld [vmem:[#allocation2 + $0xd8] sm:$0xff] }
 0x11c   : > { %v906_v42 = vadd.f32 %v1730_v15, %v867_v40  ;;  %v921_v45 = vmax.f32 %v889_v37, 0.0  ;;  %v1365_v53 = vadd.f32 %v1364_v48, %v1363_v43  ;;  %v1413_v54 = vadd.f32 %v1412_v50, %v1411_v44  ;;  %v1366_v55 = vpop.f32.mrb[18].mxu0  ;;  %v1414_v56 = vpop.f32.mrb[18].mxu1 }
 0x11d   : > { %v937_v46 = vmax.f32 %v905_v38, 0.0  ;;  %v922_v51 = vmax.f32 %v890_v41, 0.0  ;;  %v1367_v59 = vpop.f32.mrb[19].mxu0  ;;  %v1415_v60 = vpop.f32.mrb[19].mxu1  ;;  %v276_v38 = vld [vmem:[#allocation2 + $0x58] sm:$0xff] }
 0x11e   : > { %v938_v52 = vmax.f32 %v906_v42, 0.0  ;;  %v1295_v57 = vpack.c.bf16 %v921_v45, %v921_v45  ;;  %v786_v63 = vadd.f32 %v1365_v53, %v273_v47  ;;  %v802_v0 = vadd.f32 %v1413_v54, %v289_v49 }
 0x11f   : > { %v1311_v58 = vpack.c.bf16 %v937_v46, %v937_v46  ;;  %v1296_v61 = vpack.c.bf16 %v922_v51, %v922_v51  ;;  %v1368_v3 = vadd.f32 %v1367_v59, %v1366_v55  ;;  %v1416_v4 = vadd.f32 %v1415_v60, %v1414_v56  ;;  %v277_v56 = vld [vmem:[#allocation2 + $0x60] sm:$0xff] }
 0x120   : > { %v1312_v62 = vpack.c.bf16 %v938_v52, %v938_v52  ;;  %1082 = vst.msk [vmem:[%s1744_s7 + $0x10] sm:$0xf] %vm1077_vm1, %v1295_v57 }
 0x121   : > { %1098 = vst.msk [vmem:[%s1744_s7 + $0x50] sm:$0xf] %vm1077_vm1, %v1311_v58  ;;  %1083 = vst.msk [vmem:[%s1744_s7 + $0x14] sm:$0xf] %vm1077_vm1, %v1296_v61  ;;  %v852_v5 = vld [vmem:[#allocation2 + $0x30] sm:$0xff]  ;;  %v787_v11 = vadd.f32 %v1368_v3, %v274_v1  ;;  %v803_v12 = vadd.f32 %v1416_v4, %v290_v2  ;;  %v293_v58 = vld [vmem:[#allocation2 + $0xe0] sm:$0xff] }
 0x122   : > { %1099 = vst.msk [vmem:[%s1744_s7 + $0x54] sm:$0xf] %vm1077_vm1, %v1312_v62  ;;  %v868_v6 = vld [vmem:[#allocation2 + $0xb0] sm:$0xff]  ;;  %v891_v7 = vadd.f32 %v1730_v15, %v852_v5  ;;  %v853_v9 = vld [vmem:[#allocation2 + $0x38] sm:$0xff]  ;;  %v1369_v16 = vpop.f32.mrb[20].mxu0  ;;  %v1417_v17 = vpop.f32.mrb[20].mxu1 }
 0x123   : > { %819 = vst.msk [vmem:[#allocation2 + $0x40] sm:$0xff] %vm232_vm0, %v786_v63  ;;  %835 = vst.msk [vmem:[#allocation2 + $0xc0] sm:$0xff] %vm232_vm0, %v802_v0  ;;  %v907_v8 = vadd.f32 %v1730_v15, %v868_v6  ;;  %v869_v10 = vld [vmem:[#allocation2 + $0xb8] sm:$0xff]  ;;  %v892_v13 = vadd.f32 %v1730_v15, %v853_v9  ;;  %v1370_v21 = vpop.f32.mrb[21].mxu0  ;;  %v1418_v23 = vpop.f32.mrb[21].mxu1  ;;  %v278_v4 = vld [vmem:[#allocation2 + $0x68] sm:$0xff] }
 0x124   : > { %v908_v14 = vadd.f32 %v1730_v15, %v869_v10  ;;  %v923_v18 = vmax.f32 %v891_v7, 0.0  ;;  %820 = vst.msk [vmem:[#allocation2 + $0x48] sm:$0xff] %vm232_vm0, %v787_v11  ;;  %836 = vst.msk [vmem:[#allocation2 + $0xc8] sm:$0xff] %vm232_vm0, %v803_v12  ;;  %v1371_v26 = vadd.f32 %v1370_v21, %v1369_v16  ;;  %v1419_v27 = vadd.f32 %v1418_v23, %v1417_v17  ;;  %v1372_v28 = vpop.f32.mrb[22].mxu0  ;;  %v1420_v29 = vpop.f32.mrb[22].mxu1  ;;  %v294_v6 = vld [vmem:[#allocation2 + $0xe8] sm:$0xff] }
 0x125   : > { %v939_v19 = vmax.f32 %v907_v8, 0.0  ;;  %v924_v24 = vmax.f32 %v892_v13, 0.0  ;;  %v1373_v32 = vpop.f32.mrb[23].mxu0  ;;  %v1421_v33 = vpop.f32.mrb[23].mxu1 }
 0x126   : > { %v940_v25 = vmax.f32 %v908_v14, 0.0  ;;  %v1297_v30 = vpack.c.bf16 %v923_v18, %v923_v18  ;;  %v788_v36 = vadd.f32 %v1371_v26, %v275_v20  ;;  %v804_v37 = vadd.f32 %v1419_v27, %v291_v22 }
 0x127   : > { %v1313_v31 = vpack.c.bf16 %v939_v19, %v939_v19  ;;  %v1298_v34 = vpack.c.bf16 %v924_v24, %v924_v24  ;;  %v1374_v42 = vadd.f32 %v1373_v32, %v1372_v28  ;;  %v1422_v43 = vadd.f32 %v1421_v33, %v1420_v29  ;;  %v279_v29 = vld [vmem:[#allocation2 + $0x70] sm:$0xff] }
 0x128   : > { %v1314_v35 = vpack.c.bf16 %v940_v25, %v940_v25  ;;  %1084 = vst.msk [vmem:[%s1744_s7 + $0x18] sm:$0xf] %vm1077_vm1, %v1297_v30 }
 0x129   : > { %1100 = vst.msk [vmem:[%s1744_s7 + $0x58] sm:$0xf] %vm1077_vm1, %v1313_v31  ;;  %1085 = vst.msk [vmem:[%s1744_s7 + $0x1c] sm:$0xf] %vm1077_vm1, %v1298_v34  ;;  %v789_v46 = vadd.f32 %v1374_v42, %v276_v38  ;;  %v805_v47 = vadd.f32 %v1422_v43, %v292_v39  ;;  %v295_v31 = vld [vmem:[#allocation2 + $0xf0] sm:$0xff]  ;;  %v296_v43 = vld [vmem:[#allocation2 + $0xf8] sm:$0xff] }
 0x12a   : > { %v854_v40 = vld [vmem:[#allocation2 + $0x40] sm:$0xff]  ;;  %1101 = vst.msk [vmem:[%s1744_s7 + $0x5c] sm:$0xf] %vm1077_vm1, %v1314_v35  ;;  %v1375_v52 = vpop.f32.mrb[24].mxu0  ;;  %v1423_v53 = vpop.f32.mrb[24].mxu1 }
 0x12b   : > { %v870_v41 = vld [vmem:[#allocation2 + $0xc0] sm:$0xff]  ;;  %v893_v44 = vadd.f32 %v1730_v15, %v854_v40  ;;  %821 = vst.msk [vmem:[#allocation2 + $0x50] sm:$0xff] %vm232_vm0, %v788_v36  ;;  %837 = vst.msk [vmem:[#allocation2 + $0xd0] sm:$0xff] %vm232_vm0, %v804_v37  ;;  %v855_v50 = vld [vmem:[#allocation2 + $0x48] sm:$0xff]  ;;  %v1376_v57 = vpop.f32.mrb[25].mxu0  ;;  %v1424_v59 = vpop.f32.mrb[25].mxu1 }
 0x12c   : > { %v909_v45 = vadd.f32 %v1730_v15, %v870_v41  ;;  %v871_v51 = vld [vmem:[#allocation2 + $0xc8] sm:$0xff]  ;;  %v894_v54 = vadd.f32 %v1730_v15, %v855_v50  ;;  %822 = vst.msk [vmem:[#allocation2 + $0x58] sm:$0xff] %vm232_vm0, %v789_v46  ;;  %838 = vst.msk [vmem:[#allocation2 + $0xd8] sm:$0xff] %vm232_vm0, %v805_v47  ;;  %v1377_v62 = vadd.f32 %v1376_v57, %v1375_v52  ;;  %v1378_v0 = vpop.f32.mrb[26].mxu0  ;;  %v1426_v1 = vpop.f32.mrb[26].mxu1  ;;  %v280_v41 = vld [vmem:[#allocation2 + $0x78] sm:$0xff] }
 0x12d   : > { %v925_v48 = vmax.f32 %v893_v44, 0.0  ;;  %v910_v55 = vadd.f32 %v1730_v15, %v871_v51  ;;  %v1425_v63 = vadd.f32 %v1424_v59, %v1423_v53  ;;  %v1379_v5 = vpop.f32.mrb[27].mxu0  ;;  %v1427_v7 = vpop.f32.mrb[27].mxu1 }
 0x12e   : > { %v941_v49 = vmax.f32 %v909_v45, 0.0  ;;  %v926_v2 = vmax.f32 %v894_v54, 0.0  ;;  %v790_v8 = vadd.f32 %v1377_v62, %v277_v56  ;;  %v1380_v10 = vadd.f32 %v1379_v5, %v1378_v0 }
 0x12f   : > { %v1299_v60 = vpack.c.bf16 %v925_v48, %v925_v48  ;;  %v942_v3 = vmax.f32 %v910_v55, 0.0  ;;  %v806_v9 = vadd.f32 %v1425_v63, %v293_v58  ;;  %v1428_v11 = vadd.f32 %v1427_v7, %v1426_v1 }
 0x130   : > { %v1315_v61 = vpack.c.bf16 %v941_v49, %v941_v49  ;;  %v1300_v12 = vpack.c.bf16 %v926_v2, %v926_v2  ;;  %823 = vst.msk [vmem:[#allocation2 + $0x60] sm:$0xff] %vm232_vm0, %v790_v8  ;;  %v791_v19 = vadd.f32 %v1380_v10, %v278_v4 }
 0x131   : > { %1086 = vst.msk [vmem:[%s1744_s7 + $0x20] sm:$0xf] %vm1077_vm1, %v1299_v60  ;;  %v1316_v13 = vpack.c.bf16 %v942_v3, %v942_v3  ;;  %v807_v20 = vadd.f32 %v1428_v11, %v294_v6 }
 0x132   : > { %1102 = vst.msk [vmem:[%s1744_s7 + $0x60] sm:$0xf] %vm1077_vm1, %v1315_v61  ;;  %v856_v14 = vld [vmem:[#allocation2 + $0x50] sm:$0xff]  ;;  %1087 = vst.msk [vmem:[%s1744_s7 + $0x24] sm:$0xf] %vm1077_vm1, %v1300_v12  ;;  %v1381_v25 = vpop.f32.mrb[28].mxu0 }
 0x133   : > { %v872_v16 = vld [vmem:[#allocation2 + $0xd0] sm:$0xff]  ;;  %v895_v17 = vadd.f32 %v1730_v15, %v856_v14  ;;  %839 = vst.msk [vmem:[#allocation2 + $0xe0] sm:$0xff] %vm232_vm0, %v806_v9  ;;  %v857_v23 = vld [vmem:[#allocation2 + $0x58] sm:$0xff]  ;;  %824 = vst.msk [vmem:[#allocation2 + $0x68] sm:$0xff] %vm232_vm0, %v791_v19  ;;  %v1429_v26 = vpop.f32.mrb[28].mxu1  ;;  %v1382_v30 = vpop.f32.mrb[29].mxu0 }
 0x134   : > { %v911_v18 = vadd.f32 %v1730_v15, %v872_v16  ;;  %1103 = vst.msk [vmem:[%s1744_s7 + $0x64] sm:$0xf] %vm1077_vm1, %v1316_v13  ;;  %v873_v24 = vld [vmem:[#allocation2 + $0xd8] sm:$0xff]  ;;  %v896_v27 = vadd.f32 %v1730_v15, %v857_v23  ;;  %v1430_v32 = vpop.f32.mrb[29].mxu1  ;;  %v1383_v35 = vadd.f32 %v1382_v30, %v1381_v25  ;;  %v1384_v37 = vpop.f32.mrb[30].mxu0 }
 0x135   : > { %v927_v21 = vmax.f32 %v895_v17, 0.0  ;;  %840 = vst.msk [vmem:[#allocation2 + $0xe8] sm:$0xff] %vm232_vm0, %v807_v20  ;;  %v912_v28 = vadd.f32 %v1730_v15, %v873_v24  ;;  %v1431_v36 = vadd.f32 %v1430_v32, %v1429_v26  ;;  %v1432_v38 = vpop.f32.mrb[30].mxu1  ;;  %v1385_v42 = vpop.f32.mrb[31].mxu0 }
 0x136   : > { %v943_v22 = vmax.f32 %v911_v18, 0.0  ;;  %v928_v39 = vmax.f32 %v896_v27, 0.0  ;;  %v1433_v44 = vpop.f32.mrb[31].mxu1  ;;  %v792_v45 = vadd.f32 %v1383_v35, %v279_v29  ;;  %v1386_v47 = vadd.f32 %v1385_v42, %v1384_v37 }
 0x137   : > { %v1301_v33 = vpack.c.bf16 %v927_v21, %v927_v21  ;;  %v944_v40 = vmax.f32 %v912_v28, 0.0  ;;  %v808_v46 = vadd.f32 %v1431_v36, %v295_v31  ;;  %v1434_v48 = vadd.f32 %v1433_v44, %v1432_v38  ;;  %v858_v51 = vld [vmem:[#allocation2 + $0x60] sm:$0xff] }
 0x138   : > { %v1317_v34 = vpack.c.bf16 %v943_v22, %v943_v22  ;;  %v1302_v49 = vpack.c.bf16 %v928_v39, %v928_v39  ;;  %v897_v53 = vadd.f32 %v1730_v15, %v858_v51  ;;  %825 = vst.msk [vmem:[#allocation2 + $0x70] sm:$0xff] %vm232_vm0, %v792_v45  ;;  %v793_v55 = vadd.f32 %v1386_v47, %v280_v41 }
 0x139   : > { %1088 = vst.msk [vmem:[%s1744_s7 + $0x28] sm:$0xf] %vm1077_vm1, %v1301_v33  ;;  %v1318_v50 = vpack.c.bf16 %v944_v40, %v944_v40  ;;  %v809_v56 = vadd.f32 %v1434_v48, %v296_v43 }
 0x13a   : > { %1104 = vst.msk [vmem:[%s1744_s7 + $0x68] sm:$0xf] %vm1077_vm1, %v1317_v34  ;;  %v874_v52 = vld [vmem:[#allocation2 + $0xe0] sm:$0xff]  ;;  %1089 = vst.msk [vmem:[%s1744_s7 + $0x2c] sm:$0xf] %vm1077_vm1, %v1302_v49  ;;  %v859_v57 = vld [vmem:[#allocation2 + $0x68] sm:$0xff] }
 0x13b   : > { %v913_v54 = vadd.f32 %v1730_v15, %v874_v52  ;;  %841 = vst.msk [vmem:[#allocation2 + $0xf0] sm:$0xff] %vm232_vm0, %v808_v46  ;;  %v929_v59 = vmax.f32 %v897_v53, 0.0  ;;  %v898_v61 = vadd.f32 %v1730_v15, %v859_v57  ;;  %826 = vst.msk [vmem:[#allocation2 + $0x78] sm:$0xff] %vm232_vm0, %v793_v55 }
 0x13c   : > { %1105 = vst.msk [vmem:[%s1744_s7 + $0x6c] sm:$0xf] %vm1077_vm1, %v1318_v50  ;;  %v875_v58 = vld [vmem:[#allocation2 + $0xe8] sm:$0xff] }
 0x13d   : > { %v945_v60 = vmax.f32 %v913_v54, 0.0  ;;  %v914_v62 = vadd.f32 %v1730_v15, %v875_v58  ;;  %842 = vst.msk [vmem:[#allocation2 + $0xf8] sm:$0xff] %vm232_vm0, %v809_v56  ;;  %v1303_v63 = vpack.c.bf16 %v929_v59, %v929_v59  ;;  %v930_v1 = vmax.f32 %v898_v61, 0.0 }
 0x13f   : > { %v1319_v0 = vpack.c.bf16 %v945_v60, %v945_v60  ;;  %v946_v2 = vmax.f32 %v914_v62, 0.0  ;;  %1090 = vst.msk [vmem:[%s1744_s7 + $0x30] sm:$0xf] %vm1077_vm1, %v1303_v63  ;;  %v1304_v3 = vpack.c.bf16 %v930_v1, %v930_v1  ;;  %v860_v5 = vld [vmem:[#allocation2 + $0x70] sm:$0xff] }
 0x140   : > { %v899_v7 = vadd.f32 %v1730_v15, %v860_v5 }
 0x141   : > { %1106 = vst.msk [vmem:[%s1744_s7 + $0x70] sm:$0xf] %vm1077_vm1, %v1319_v0  ;;  %v1320_v4 = vpack.c.bf16 %v946_v2, %v946_v2  ;;  %1091 = vst.msk [vmem:[%s1744_s7 + $0x34] sm:$0xf] %vm1077_vm1, %v1304_v3 }
 0x142   : > { %v876_v6 = vld [vmem:[#allocation2 + $0xf0] sm:$0xff]  ;;  %v861_v9 = vld [vmem:[#allocation2 + $0x78] sm:$0xff]  ;;  %v931_v11 = vmax.f32 %v899_v7, 0.0 }
 0x143   : > { %1107 = vst.msk [vmem:[%s1744_s7 + $0x74] sm:$0xf] %vm1077_vm1, %v1320_v4  ;;  %v915_v8 = vadd.f32 %v1730_v15, %v876_v6  ;;  %v900_v13 = vadd.f32 %v1730_v15, %v861_v9 }
 0x144   : > { %v877_v10 = vld [vmem:[#allocation2 + $0xf8] sm:$0xff]  ;;  %v1305_v16 = vpack.c.bf16 %v931_v11, %v931_v11 }
 0x145   : > { %v947_v12 = vmax.f32 %v915_v8, 0.0  ;;  %v916_v14 = vadd.f32 %v1730_v15, %v877_v10  ;;  %v932_v18 = vmax.f32 %v900_v13, 0.0 }
 0x146   : > { %1092 = vst.msk [vmem:[%s1744_s7 + $0x38] sm:$0xf] %vm1077_vm1, %v1305_v16 }
 0x147   : > { %v1321_v17 = vpack.c.bf16 %v947_v12, %v947_v12  ;;  %v948_v19 = vmax.f32 %v916_v14, 0.0  ;;  %v1306_v20 = vpack.c.bf16 %v932_v18, %v932_v18 }
 0x149   : > { %1108 = vst.msk [vmem:[%s1744_s7 + $0x78] sm:$0xf] %vm1077_vm1, %v1321_v17  ;;  %v1322_v21 = vpack.c.bf16 %v948_v19, %v948_v19  ;;  %1093 = vst.msk [vmem:[%s1744_s7 + $0x3c] sm:$0xf] %vm1077_vm1, %v1306_v20 }
 0x14b   : > { %1109 = vst.msk [vmem:[%s1744_s7 + $0x7c] sm:$0xf] %vm1077_vm1, %v1322_v21 }
 0x14c PF: > { %s13_s14 = sadd.s32 1, %s1562_s14   ;;  %s1875_s12 = smov %s1558_s13 }
 0x14d   : > { %p10_p5 = scmp.ge.s32.totalorder %s13_s14, 6   ;;  %s1876_s13 = smov %s1878_s15 }
 0x14f   :  { %12 = sbr.rel (!%p10_p5) target bundleno = 2 (0x2), region = 73 }

// kernel: qnetwork_forward.12
= control target key start
LH: loop header
LB: loop body
LE: loop exit
PB: predicated region body
PF: predicated region fallthrough
CT: control target
= control target key end

     0   :  { %vm19_vm0 = vcmask 523264   ;;  %vm1035_vm1 = vcmask 519168   ;;  %s1854_s1 = inlined_call_operand.vmem [shape: bf16[512,64], index: 1, kind: input, shape index: {}]   ;;  %s1855_s0 = inlined_call_operand.vmem [shape: bf16[176,512], index: 0, kind: input, shape index: {}]   ;;  %s1856_s2 = inlined_call_operand.vmem [shape: f32[1,64], index: 2, kind: input, shape index: {}]   ;;  %s1857_s3 = inlined_call_operand.vmem [shape: bf16[176,64], index: 3, kind: output, shape index: {}]  }
   0x1   :  { %v1348_v0 = vld [vmem:[%s1854_s1 + $0x40] sm:$0xff]   ;;  %v1352_v4 = vld [vmem:[%s1854_s1 + $0x48] sm:$0xff]   ;;  %v1356_v8 = vld [vmem:[%s1854_s1 + $0x50] sm:$0xff]  }
   0x2   :  { %v1349_v1 = vld [vmem:[%s1854_s1 + $0xc0] sm:$0xff]   ;;  %1183 = vmatprep.subr.bf16.mxu0 %v1348_v0  ;;  %v1353_v5 = vld [vmem:[%s1854_s1 + $0xc8] sm:$0xff]   ;;  %v1357_v9 = vld [vmem:[%s1854_s1 + $0xd0] sm:$0xff]  }
   0x3   :  { %v1350_v2 = vld [vmem:[%s1854_s1] sm:$0xff]   ;;  %1265 = vmatprep.subr.bf16.mxu1 %v1349_v1  ;;  %v1354_v6 = vld [vmem:[%s1854_s1 + $0x8] sm:$0xff]   ;;  %v1358_v10 = vld [vmem:[%s1854_s1 + $0x10] sm:$0xff]  }
   0x4   :  { %v1351_v3 = vld [vmem:[%s1854_s1 + $0x80] sm:$0xff]   ;;  %1184 = vmatpush3.bf16.msra.mxu0 %v1350_v2  ;;  %v1355_v7 = vld [vmem:[%s1854_s1 + $0x88] sm:$0xff]   ;;  %v1359_v11 = vld [vmem:[%s1854_s1 + $0x90] sm:$0xff]  }
   0x5   :  { %1266 = vmatpush3.bf16.msra.mxu1 %v1351_v3  ;;  %1185 = vmatprep.subr.bf16.mxu0 %v1352_v4  ;;  %v1360_v12 = vld [vmem:[%s1854_s1 + $0x58] sm:$0xff]   ;;  %v1364_v16 = vld [vmem:[%s1854_s1 + $0x60] sm:$0xff]   ;;  %v1368_v20 = vld [vmem:[%s1854_s1 + $0x68] sm:$0xff]  }
   0x6   :  { %1267 = vmatprep.subr.bf16.mxu1 %v1353_v5  ;;  %v1361_v13 = vld [vmem:[%s1854_s1 + $0xd8] sm:$0xff]   ;;  %v1365_v17 = vld [vmem:[%s1854_s1 + $0xe0] sm:$0xff]   ;;  %v1369_v21 = vld [vmem:[%s1854_s1 + $0xe8] sm:$0xff]  }
   0x7   :  { %v1362_v14 = vld [vmem:[%s1854_s1 + $0x18] sm:$0xff]   ;;  %v1366_v18 = vld [vmem:[%s1854_s1 + $0x20] sm:$0xff]   ;;  %v1370_v22 = vld [vmem:[%s1854_s1 + $0x28] sm:$0xff]  }
   0x8   :  { %1186 = vmatpush3.bf16.msra.mxu0 %v1354_v6  ;;  %v1363_v15 = vld [vmem:[%s1854_s1 + $0x98] sm:$0xff]   ;;  %v1367_v19 = vld [vmem:[%s1854_s1 + $0xa0] sm:$0xff]   ;;  %v1371_v23 = vld [vmem:[%s1854_s1 + $0xa8] sm:$0xff]  }
   0x9   :  { %1268 = vmatpush3.bf16.msra.mxu1 %v1355_v7  ;;  %1187 = vmatprep.subr.bf16.mxu0 %v1356_v8  ;;  %v1372_v24 = vld [vmem:[%s1854_s1 + $0x70] sm:$0xff]   ;;  %v1376_v28 = vld [vmem:[%s1854_s1 + $0x78] sm:$0xff]  }
   0xa   :  { %1269 = vmatprep.subr.bf16.mxu1 %v1357_v9  ;;  %v1373_v25 = vld [vmem:[%s1854_s1 + $0xf0] sm:$0xff]   ;;  %v1377_v29 = vld [vmem:[%s1854_s1 + $0xf8] sm:$0xff]  }
   0xb   :  { %v1374_v26 = vld [vmem:[%s1854_s1 + $0x30] sm:$0xff]   ;;  %v1378_v30 = vld [vmem:[%s1854_s1 + $0x38] sm:$0xff]  }
   0xc   :  { %1188 = vmatpush3.bf16.msra.mxu0 %v1358_v10  ;;  %v1375_v27 = vld [vmem:[%s1854_s1 + $0xb0] sm:$0xff]   ;;  %v1379_v31 = vld [vmem:[%s1854_s1 + $0xb8] sm:$0xff]  }
   0xd   :  { %1270 = vmatpush3.bf16.msra.mxu1 %v1359_v11  ;;  %1189 = vmatprep.subr.bf16.mxu0 %v1360_v12  ;;  %v1380_v32 = vld [vmem:[%s1855_s0] ss:$16 sps:$4 sm:$0xff]   ;;  %v1382_v33 = vld [vmem:[%s1855_s0 + $0x4] ss:$16 sps:$4 sm:$0xff]   ;;  %v1383_v34 = vld [vmem:[%s1855_s0 + $0x8] ss:$16 sps:$4 sm:$0xff]  }
   0xe   :  { %1271 = vmatprep.subr.bf16.mxu1 %v1361_v13  ;;  %v1385_v35 = vld [vmem:[%s1855_s0 + $0xc] ss:$16 sps:$4 sm:$0xff]   ;;  %616 = vmatprep.mubr.bf16.mxu0 %v1382_v33  ;;  %v1386_v36 = vld [vmem:[%s1855_s0 + $0x24] ss:$16 sps:$4 sm:$0xff]   ;;  %v1390_v38 = vld [vmem:[%s1855_s0 + $0x20] ss:$16 sps:$4 sm:$0xff]  }
   0xf   :  { %737 = vmatprep.mubr.bf16.mxu1 %v1385_v35  ;;  %v1388_v37 = vld [vmem:[%s1855_s0 + $0x2c] ss:$16 sps:$4 sm:$0xff]   ;;  %v1391_v39 = vld [vmem:[%s1855_s0 + $0x28] ss:$16 sps:$4 sm:$0xff]   ;;  %v1392_v40 = vld [vmem:[%s1855_s0 + $0x44] ss:$16 sps:$4 sm:$0xff]  }
  0x10   :  { %1190 = vmatpush3.bf16.msra.mxu0 %v1362_v14  ;;  %v1394_v41 = vld [vmem:[%s1855_s0 + $0x4c] ss:$16 sps:$4 sm:$0xff]   ;;  %v1396_v42 = vld [vmem:[%s1855_s0 + $0x40] ss:$16 sps:$4 sm:$0xff]   ;;  %v1397_v43 = vld [vmem:[%s1855_s0 + $0x48] ss:$16 sps:$4 sm:$0xff]  }
  0x11   :  { %1272 = vmatpush3.bf16.msra.mxu1 %v1363_v15  ;;  %1191 = vmatprep.subr.bf16.mxu0 %v1364_v16  ;;  %v1398_v44 = vld [vmem:[%s1855_s0 + $0x64] ss:$16 sps:$4 sm:$0xff]   ;;  %v1400_v45 = vld [vmem:[%s1855_s0 + $0x6c] ss:$16 sps:$4 sm:$0xff]   ;;  %v1402_v46 = vld [vmem:[%s1855_s0 + $0x60] ss:$16 sps:$4 sm:$0xff]  }
  0x12   :  { %1273 = vmatprep.subr.bf16.mxu1 %v1365_v17  ;;  %v1403_v47 = vld [vmem:[%s1855_s0 + $0x68] ss:$16 sps:$4 sm:$0xff]   ;;  %v1404_v48 = vld [vmem:[%s1855_s0 + $0x84] ss:$16 sps:$4 sm:$0xff]   ;;  %v1406_v49 = vld [vmem:[%s1855_s0 + $0x8c] ss:$16 sps:$4 sm:$0xff]  }
  0x13   :  { %v1408_v50 = vld [vmem:[%s1855_s0 + $0x80] ss:$16 sps:$4 sm:$0xff]   ;;  %v1409_v51 = vld [vmem:[%s1855_s0 + $0x88] ss:$16 sps:$4 sm:$0xff]   ;;  %v1410_v52 = vld [vmem:[%s1855_s0 + $0xa4] ss:$16 sps:$4 sm:$0xff]  }
  0x14   :  { %1192 = vmatpush3.bf16.msra.mxu0 %v1366_v18  ;;  %v1412_v53 = vld [vmem:[%s1855_s0 + $0xac] ss:$16 sps:$4 sm:$0xff]   ;;  %v1414_v54 = vld [vmem:[%s1855_s0 + $0xa0] ss:$16 sps:$4 sm:$0xff]   ;;  %v1415_v55 = vld [vmem:[%s1855_s0 + $0xa8] ss:$16 sps:$4 sm:$0xff]  }
  0x15   :  { %1274 = vmatpush3.bf16.msra.mxu1 %v1367_v19  ;;  %1193 = vmatprep.subr.bf16.mxu0 %v1368_v20  ;;  %v1416_v56 = vld [vmem:[%s1855_s0 + $0xc4] ss:$16 sps:$4 sm:$0xff]   ;;  %v1418_v57 = vld [vmem:[%s1855_s0 + $0xcc] ss:$16 sps:$4 sm:$0xff]   ;;  %v1420_v58 = vld [vmem:[%s1855_s0 + $0xc0] ss:$16 sps:$4 sm:$0xff]  }
  0x16   :  { %1275 = vmatprep.subr.bf16.mxu1 %v1369_v21  ;;  %v1421_v59 = vld [vmem:[%s1855_s0 + $0xc8] ss:$16 sps:$4 sm:$0xff]   ;;  %v1422_v60 = vld [vmem:[%s1855_s0 + $0xe4] ss:$16 sps:$4 sm:$0xff]   ;;  %v1424_v61 = vld [vmem:[%s1855_s0 + $0xec] ss:$16 sps:$4 sm:$0xff]  }
  0x17   :  { %v1426_v62 = vld [vmem:[%s1855_s0 + $0xe0] ss:$16 sps:$4 sm:$0xff]   ;;  %v1427_v63 = vld [vmem:[%s1855_s0 + $0xe8] ss:$16 sps:$4 sm:$0xff]   ;;  %v1428_v0 = vld [vmem:[%s1855_s0 + $0x104] ss:$16 sps:$4 sm:$0xff]  }
  0x18   :  { %1194 = vmatpush3.bf16.msra.mxu0 %v1370_v22  ;;  %v1430_v1 = vld [vmem:[%s1855_s0 + $0x10c] ss:$16 sps:$4 sm:$0xff]   ;;  %v1432_v2 = vld [vmem:[%s1855_s0 + $0x100] ss:$16 sps:$4 sm:$0xff]   ;;  %v1433_v3 = vld [vmem:[%s1855_s0 + $0x108] ss:$16 sps:$4 sm:$0xff]  }
  0x19   :  { %1276 = vmatpush3.bf16.msra.mxu1 %v1371_v23  ;;  %1195 = vmatprep.subr.bf16.mxu0 %v1372_v24  ;;  %v1434_v4 = vld [vmem:[%s1855_s0 + $0x124] ss:$16 sps:$4 sm:$0xff]   ;;  %v1436_v5 = vld [vmem:[%s1855_s0 + $0x12c] ss:$16 sps:$4 sm:$0xff]   ;;  %v1438_v6 = vld [vmem:[%s1855_s0 + $0x120] ss:$16 sps:$4 sm:$0xff]  }
  0x1a   :  { %1277 = vmatprep.subr.bf16.mxu1 %v1373_v25  ;;  %v1439_v7 = vld [vmem:[%s1855_s0 + $0x128] ss:$16 sps:$4 sm:$0xff]   ;;  %v1440_v8 = vld [vmem:[%s1855_s0 + $0x144] ss:$16 sps:$4 sm:$0xff]   ;;  %v1442_v9 = vld [vmem:[%s1855_s0 + $0x14c] ss:$16 sps:$4 sm:$0xff]  }
  0x1b   :  { %v1444_v10 = vld [vmem:[%s1855_s0 + $0x140] ss:$16 sps:$4 sm:$0xff]   ;;  %v1445_v11 = vld [vmem:[%s1855_s0 + $0x148] ss:$16 sps:$4 sm:$0xff]   ;;  %v1446_v12 = vmov 0.0  }
  0x1c   :  { %1196 = vmatpush3.bf16.msra.mxu0 %v1374_v26  ;;  %20 = vst.msk [vmem:[#allocation2] sm:$0xff] %vm19_vm0, %v1446_v12  ;;  %21 = vst.msk [vmem:[#allocation2 + $0x8] sm:$0xff] %vm19_vm0, %v1446_v12 }
  0x1d   :  { %1278 = vmatpush3.bf16.msra.mxu1 %v1375_v27  ;;  %1197 = vmatprep.subr.bf16.mxu0 %v1376_v28  ;;  %22 = vst.msk [vmem:[#allocation2 + $0x10] sm:$0xff] %vm19_vm0, %v1446_v12  ;;  %23 = vst.msk [vmem:[#allocation2 + $0x18] sm:$0xff] %vm19_vm0, %v1446_v12 }
  0x1e   :  { %1279 = vmatprep.subr.bf16.mxu1 %v1377_v29  ;;  %24 = vst.msk [vmem:[#allocation2 + $0x20] sm:$0xff] %vm19_vm0, %v1446_v12  ;;  %25 = vst.msk [vmem:[#allocation2 + $0x28] sm:$0xff] %vm19_vm0, %v1446_v12 }
  0x1f   :  { %26 = vst.msk [vmem:[#allocation2 + $0x30] sm:$0xff] %vm19_vm0, %v1446_v12  ;;  %27 = vst.msk [vmem:[#allocation2 + $0x38] sm:$0xff] %vm19_vm0, %v1446_v12 }
  0x20   :  { %1198 = vmatpush3.bf16.msra.mxu0 %v1378_v30  ;;  %28 = vst.msk [vmem:[#allocation2 + $0x40] sm:$0xff] %vm19_vm0, %v1446_v12  ;;  %29 = vst.msk [vmem:[#allocation2 + $0x48] sm:$0xff] %vm19_vm0, %v1446_v12 }
  0x21   :  { %1280 = vmatpush3.bf16.msra.mxu1 %v1379_v31  ;;  %30 = vst.msk [vmem:[#allocation2 + $0x50] sm:$0xff] %vm19_vm0, %v1446_v12  ;;  %31 = vst.msk [vmem:[#allocation2 + $0x58] sm:$0xff] %vm19_vm0, %v1446_v12 }
  0x22   :  { %32 = vst.msk [vmem:[#allocation2 + $0x60] sm:$0xff] %vm19_vm0, %v1446_v12  ;;  %33 = vst.msk [vmem:[#allocation2 + $0x68] sm:$0xff] %vm19_vm0, %v1446_v12 }
  0x23   :  { %617 = vmatmul.mubr.bf16.vlgmr.msra.gmra.mrb[0].mxu0 %v1380_v32  ;;  %34 = vst.msk [vmem:[#allocation2 + $0x70] sm:$0xff] %vm19_vm0, %v1446_v12  ;;  %35 = vst.msk [vmem:[#allocation2 + $0x78] sm:$0xff] %vm19_vm0, %v1446_v12  ;;  %v42_v22 = vld [vmem:[#allocation2] sm:$0xff]  ;;  %v43_v27 = vld [vmem:[#allocation2 + $0x8] sm:$0xff] }
  0x24   :  { %738 = vmatmul.mubr.bf16.vlgmr.msra.gmra.mrb[0].mxu1 %v1383_v34  ;;  %624 = vmatprep.mubr.bf16.mxu0 %v1386_v36  ;;  %36 = vst.msk [vmem:[#allocation2 + $0x80] sm:$0xff] %vm19_vm0, %v1446_v12  ;;  %37 = vst.msk [vmem:[#allocation2 + $0x88] sm:$0xff] %vm19_vm0, %v1446_v12 }
  0x25   :  { %745 = vmatprep.mubr.bf16.mxu1 %v1388_v37  ;;  %38 = vst.msk [vmem:[#allocation2 + $0x90] sm:$0xff] %vm19_vm0, %v1446_v12  ;;  %39 = vst.msk [vmem:[#allocation2 + $0x98] sm:$0xff] %vm19_vm0, %v1446_v12 }
  0x26   :  { %40 = vst.msk [vmem:[#allocation2 + $0xa0] sm:$0xff] %vm19_vm0, %v1446_v12  ;;  %41 = vst.msk [vmem:[#allocation2 + $0xa8] sm:$0xff] %vm19_vm0, %v1446_v12 }
  0x2b   :  { %625 = vmatmul.mubr.bf16.gmra.mrb[4].mxu0 %v1390_v38 }
  0x2c   :  { %746 = vmatmul.mubr.bf16.gmra.mrb[4].mxu1 %v1391_v39  ;;  %632 = vmatprep.mubr.bf16.mxu0 %v1392_v40  ;;  %v44_v40 = vld [vmem:[#allocation2 + $0x10] sm:$0xff] }
  0x2d   :  { %753 = vmatprep.mubr.bf16.mxu1 %v1394_v41 }
  0x33   :  { %633 = vmatmul.mubr.bf16.gmra.mrb[8].mxu0 %v1396_v42 }
  0x34   :  { %754 = vmatmul.mubr.bf16.gmra.mrb[8].mxu1 %v1397_v43  ;;  %640 = vmatprep.mubr.bf16.mxu0 %v1398_v44 }
  0x35   :  { %761 = vmatprep.mubr.bf16.mxu1 %v1400_v45  ;;  %v1722_v45 = vld [vmem:[%s1856_s2] ss:$0 sm:$0xff] }
  0x3b   :  { %641 = vmatmul.mubr.bf16.gmra.mrb[12].mxu0 %v1402_v46  ;;  %v45_v46 = vld [vmem:[#allocation2 + $0x18] sm:$0xff] }
  0x3c   :  { %762 = vmatmul.mubr.bf16.gmra.mrb[12].mxu1 %v1403_v47  ;;  %648 = vmatprep.mubr.bf16.mxu0 %v1404_v48 }
  0x3d   :  { %769 = vmatprep.mubr.bf16.mxu1 %v1406_v49 }
  0x43   :  { %649 = vmatmul.mubr.bf16.gmra.mrb[16].mxu0 %v1408_v50 }
  0x44   :  { %770 = vmatmul.mubr.bf16.gmra.mrb[16].mxu1 %v1409_v51  ;;  %656 = vmatprep.mubr.bf16.mxu0 %v1410_v52 }
  0x45   :  { %777 = vmatprep.mubr.bf16.mxu1 %v1412_v53 }
  0x4b   :  { %657 = vmatmul.mubr.bf16.gmra.mrb[20].mxu0 %v1414_v54 }
  0x4c   :  { %778 = vmatmul.mubr.bf16.gmra.mrb[20].mxu1 %v1415_v55  ;;  %664 = vmatprep.mubr.bf16.mxu0 %v1416_v56 }
  0x4d   :  { %785 = vmatprep.mubr.bf16.mxu1 %v1418_v57 }
  0x53   :  { %665 = vmatmul.mubr.bf16.gmra.mrb[24].mxu0 %v1420_v58 }
  0x54   :  { %786 = vmatmul.mubr.bf16.gmra.mrb[24].mxu1 %v1421_v59  ;;  %672 = vmatprep.mubr.bf16.mxu0 %v1422_v60 }
  0x55   :  { %793 = vmatprep.mubr.bf16.mxu1 %v1424_v61 }
  0x5b   :  { %673 = vmatmul.mubr.bf16.gmra.mrb[28].mxu0 %v1426_v62 }
  0x5c   :  { %794 = vmatmul.mubr.bf16.gmra.mrb[28].mxu1 %v1427_v63  ;;  %680 = vmatprep.mubr.bf16.mxu0 %v1428_v0  ;;  %v46_v0 = vld [vmem:[#allocation2 + $0x20] sm:$0xff] }
  0x5d   :  { %801 = vmatprep.mubr.bf16.mxu1 %v1430_v1 }
  0x63   :  { %681 = vmatmul.mubr.bf16.gmra.mrb[32].mxu0 %v1432_v2 }
  0x64   :  { %802 = vmatmul.mubr.bf16.gmra.mrb[32].mxu1 %v1433_v3  ;;  %688 = vmatprep.mubr.bf16.mxu0 %v1434_v4 }
  0x65   :  { %809 = vmatprep.mubr.bf16.mxu1 %v1436_v5 }
  0x6b   :  { %689 = vmatmul.mubr.bf16.gmra.mrb[36].mxu0 %v1438_v6 }
  0x6c   :  { %810 = vmatmul.mubr.bf16.gmra.mrb[36].mxu1 %v1439_v7  ;;  %696 = vmatprep.mubr.bf16.mxu0 %v1440_v8  ;;  %v47_v7 = vld [vmem:[#allocation2 + $0x28] sm:$0xff] }
  0x6d   :  { %817 = vmatprep.mubr.bf16.mxu1 %v1442_v9 }
  0x73   :  { %697 = vmatmul.mubr.bf16.gmra.mrb[40].mxu0 %v1444_v10 }
  0x74   :  { %818 = vmatmul.mubr.bf16.gmra.mrb[40].mxu1 %v1445_v11 }
  0xf6   :  { %v1199_v13 = vpop.f32.mrb[0].mxu0 }
  0xf7   :  { %v1281_v14 = vpop.f32.mrb[0].mxu1  ;;  %v1200_v15 = vpop.f32.mrb[1].mxu0 }
  0xf8   :  { %v1201_v16 = vadd.f32 %v1200_v15, %v1199_v13  ;;  %v1282_v17 = vpop.f32.mrb[1].mxu1  ;;  %v1202_v18 = vpop.f32.mrb[2].mxu0 }
  0xf9   :  { %v1283_v19 = vadd.f32 %v1282_v17, %v1281_v14  ;;  %v1284_v20 = vpop.f32.mrb[2].mxu1  ;;  %v1203_v21 = vpop.f32.mrb[3].mxu0 }
  0xfa   :  { %v1204_v23 = vadd.f32 %v1203_v21, %v1202_v18  ;;  %v1285_v24 = vpop.f32.mrb[3].mxu1 }
  0xfb   :  { %v740_v25 = vadd.f32 %v1283_v19, %v1201_v16  ;;  %v1286_v26 = vadd.f32 %v1285_v24, %v1284_v20 }
  0xfd   :  { %v826_v28 = vadd.f32 %v740_v25, %v42_v22  ;;  %v743_v29 = vadd.f32 %v1286_v26, %v1204_v23  ;;  %v48_v26 = vld [vmem:[#allocation2 + $0x30] sm:$0xff] }
  0xfe   :  { %v1205_v30 = vpop.f32.mrb[4].mxu0 }
  0xff   :  { %849 = vst.msk [vmem:[#allocation2] sm:$0xff] %vm19_vm0, %v826_v28  ;;  %v827_v31 = vadd.f32 %v743_v29, %v43_v27  ;;  %v1287_v32 = vpop.f32.mrb[4].mxu1  ;;  %v1206_v33 = vpop.f32.mrb[5].mxu0 }
 0x100   :  { %v1207_v34 = vadd.f32 %v1206_v33, %v1205_v30  ;;  %v1288_v35 = vpop.f32.mrb[5].mxu1  ;;  %v1208_v36 = vpop.f32.mrb[6].mxu0  ;;  %v49_v33 = vld [vmem:[#allocation2 + $0x38] sm:$0xff] }
 0x101   :  { %850 = vst.msk [vmem:[#allocation2 + $0x8] sm:$0xff] %vm19_vm0, %v827_v31  ;;  %v1289_v37 = vadd.f32 %v1288_v35, %v1287_v32  ;;  %v1290_v38 = vpop.f32.mrb[6].mxu1  ;;  %v1209_v39 = vpop.f32.mrb[7].mxu0 }
 0x102   :  { %v1210_v41 = vadd.f32 %v1209_v39, %v1208_v36  ;;  %v1291_v42 = vpop.f32.mrb[7].mxu1 }
 0x103   :  { %v748_v43 = vadd.f32 %v1289_v37, %v1207_v34  ;;  %v1292_v44 = vadd.f32 %v1291_v42, %v1290_v38 }
 0x105   :  { %v828_v47 = vadd.f32 %v748_v43, %v44_v40  ;;  %v751_v48 = vadd.f32 %v1292_v44, %v1210_v41 }
 0x106   :  { %v874_v49 = vld [vmem:[#allocation2] sm:$0xff]  ;;  %v1211_v50 = vpop.f32.mrb[8].mxu0 }
 0x107   :  { %v903_v51 = vadd.f32 %v1722_v45, %v874_v49  ;;  %851 = vst.msk [vmem:[#allocation2 + $0x10] sm:$0xff] %vm19_vm0, %v828_v47  ;;  %v829_v52 = vadd.f32 %v751_v48, %v45_v46  ;;  %v1293_v53 = vpop.f32.mrb[8].mxu1  ;;  %v1212_v54 = vpop.f32.mrb[9].mxu0 }
 0x108   :  { %v875_v55 = vld [vmem:[#allocation2 + $0x8] sm:$0xff]  ;;  %v1213_v56 = vadd.f32 %v1212_v54, %v1211_v50  ;;  %v1294_v57 = vpop.f32.mrb[9].mxu1  ;;  %v1214_v58 = vpop.f32.mrb[10].mxu0 }
 0x109   :  { %v925_v59 = vmax.f32 %v903_v51, 0.0  ;;  %v904_v60 = vadd.f32 %v1722_v45, %v875_v55  ;;  %852 = vst.msk [vmem:[#allocation2 + $0x18] sm:$0xff] %vm19_vm0, %v829_v52  ;;  %v1295_v61 = vadd.f32 %v1294_v57, %v1293_v53  ;;  %v1296_v62 = vpop.f32.mrb[10].mxu1  ;;  %v1215_v63 = vpop.f32.mrb[11].mxu0  ;;  %v50_v53 = vld [vmem:[#allocation2 + $0x40] sm:$0xff] }
 0x10a   :  { %v1216_v1 = vadd.f32 %v1215_v63, %v1214_v58  ;;  %v1297_v2 = vpop.f32.mrb[11].mxu1 }
 0x10b   :  { %v1161_v3 = vpack.c.bf16 %v925_v59, %v925_v59  ;;  %v926_v4 = vmax.f32 %v904_v60, 0.0  ;;  %v756_v5 = vadd.f32 %v1295_v61, %v1213_v56  ;;  %v1298_v6 = vadd.f32 %v1297_v2, %v1296_v62  ;;  %v51_v60 = vld [vmem:[#allocation2 + $0x48] sm:$0xff] }
 0x10d   :  { %1036 = vst.msk [vmem:[%s1857_s3] sm:$0xf] %vm1035_vm1, %v1161_v3  ;;  %v1162_v8 = vpack.c.bf16 %v926_v4, %v926_v4  ;;  %v830_v9 = vadd.f32 %v756_v5, %v46_v0  ;;  %v759_v10 = vadd.f32 %v1298_v6, %v1216_v1 }
 0x10e   :  { %v876_v11 = vld [vmem:[#allocation2 + $0x10] sm:$0xff]  ;;  %v1217_v12 = vpop.f32.mrb[12].mxu0 }
 0x10f   :  { %1037 = vst.msk [vmem:[%s1857_s3 + $0x4] sm:$0xf] %vm1035_vm1, %v1162_v8  ;;  %v905_v13 = vadd.f32 %v1722_v45, %v876_v11  ;;  %v831_v14 = vadd.f32 %v759_v10, %v47_v7  ;;  %v1299_v15 = vpop.f32.mrb[12].mxu1  ;;  %v1218_v16 = vpop.f32.mrb[13].mxu0 }
 0x110   :  { %853 = vst.msk [vmem:[#allocation2 + $0x20] sm:$0xff] %vm19_vm0, %v830_v9  ;;  %v877_v17 = vld [vmem:[#allocation2 + $0x18] sm:$0xff]  ;;  %v1219_v18 = vadd.f32 %v1218_v16, %v1217_v12  ;;  %v1300_v19 = vpop.f32.mrb[13].mxu1  ;;  %v1220_v20 = vpop.f32.mrb[14].mxu0 }
 0x111   :  { %v927_v21 = vmax.f32 %v905_v13, 0.0  ;;  %v906_v22 = vadd.f32 %v1722_v45, %v877_v17  ;;  %854 = vst.msk [vmem:[#allocation2 + $0x28] sm:$0xff] %vm19_vm0, %v831_v14  ;;  %v1301_v23 = vadd.f32 %v1300_v19, %v1299_v15  ;;  %v1302_v24 = vpop.f32.mrb[14].mxu1  ;;  %v1221_v25 = vpop.f32.mrb[15].mxu0  ;;  %v52_v15 = vld [vmem:[#allocation2 + $0x50] sm:$0xff] }
 0x112   :  { %v1222_v27 = vadd.f32 %v1221_v25, %v1220_v20  ;;  %v1303_v28 = vpop.f32.mrb[15].mxu1 }
 0x113   :  { %v1163_v29 = vpack.c.bf16 %v927_v21, %v927_v21  ;;  %v928_v30 = vmax.f32 %v906_v22, 0.0  ;;  %v764_v31 = vadd.f32 %v1301_v23, %v1219_v18  ;;  %v1304_v32 = vadd.f32 %v1303_v28, %v1302_v24  ;;  %v53_v22 = vld [vmem:[#allocation2 + $0x58] sm:$0xff] }
 0x115   :  { %1038 = vst.msk [vmem:[%s1857_s3 + $0x8] sm:$0xf] %vm1035_vm1, %v1163_v29  ;;  %v1164_v34 = vpack.c.bf16 %v928_v30, %v928_v30  ;;  %v832_v35 = vadd.f32 %v764_v31, %v48_v26  ;;  %v767_v36 = vadd.f32 %v1304_v32, %v1222_v27 }
 0x116   :  { %v1223_v38 = vpop.f32.mrb[16].mxu0 }
 0x117   :  { %v878_v37 = vld [vmem:[#allocation2 + $0x20] sm:$0xff]  ;;  %1039 = vst.msk [vmem:[%s1857_s3 + $0xc] sm:$0xf] %vm1035_vm1, %v1164_v34  ;;  %v833_v40 = vadd.f32 %v767_v36, %v49_v33  ;;  %v1305_v41 = vpop.f32.mrb[16].mxu1  ;;  %v1224_v42 = vpop.f32.mrb[17].mxu0 }
 0x118   :  { %v907_v39 = vadd.f32 %v1722_v45, %v878_v37  ;;  %855 = vst.msk [vmem:[#allocation2 + $0x30] sm:$0xff] %vm19_vm0, %v832_v35  ;;  %v879_v43 = vld [vmem:[#allocation2 + $0x28] sm:$0xff]  ;;  %v1225_v44 = vadd.f32 %v1224_v42, %v1223_v38  ;;  %v1306_v46 = vpop.f32.mrb[17].mxu1  ;;  %v1226_v47 = vpop.f32.mrb[18].mxu0 }
 0x119   :  { %v908_v49 = vadd.f32 %v1722_v45, %v879_v43  ;;  %856 = vst.msk [vmem:[#allocation2 + $0x38] sm:$0xff] %vm19_vm0, %v833_v40  ;;  %v1307_v50 = vadd.f32 %v1306_v46, %v1305_v41  ;;  %v1308_v51 = vpop.f32.mrb[18].mxu1  ;;  %v1227_v52 = vpop.f32.mrb[19].mxu0  ;;  %v54_v41 = vld [vmem:[#allocation2 + $0x60] sm:$0xff] }
 0x11a   :  { %v929_v48 = vmax.f32 %v907_v39, 0.0  ;;  %v1228_v54 = vadd.f32 %v1227_v52, %v1226_v47  ;;  %v1309_v55 = vpop.f32.mrb[19].mxu1 }
 0x11b   :  { %v930_v57 = vmax.f32 %v908_v49, 0.0  ;;  %v772_v58 = vadd.f32 %v1307_v50, %v1225_v44  ;;  %v1310_v59 = vadd.f32 %v1309_v55, %v1308_v51  ;;  %v55_v49 = vld [vmem:[#allocation2 + $0x68] sm:$0xff] }
 0x11c   :  { %v1165_v56 = vpack.c.bf16 %v929_v48, %v929_v48 }
 0x11d   :  { %v1166_v61 = vpack.c.bf16 %v930_v57, %v930_v57  ;;  %v834_v62 = vadd.f32 %v772_v58, %v50_v53  ;;  %v775_v63 = vadd.f32 %v1310_v59, %v1228_v54 }
 0x11e   :  { %1040 = vst.msk [vmem:[%s1857_s3 + $0x10] sm:$0xf] %vm1035_vm1, %v1165_v56  ;;  %v1229_v1 = vpop.f32.mrb[20].mxu0 }
 0x11f   :  { %v880_v0 = vld [vmem:[#allocation2 + $0x30] sm:$0xff]  ;;  %1041 = vst.msk [vmem:[%s1857_s3 + $0x14] sm:$0xf] %vm1035_vm1, %v1166_v61  ;;  %v835_v3 = vadd.f32 %v775_v63, %v51_v60  ;;  %v1311_v4 = vpop.f32.mrb[20].mxu1  ;;  %v1230_v5 = vpop.f32.mrb[21].mxu0 }
 0x120   :  { %v909_v2 = vadd.f32 %v1722_v45, %v880_v0  ;;  %857 = vst.msk [vmem:[#allocation2 + $0x40] sm:$0xff] %vm19_vm0, %v834_v62  ;;  %v881_v6 = vld [vmem:[#allocation2 + $0x38] sm:$0xff]  ;;  %v1231_v7 = vadd.f32 %v1230_v5, %v1229_v1  ;;  %v1312_v8 = vpop.f32.mrb[21].mxu1  ;;  %v1232_v9 = vpop.f32.mrb[22].mxu0 }
 0x121   :  { %v910_v11 = vadd.f32 %v1722_v45, %v881_v6  ;;  %858 = vst.msk [vmem:[#allocation2 + $0x48] sm:$0xff] %vm19_vm0, %v835_v3  ;;  %v1313_v12 = vadd.f32 %v1312_v8, %v1311_v4  ;;  %v1314_v13 = vpop.f32.mrb[22].mxu1  ;;  %v1233_v14 = vpop.f32.mrb[23].mxu0  ;;  %v56_v4 = vld [vmem:[#allocation2 + $0x70] sm:$0xff] }
 0x122   :  { %v931_v10 = vmax.f32 %v909_v2, 0.0  ;;  %v1234_v16 = vadd.f32 %v1233_v14, %v1232_v9  ;;  %v1315_v17 = vpop.f32.mrb[23].mxu1 }
 0x123   :  { %v932_v19 = vmax.f32 %v910_v11, 0.0  ;;  %v780_v20 = vadd.f32 %v1313_v12, %v1231_v7  ;;  %v1316_v21 = vadd.f32 %v1315_v17, %v1314_v13  ;;  %v57_v11 = vld [vmem:[#allocation2 + $0x78] sm:$0xff] }
 0x124   :  { %v1167_v18 = vpack.c.bf16 %v931_v10, %v931_v10 }
 0x125   :  { %v1168_v23 = vpack.c.bf16 %v932_v19, %v932_v19  ;;  %v836_v24 = vadd.f32 %v780_v20, %v52_v15  ;;  %v783_v25 = vadd.f32 %v1316_v21, %v1234_v16 }
 0x126   :  { %1042 = vst.msk [vmem:[%s1857_s3 + $0x18] sm:$0xf] %vm1035_vm1, %v1167_v18  ;;  %v1235_v27 = vpop.f32.mrb[24].mxu0 }
 0x127   :  { %v882_v26 = vld [vmem:[#allocation2 + $0x40] sm:$0xff]  ;;  %1043 = vst.msk [vmem:[%s1857_s3 + $0x1c] sm:$0xf] %vm1035_vm1, %v1168_v23  ;;  %v837_v29 = vadd.f32 %v783_v25, %v53_v22  ;;  %v1317_v30 = vpop.f32.mrb[24].mxu1  ;;  %v1236_v31 = vpop.f32.mrb[25].mxu0 }
 0x128   :  { %v911_v28 = vadd.f32 %v1722_v45, %v882_v26  ;;  %859 = vst.msk [vmem:[#allocation2 + $0x50] sm:$0xff] %vm19_vm0, %v836_v24  ;;  %v883_v32 = vld [vmem:[#allocation2 + $0x48] sm:$0xff]  ;;  %v1237_v33 = vadd.f32 %v1236_v31, %v1235_v27  ;;  %v1318_v34 = vpop.f32.mrb[25].mxu1  ;;  %v1238_v35 = vpop.f32.mrb[26].mxu0 }
 0x129   :  { %v912_v37 = vadd.f32 %v1722_v45, %v883_v32  ;;  %860 = vst.msk [vmem:[#allocation2 + $0x58] sm:$0xff] %vm19_vm0, %v837_v29  ;;  %v1319_v38 = vadd.f32 %v1318_v34, %v1317_v30  ;;  %v1320_v39 = vpop.f32.mrb[26].mxu1  ;;  %v1239_v40 = vpop.f32.mrb[27].mxu0  ;;  %v58_v30 = vld [vmem:[#allocation2 + $0x80] sm:$0xff] }
 0x12a   :  { %v933_v36 = vmax.f32 %v911_v28, 0.0  ;;  %v1240_v42 = vadd.f32 %v1239_v40, %v1238_v35  ;;  %v1321_v43 = vpop.f32.mrb[27].mxu1 }
 0x12b   :  { %v934_v46 = vmax.f32 %v912_v37, 0.0  ;;  %v788_v47 = vadd.f32 %v1319_v38, %v1237_v33  ;;  %v1322_v48 = vadd.f32 %v1321_v43, %v1320_v39  ;;  %v59_v37 = vld [vmem:[#allocation2 + $0x88] sm:$0xff] }
 0x12c   :  { %v1169_v44 = vpack.c.bf16 %v933_v36, %v933_v36 }
 0x12d   :  { %v1170_v50 = vpack.c.bf16 %v934_v46, %v934_v46  ;;  %v838_v51 = vadd.f32 %v788_v47, %v54_v41  ;;  %v791_v52 = vadd.f32 %v1322_v48, %v1240_v42 }
 0x12e   :  { %1044 = vst.msk [vmem:[%s1857_s3 + $0x20] sm:$0xf] %vm1035_vm1, %v1169_v44  ;;  %v1241_v54 = vpop.f32.mrb[28].mxu0 }
 0x12f   :  { %v884_v53 = vld [vmem:[#allocation2 + $0x50] sm:$0xff]  ;;  %1045 = vst.msk [vmem:[%s1857_s3 + $0x24] sm:$0xf] %vm1035_vm1, %v1170_v50  ;;  %v839_v56 = vadd.f32 %v791_v52, %v55_v49  ;;  %v1323_v57 = vpop.f32.mrb[28].mxu1  ;;  %v1242_v58 = vpop.f32.mrb[29].mxu0 }
 0x130   :  { %v913_v55 = vadd.f32 %v1722_v45, %v884_v53  ;;  %861 = vst.msk [vmem:[#allocation2 + $0x60] sm:$0xff] %vm19_vm0, %v838_v51  ;;  %v885_v59 = vld [vmem:[#allocation2 + $0x58] sm:$0xff]  ;;  %v1243_v60 = vadd.f32 %v1242_v58, %v1241_v54  ;;  %v1324_v61 = vpop.f32.mrb[29].mxu1  ;;  %v1244_v62 = vpop.f32.mrb[30].mxu0 }
 0x131   :  { %v914_v0 = vadd.f32 %v1722_v45, %v885_v59  ;;  %862 = vst.msk [vmem:[#allocation2 + $0x68] sm:$0xff] %vm19_vm0, %v839_v56  ;;  %v1325_v1 = vadd.f32 %v1324_v61, %v1323_v57  ;;  %v1326_v2 = vpop.f32.mrb[30].mxu1  ;;  %v1245_v3 = vpop.f32.mrb[31].mxu0  ;;  %v60_v57 = vld [vmem:[#allocation2 + $0x90] sm:$0xff] }
 0x132   :  { %v935_v63 = vmax.f32 %v913_v55, 0.0  ;;  %v1246_v5 = vadd.f32 %v1245_v3, %v1244_v62  ;;  %v1327_v6 = vpop.f32.mrb[31].mxu1 }
 0x133   :  { %v936_v8 = vmax.f32 %v914_v0, 0.0  ;;  %v796_v9 = vadd.f32 %v1325_v1, %v1243_v60  ;;  %v1328_v10 = vadd.f32 %v1327_v6, %v1326_v2  ;;  %v61_v0 = vld [vmem:[#allocation2 + $0x98] sm:$0xff] }
 0x134   :  { %v1171_v7 = vpack.c.bf16 %v935_v63, %v935_v63 }
 0x135   :  { %v1172_v12 = vpack.c.bf16 %v936_v8, %v936_v8  ;;  %v840_v13 = vadd.f32 %v796_v9, %v56_v4  ;;  %v799_v14 = vadd.f32 %v1328_v10, %v1246_v5 }
 0x136   :  { %1046 = vst.msk [vmem:[%s1857_s3 + $0x28] sm:$0xf] %vm1035_vm1, %v1171_v7  ;;  %v1247_v16 = vpop.f32.mrb[32].mxu0 }
 0x137   :  { %v886_v15 = vld [vmem:[#allocation2 + $0x60] sm:$0xff]  ;;  %1047 = vst.msk [vmem:[%s1857_s3 + $0x2c] sm:$0xf] %vm1035_vm1, %v1172_v12  ;;  %v841_v18 = vadd.f32 %v799_v14, %v57_v11  ;;  %v1329_v19 = vpop.f32.mrb[32].mxu1  ;;  %v1248_v20 = vpop.f32.mrb[33].mxu0 }
 0x138   :  { %v915_v17 = vadd.f32 %v1722_v45, %v886_v15  ;;  %863 = vst.msk [vmem:[#allocation2 + $0x70] sm:$0xff] %vm19_vm0, %v840_v13  ;;  %v887_v21 = vld [vmem:[#allocation2 + $0x68] sm:$0xff]  ;;  %v1249_v22 = vadd.f32 %v1248_v20, %v1247_v16  ;;  %v1330_v23 = vpop.f32.mrb[33].mxu1  ;;  %v1250_v24 = vpop.f32.mrb[34].mxu0 }
 0x139   :  { %v916_v26 = vadd.f32 %v1722_v45, %v887_v21  ;;  %864 = vst.msk [vmem:[#allocation2 + $0x78] sm:$0xff] %vm19_vm0, %v841_v18  ;;  %v1331_v27 = vadd.f32 %v1330_v23, %v1329_v19  ;;  %v1332_v28 = vpop.f32.mrb[34].mxu1  ;;  %v1251_v29 = vpop.f32.mrb[35].mxu0  ;;  %v62_v19 = vld [vmem:[#allocation2 + $0xa0] sm:$0xff] }
 0x13a   :  { %v937_v25 = vmax.f32 %v915_v17, 0.0  ;;  %v1252_v31 = vadd.f32 %v1251_v29, %v1250_v24  ;;  %v1333_v32 = vpop.f32.mrb[35].mxu1 }
 0x13b   :  { %v938_v34 = vmax.f32 %v916_v26, 0.0  ;;  %v804_v35 = vadd.f32 %v1331_v27, %v1249_v22  ;;  %v1334_v36 = vadd.f32 %v1333_v32, %v1332_v28  ;;  %v63_v26 = vld [vmem:[#allocation2 + $0xa8] sm:$0xff] }
 0x13c   :  { %v1173_v33 = vpack.c.bf16 %v937_v25, %v937_v25 }
 0x13d   :  { %v1174_v38 = vpack.c.bf16 %v938_v34, %v938_v34  ;;  %v842_v39 = vadd.f32 %v804_v35, %v58_v30  ;;  %v807_v40 = vadd.f32 %v1334_v36, %v1252_v31 }
 0x13e   :  { %1048 = vst.msk [vmem:[%s1857_s3 + $0x30] sm:$0xf] %vm1035_vm1, %v1173_v33  ;;  %v1253_v42 = vpop.f32.mrb[36].mxu0 }
 0x13f   :  { %v888_v41 = vld [vmem:[#allocation2 + $0x70] sm:$0xff]  ;;  %1049 = vst.msk [vmem:[%s1857_s3 + $0x34] sm:$0xf] %vm1035_vm1, %v1174_v38  ;;  %v843_v44 = vadd.f32 %v807_v40, %v59_v37  ;;  %v1335_v46 = vpop.f32.mrb[36].mxu1  ;;  %v1254_v47 = vpop.f32.mrb[37].mxu0 }
 0x140   :  { %v917_v43 = vadd.f32 %v1722_v45, %v888_v41  ;;  %865 = vst.msk [vmem:[#allocation2 + $0x80] sm:$0xff] %vm19_vm0, %v842_v39  ;;  %v889_v48 = vld [vmem:[#allocation2 + $0x78] sm:$0xff]  ;;  %v1255_v49 = vadd.f32 %v1254_v47, %v1253_v42  ;;  %v1336_v50 = vpop.f32.mrb[37].mxu1  ;;  %v1256_v51 = vpop.f32.mrb[38].mxu0 }
 0x141   :  { %v918_v53 = vadd.f32 %v1722_v45, %v889_v48  ;;  %866 = vst.msk [vmem:[#allocation2 + $0x88] sm:$0xff] %vm19_vm0, %v843_v44  ;;  %v1337_v54 = vadd.f32 %v1336_v50, %v1335_v46  ;;  %v1338_v55 = vpop.f32.mrb[38].mxu1  ;;  %v1257_v56 = vpop.f32.mrb[39].mxu0 }
 0x142   :  { %v939_v52 = vmax.f32 %v917_v43, 0.0  ;;  %v1258_v58 = vadd.f32 %v1257_v56, %v1256_v51  ;;  %v1339_v59 = vpop.f32.mrb[39].mxu1 }
 0x143   :  { %v940_v61 = vmax.f32 %v918_v53, 0.0  ;;  %v812_v62 = vadd.f32 %v1337_v54, %v1255_v49  ;;  %v1340_v63 = vadd.f32 %v1339_v59, %v1338_v55 }
 0x144   :  { %v1175_v60 = vpack.c.bf16 %v939_v52, %v939_v52 }
 0x145   :  { %v1176_v1 = vpack.c.bf16 %v940_v61, %v940_v61  ;;  %v844_v2 = vadd.f32 %v812_v62, %v60_v57  ;;  %v815_v3 = vadd.f32 %v1340_v63, %v1258_v58 }
 0x146   :  { %1050 = vst.msk [vmem:[%s1857_s3 + $0x38] sm:$0xf] %vm1035_vm1, %v1175_v60  ;;  %v1259_v5 = vpop.f32.mrb[40].mxu0 }
 0x147   :  { %v890_v4 = vld [vmem:[#allocation2 + $0x80] sm:$0xff]  ;;  %1051 = vst.msk [vmem:[%s1857_s3 + $0x3c] sm:$0xf] %vm1035_vm1, %v1176_v1  ;;  %v845_v7 = vadd.f32 %v815_v3, %v61_v0  ;;  %v1341_v8 = vpop.f32.mrb[40].mxu1  ;;  %v1260_v9 = vpop.f32.mrb[41].mxu0 }
 0x148   :  { %v919_v6 = vadd.f32 %v1722_v45, %v890_v4  ;;  %867 = vst.msk [vmem:[#allocation2 + $0x90] sm:$0xff] %vm19_vm0, %v844_v2  ;;  %v891_v10 = vld [vmem:[#allocation2 + $0x88] sm:$0xff]  ;;  %v1261_v11 = vadd.f32 %v1260_v9, %v1259_v5  ;;  %v1342_v12 = vpop.f32.mrb[41].mxu1  ;;  %v1262_v13 = vpop.f32.mrb[42].mxu0 }
 0x149   :  { %v920_v15 = vadd.f32 %v1722_v45, %v891_v10  ;;  %868 = vst.msk [vmem:[#allocation2 + $0x98] sm:$0xff] %vm19_vm0, %v845_v7  ;;  %v1343_v16 = vadd.f32 %v1342_v12, %v1341_v8  ;;  %v1344_v17 = vpop.f32.mrb[42].mxu1  ;;  %v1263_v18 = vpop.f32.mrb[43].mxu0 }
 0x14a   :  { %v941_v14 = vmax.f32 %v919_v6, 0.0  ;;  %v1264_v20 = vadd.f32 %v1263_v18, %v1262_v13  ;;  %v1345_v21 = vpop.f32.mrb[43].mxu1 }
 0x14b   :  { %v942_v23 = vmax.f32 %v920_v15, 0.0  ;;  %v820_v24 = vadd.f32 %v1343_v16, %v1261_v11  ;;  %v1346_v25 = vadd.f32 %v1345_v21, %v1344_v17 }
 0x14c   :  { %v1177_v22 = vpack.c.bf16 %v941_v14, %v941_v14 }
 0x14d   :  { %v1178_v27 = vpack.c.bf16 %v942_v23, %v942_v23  ;;  %v846_v28 = vadd.f32 %v820_v24, %v62_v19  ;;  %v823_v29 = vadd.f32 %v1346_v25, %v1264_v20 }
 0x14e   :  { %1052 = vst.msk [vmem:[%s1857_s3 + $0x40] sm:$0xf] %vm1035_vm1, %v1177_v22 }
 0x14f   :  { %v892_v30 = vld [vmem:[#allocation2 + $0x90] sm:$0xff]  ;;  %1053 = vst.msk [vmem:[%s1857_s3 + $0x44] sm:$0xf] %vm1035_vm1, %v1178_v27  ;;  %v847_v32 = vadd.f32 %v823_v29, %v63_v26 }
 0x150   :  { %v921_v31 = vadd.f32 %v1722_v45, %v892_v30  ;;  %869 = vst.msk [vmem:[#allocation2 + $0xa0] sm:$0xff] %vm19_vm0, %v846_v28  ;;  %v893_v33 = vld [vmem:[#allocation2 + $0x98] sm:$0xff] }
 0x151   :  { %v922_v35 = vadd.f32 %v1722_v45, %v893_v33  ;;  %870 = vst.msk [vmem:[#allocation2 + $0xa8] sm:$0xff] %vm19_vm0, %v847_v32 }
 0x152   :  { %v943_v34 = vmax.f32 %v921_v31, 0.0 }
 0x153   :  { %v944_v37 = vmax.f32 %v922_v35, 0.0 }
 0x154   :  { %v1179_v36 = vpack.c.bf16 %v943_v34, %v943_v34 }
 0x155   :  { %v1180_v38 = vpack.c.bf16 %v944_v37, %v944_v37 }
 0x156   :  { %1054 = vst.msk [vmem:[%s1857_s3 + $0x48] sm:$0xf] %vm1035_vm1, %v1179_v36 }
 0x157   :  { %v894_v39 = vld [vmem:[#allocation2 + $0xa0] sm:$0xff]  ;;  %1055 = vst.msk [vmem:[%s1857_s3 + $0x4c] sm:$0xf] %vm1035_vm1, %v1180_v38 }
 0x158   :  { %v923_v40 = vadd.f32 %v1722_v45, %v894_v39  ;;  %v895_v41 = vld [vmem:[#allocation2 + $0xa8] sm:$0xff] }
 0x159   :  { %v924_v43 = vadd.f32 %v1722_v45, %v895_v41 }
 0x15a   :  { %v945_v42 = vmax.f32 %v923_v40, 0.0 }
 0x15b   :  { %v946_v46 = vmax.f32 %v924_v43, 0.0 }
 0x15c   :  { %v1181_v44 = vpack.c.bf16 %v945_v42, %v945_v42 }
 0x15d   :  { %v1182_v47 = vpack.c.bf16 %v946_v46, %v946_v46 }
 0x15e   :  { %1056 = vst.msk [vmem:[%s1857_s3 + $0x50] sm:$0xf] %vm1035_vm1, %v1181_v44 }
 0x15f   :  { %1057 = vst.msk [vmem:[%s1857_s3 + $0x54] sm:$0xf] %vm1035_vm1, %v1182_v47 }

// kernel: qnetwork_forward.13
= control target key start
LH: loop header
LB: loop body
LE: loop exit
PB: predicated region body
PF: predicated region fallthrough
CT: control target
= control target key end

     0   :  { %v1401_v24 = vmov 0.0   ;;  %vm1402_vm0 = vmmov 0   ;;  %vm19_vm1 = vcmask 523264   ;;  %vm996_vm2 = vcmask 519168   ;;  %s1817_s1 = inlined_call_operand.vmem [shape: bf16[640,64], index: 1, kind: input, shape index: {}]   ;;  %s1818_s0 = inlined_call_operand.vmem [shape: bf16[112,640], index: 0, kind: input, shape index: {}]   ;;  %s1819_s2 = inlined_call_operand.vmem [shape: f32[1,64], index: 2, kind: input, shape index: {}]   ;;  %s1820_s3 = inlined_call_operand.vmem [shape: bf16[112,64], index: 3, kind: output, shape index: {}]  }
   0x1   :  { %v1312_v0 = vld [vmem:[%s1817_s1 + $0x40] sm:$0xff]   ;;  %v1314_v2 = vld [vmem:[%s1817_s1 + $0x48] sm:$0xff]   ;;  %v1316_v4 = vld [vmem:[%s1817_s1 + $0x50] sm:$0xff]   ;;  %20 = vst.msk [vmem:[#allocation2] sm:$0xff] %vm19_vm1, %v1401_v24 }
   0x2   :  { %v1313_v1 = vld [vmem:[%s1817_s1] sm:$0xff]   ;;  %1294 = vmatprep.subr.bf16.mxu1 %v1312_v0  ;;  %1119 = vmatprep.subr.bf16.mxu0 %v1312_v0  ;;  %v1315_v3 = vld [vmem:[%s1817_s1 + $0x8] sm:$0xff]   ;;  %v1317_v5 = vld [vmem:[%s1817_s1 + $0x10] sm:$0xff]   ;;  %21 = vst.msk [vmem:[#allocation2 + $0x8] sm:$0xff] %vm19_vm1, %v1401_v24 }
   0x3   :  { %1302 = vmatpush3.bf16.msra.mxu1 %v1313_v1  ;;  %1120 = vmatpush3.bf16.msra.mxu0 %v1313_v1  ;;  %v1318_v6 = vld [vmem:[%s1817_s1 + $0x58] sm:$0xff]   ;;  %v1320_v8 = vld [vmem:[%s1817_s1 + $0x60] sm:$0xff]   ;;  %v1322_v10 = vld [vmem:[%s1817_s1 + $0x68] sm:$0xff]   ;;  %22 = vst.msk [vmem:[#allocation2 + $0x10] sm:$0xff] %vm19_vm1, %v1401_v24 }
   0x4   :  { %1295 = vmatprep.subr.bf16.mxu1 %v1314_v2  ;;  %1121 = vmatprep.subr.bf16.mxu0 %v1314_v2  ;;  %v1319_v7 = vld [vmem:[%s1817_s1 + $0x18] sm:$0xff]   ;;  %v1321_v9 = vld [vmem:[%s1817_s1 + $0x20] sm:$0xff]   ;;  %v1323_v12 = vld [vmem:[%s1817_s1 + $0x28] sm:$0xff]   ;;  %23 = vst.msk [vmem:[#allocation2 + $0x18] sm:$0xff] %vm19_vm1, %v1401_v24 }
   0x5   :  { %v1330_v11 = vld [vmem:[%s1818_s0 + $0xa4] ss:$20 sps:$4 sm:$0xff]   ;;  %v1324_v14 = vld [vmem:[%s1817_s1 + $0x70] sm:$0xff]   ;;  %v1337_v23 = vld [vmem:[%s1817_s1 + $0xc8] sm:$0xff]   ;;  %24 = vst.msk [vmem:[#allocation2 + $0x20] sm:$0xff] %vm19_vm1, %v1401_v24 }
   0x6   :  { %v1334_v13 = vld [vmem:[%s1818_s0 + $0x4] ss:$20 sps:$4 sm:$0xff]   ;;  %656 = vmatprep.mubr.bf16.mxu1 %v1330_v11  ;;  %v1325_v15 = vld [vmem:[%s1817_s1 + $0x30] sm:$0xff]   ;;  %v1341_v25 = vld [vmem:[%s1818_s0 + $0x2c] ss:$20 sps:$4 sm:$0xff]   ;;  %25 = vst.msk [vmem:[#allocation2 + $0x28] sm:$0xff] %vm19_vm1, %v1401_v24 }
   0x7   :  { %1303 = vmatpush3.bf16.msra.mxu1 %v1315_v3  ;;  %1122 = vmatpush3.bf16.msra.mxu0 %v1315_v3  ;;  %v1326_v16 = vld [vmem:[%s1817_s1 + $0x78] sm:$0xff]   ;;  %v1331_v18 = vld [vmem:[%s1817_s1 + $0xc0] sm:$0xff]   ;;  %v1338_v27 = vld [vmem:[%s1817_s1 + $0x88] sm:$0xff]   ;;  %26 = vst.msk [vmem:[#allocation2 + $0x30] sm:$0xff] %vm19_vm1, %v1401_v24 }
   0x8   :  { %1296 = vmatprep.subr.bf16.mxu1 %v1316_v4  ;;  %1123 = vmatprep.subr.bf16.mxu0 %v1316_v4  ;;  %v1327_v17 = vld [vmem:[%s1817_s1 + $0x38] sm:$0xff]   ;;  %v1328_v19 = vld [vmem:[%s1818_s0 + $0xa0] ss:$20 sps:$4 sm:$0xff]   ;;  %v1339_v28 = vld [vmem:[%s1817_s1 + $0x108] sm:$0xff]   ;;  %27 = vst.msk [vmem:[#allocation2 + $0x38] sm:$0xff] %vm19_vm1, %v1401_v24 }
   0x9   :  { %624 = vmatprep.mubr.bf16.mxu0 %v1334_v13  ;;  %v1332_v20 = vld [vmem:[%s1818_s0] ss:$20 sps:$4 sm:$0xff]   ;;  %v1344_v31 = vld [vmem:[%s1818_s0 + $0x28] ss:$20 sps:$4 sm:$0xff]   ;;  %v1356_v41 = vld [vmem:[%s1818_s0 + $0x50] ss:$20 sps:$4 sm:$0xff]  }
   0xa   :  { %v1335_v21 = vld [vmem:[%s1817_s1 + $0x80] sm:$0xff]   ;;  %v1340_v29 = vld [vmem:[%s1817_s1 + $0xd0] sm:$0xff]   ;;  %v1349_v32 = vld [vmem:[%s1818_s0 + $0xc8] ss:$20 sps:$4 sm:$0xff]   ;;  %28 = vst.msk [vmem:[#allocation2 + $0x40] sm:$0xff] %vm19_vm1, %v1401_v24 }
   0xb   :  { %1304 = vmatpush3.bf16.msra.mxu1 %v1317_v5  ;;  %1124 = vmatpush3.bf16.msra.mxu0 %v1317_v5  ;;  %v1336_v22 = vld [vmem:[%s1817_s1 + $0x100] sm:$0xff]   ;;  %v1343_v30 = vld [vmem:[%s1817_s1 + $0x90] sm:$0xff]   ;;  %v1348_v34 = vld [vmem:[%s1817_s1 + $0xd8] sm:$0xff]   ;;  %29 = vst.msk [vmem:[#allocation2 + $0x48] sm:$0xff] %vm19_vm1, %v1401_v24 }
   0xc   :  { %1297 = vmatprep.subr.bf16.mxu1 %v1318_v6  ;;  %1125 = vmatprep.subr.bf16.mxu0 %v1318_v6  ;;  %v1346_v26 = vld [vmem:[%s1818_s0 + $0xcc] ss:$20 sps:$4 sm:$0xff]   ;;  %v1345_v33 = vld [vmem:[%s1817_s1 + $0x110] sm:$0xff]   ;;  %v1350_v37 = vld [vmem:[%s1817_s1 + $0x98] sm:$0xff]   ;;  %30 = vst.msk [vmem:[#allocation2 + $0x50] sm:$0xff] %vm19_vm1, %v1401_v24 }
   0xd   :  { %v1353_v35 = vld [vmem:[%s1818_s0 + $0x54] ss:$20 sps:$4 sm:$0xff]   ;;  %v1351_v38 = vld [vmem:[%s1817_s1 + $0x118] sm:$0xff]   ;;  %v1352_v39 = vld [vmem:[%s1817_s1 + $0xe0] sm:$0xff]   ;;  %31 = vst.msk [vmem:[#allocation2 + $0x58] sm:$0xff] %vm19_vm1, %v1401_v24 }
   0xe   :  { %v1358_v36 = vld [vmem:[%s1818_s0 + $0xf4] ss:$20 sps:$4 sm:$0xff]   ;;  %v1355_v40 = vld [vmem:[%s1817_s1 + $0xa0] sm:$0xff]   ;;  %v1365_v45 = vld [vmem:[%s1818_s0 + $0x7c] ss:$20 sps:$4 sm:$0xff]   ;;  %32 = vst.msk [vmem:[#allocation2 + $0x60] sm:$0xff] %vm19_vm1, %v1401_v24 }
   0xf   :  { %1305 = vmatpush3.bf16.msra.mxu1 %v1319_v7  ;;  %1126 = vmatpush3.bf16.msra.mxu0 %v1319_v7  ;;  %v1361_v42 = vld [vmem:[%s1818_s0 + $0xf0] ss:$20 sps:$4 sm:$0xff]   ;;  %v1360_v44 = vld [vmem:[%s1817_s1 + $0xe8] sm:$0xff]   ;;  %v1370_v53 = vld [vmem:[%s1817_s1 + $0xf8] sm:$0xff]   ;;  %33 = vst.msk [vmem:[#allocation2 + $0x68] sm:$0xff] %vm19_vm1, %v1401_v24 }
  0x10   :  { %1298 = vmatprep.subr.bf16.mxu1 %v1320_v8  ;;  %1127 = vmatprep.subr.bf16.mxu0 %v1320_v8  ;;  %v1357_v43 = vld [vmem:[%s1817_s1 + $0x120] sm:$0xff]   ;;  %v1362_v47 = vld [vmem:[%s1817_s1 + $0xa8] sm:$0xff]   ;;  %v1364_v49 = vld [vmem:[%s1817_s1 + $0xf0] sm:$0xff]  }
  0x11   :  { %v1374_v46 = vld [vmem:[%s1818_s0 + $0xc] ss:$20 sps:$4 sm:$0xff]   ;;  %v1367_v50 = vld [vmem:[%s1817_s1 + $0xb0] sm:$0xff]   ;;  %v1371_v54 = vld [vmem:[%s1817_s1 + $0xb8] sm:$0xff]  }
  0x12   :  { %v1363_v48 = vld [vmem:[%s1817_s1 + $0x128] sm:$0xff]   ;;  %v1369_v52 = vld [vmem:[%s1817_s1 + $0x130] sm:$0xff]   ;;  %v1375_v55 = vld [vmem:[%s1817_s1 + $0x138] sm:$0xff]  }
  0x13   :  { %1306 = vmatpush3.bf16.msra.mxu1 %v1321_v9  ;;  %1128 = vmatpush3.bf16.msra.mxu0 %v1321_v9  ;;  %v1368_v51 = vld [vmem:[%s1818_s0 + $0x78] ss:$20 sps:$4 sm:$0xff]   ;;  %v1372_v56 = vld [vmem:[%s1818_s0 + $0x8] ss:$20 sps:$4 sm:$0xff]   ;;  %v1376_v57 = vld [vmem:[%s1818_s0 + $0x10] ss:$20 sps:$4 sm:$0xff]  }
  0x14   :  { %1299 = vmatprep.subr.bf16.mxu1 %v1322_v10  ;;  %1129 = vmatprep.subr.bf16.mxu0 %v1322_v10  ;;  %v1377_v58 = vld [vmem:[%s1818_s0 + $0x34] ss:$20 sps:$4 sm:$0xff]   ;;  %v1379_v59 = vld [vmem:[%s1818_s0 + $0x30] ss:$20 sps:$4 sm:$0xff]   ;;  %v1380_v60 = vld [vmem:[%s1818_s0 + $0x38] ss:$20 sps:$4 sm:$0xff]  }
  0x15   :  { %v1381_v61 = vld [vmem:[%s1818_s0 + $0x5c] ss:$20 sps:$4 sm:$0xff]   ;;  %v1383_v62 = vld [vmem:[%s1818_s0 + $0x58] ss:$20 sps:$4 sm:$0xff]   ;;  %v1384_v63 = vld [vmem:[%s1818_s0 + $0x60] ss:$20 sps:$4 sm:$0xff]  }
  0x16   :  { %v1385_v0 = vld [vmem:[%s1818_s0 + $0x84] ss:$20 sps:$4 sm:$0xff]   ;;  %v1387_v1 = vld [vmem:[%s1818_s0 + $0x80] ss:$20 sps:$4 sm:$0xff]   ;;  %v1388_v2 = vld [vmem:[%s1818_s0 + $0x88] ss:$20 sps:$4 sm:$0xff]  }
  0x17   :  { %1307 = vmatpush3.bf16.msra.mxu1 %v1323_v12  ;;  %1130 = vmatpush3.bf16.msra.mxu0 %v1323_v12  ;;  %v1389_v3 = vld [vmem:[%s1818_s0 + $0xac] ss:$20 sps:$4 sm:$0xff]   ;;  %v1391_v4 = vld [vmem:[%s1818_s0 + $0xa8] ss:$20 sps:$4 sm:$0xff]   ;;  %v1392_v5 = vld [vmem:[%s1818_s0 + $0xb0] ss:$20 sps:$4 sm:$0xff]  }
  0x18   :  { %1300 = vmatprep.subr.bf16.mxu1 %v1324_v14  ;;  %1131 = vmatprep.subr.bf16.mxu0 %v1324_v14  ;;  %v1393_v6 = vld [vmem:[%s1818_s0 + $0xd4] ss:$20 sps:$4 sm:$0xff]   ;;  %v1395_v7 = vld [vmem:[%s1818_s0 + $0xd0] ss:$20 sps:$4 sm:$0xff]   ;;  %v1396_v8 = vld [vmem:[%s1818_s0 + $0xd8] ss:$20 sps:$4 sm:$0xff]  }
  0x19   :  { %v1397_v9 = vld [vmem:[%s1818_s0 + $0xfc] ss:$20 sps:$4 sm:$0xff]   ;;  %v1399_v10 = vld [vmem:[%s1818_s0 + $0xf8] ss:$20 sps:$4 sm:$0xff]   ;;  %v1400_v11 = vld [vmem:[%s1818_s0 + $0x100] ss:$20 sps:$4 sm:$0xff]  }
  0x1b   :  { %1308 = vmatpush3.bf16.msra.mxu1 %v1325_v15  ;;  %1132 = vmatpush3.bf16.msra.mxu0 %v1325_v15 }
  0x1c   :  { %1301 = vmatprep.subr.bf16.mxu1 %v1326_v16  ;;  %1133 = vmatprep.subr.bf16.mxu0 %v1326_v16 }
  0x1f   :  { %1309 = vmatpush3.bf16.msra.mxu1 %v1327_v17  ;;  %1134 = vmatpush3.bf16.msra.mxu0 %v1327_v17 }
  0x20   :  { %1177 = vmatprep.subr.bf16.mxu1 %v1331_v18  ;;  %1250 = vmatprep.subr.bf16.mxu0 %v1401_v24 }
  0x22   :  { %657 = vmatmul.mubr.bf16.vlgmr.msra.gmra.mrb[0].mxu1 %v1328_v19  ;;  %625 = vmatmul.mubr.bf16.vlgmr.msra.gmra.mrb[0].mxu0 %v1332_v20 }
  0x23   :  { %1178 = vmatpush3.bf16.msra.mxu1 %v1335_v21  ;;  %1251 = vmatpush3.bf16.msra.mxu0 %v1336_v22 }
  0x24   :  { %1179 = vmatprep.subr.bf16.mxu1 %v1337_v23  ;;  %1252 = vmatprep.subr.bf16.mxu0 %v1401_v24 }
  0x25   :  { %632 = vmatprep.mubr.bf16.mxu0 %v1341_v25  ;;  %664 = vmatprep.mubr.bf16.mxu1 %v1346_v26 }
  0x27   :  { %1180 = vmatpush3.bf16.msra.mxu1 %v1338_v27  ;;  %1253 = vmatpush3.bf16.msra.mxu0 %v1339_v28 }
  0x28   :  { %1181 = vmatprep.subr.bf16.mxu1 %v1340_v29  ;;  %1254 = vmatprep.subr.bf16.mxu0 %v1401_v24 }
  0x2a   :  { %633 = vmatmul.mubr.bf16.gmra.mrb[4].mxu0 %v1344_v31  ;;  %665 = vmatmul.mubr.bf16.gmra.mrb[4].mxu1 %v1349_v32 }
  0x2b   :  { %1182 = vmatpush3.bf16.msra.mxu1 %v1343_v30  ;;  %1255 = vmatpush3.bf16.msra.mxu0 %v1345_v33 }
  0x2c   :  { %1183 = vmatprep.subr.bf16.mxu1 %v1348_v34  ;;  %1256 = vmatprep.subr.bf16.mxu0 %v1401_v24 }
  0x2d   :  { %640 = vmatprep.mubr.bf16.mxu0 %v1353_v35  ;;  %672 = vmatprep.mubr.bf16.mxu1 %v1358_v36 }
  0x2f   :  { %1184 = vmatpush3.bf16.msra.mxu1 %v1350_v37  ;;  %1257 = vmatpush3.bf16.msra.mxu0 %v1351_v38 }
  0x30   :  { %1185 = vmatprep.subr.bf16.mxu1 %v1352_v39  ;;  %1258 = vmatprep.subr.bf16.mxu0 %v1401_v24 }
  0x32   :  { %641 = vmatmul.mubr.bf16.gmra.mrb[8].mxu0 %v1356_v41  ;;  %673 = vmatmul.mubr.bf16.gmra.mrb[8].mxu1 %v1361_v42 }
  0x33   :  { %1186 = vmatpush3.bf16.msra.mxu1 %v1355_v40  ;;  %1259 = vmatpush3.bf16.msra.mxu0 %v1357_v43 }
  0x34   :  { %1187 = vmatprep.subr.bf16.mxu1 %v1360_v44  ;;  %1260 = vmatprep.subr.bf16.mxu0 %v1401_v24 }
  0x35   :  { %648 = vmatprep.mubr.bf16.mxu0 %v1365_v45  ;;  %713 = vmatprep.mubr.bf16.mxu1 %v1374_v46 }
  0x37   :  { %1188 = vmatpush3.bf16.msra.mxu1 %v1362_v47  ;;  %1261 = vmatpush3.bf16.msra.mxu0 %v1363_v48 }
  0x38   :  { %1189 = vmatprep.subr.bf16.mxu1 %v1364_v49  ;;  %1262 = vmatprep.subr.bf16.mxu0 %v1401_v24 }
  0x3a   :  { %649 = vmatmul.mubr.bf16.gmra.mrb[12].mxu0 %v1368_v51 }
  0x3b   :  { %1190 = vmatpush3.bf16.msra.mxu1 %v1367_v50  ;;  %1263 = vmatpush3.bf16.msra.mxu0 %v1369_v52 }
  0x3c   :  { %1191 = vmatprep.subr.bf16.mxu1 %v1370_v53  ;;  %1264 = vmatprep.subr.bf16.mxu0 %v1401_v24 }
  0x3d   :  { %1266 = vmatprep.mubr.msk.bf16.mxu0 %vm1402_vm0, %v1401_v24 }
  0x3f   :  { %1192 = vmatpush3.bf16.msra.mxu1 %v1371_v54  ;;  %1265 = vmatpush3.bf16.msra.mxu0 %v1375_v55 }
  0x42   :  { %714 = vmatmul.mubr.bf16.vlgmr.msra.gmra.mrb[12].mxu1 %v1372_v56  ;;  %1267 = vmatmul.mubr.bf16.vlgmr.msra.gmra.mrb[16].mxu0 %v1376_v57 }
  0x43   :  { %721 = vmatprep.mubr.bf16.mxu1 %v1377_v58  ;;  %1270 = vmatprep.mubr.msk.bf16.mxu0 %vm1402_vm0, %v1401_v24 }
  0x4a   :  { %722 = vmatmul.mubr.bf16.gmra.mrb[16].mxu1 %v1379_v59  ;;  %1271 = vmatmul.mubr.bf16.gmra.mrb[20].mxu0 %v1380_v60 }
  0x4b   :  { %729 = vmatprep.mubr.bf16.mxu1 %v1381_v61  ;;  %1274 = vmatprep.mubr.msk.bf16.mxu0 %vm1402_vm0, %v1401_v24 }
  0x52   :  { %730 = vmatmul.mubr.bf16.gmra.mrb[20].mxu1 %v1383_v62  ;;  %1275 = vmatmul.mubr.bf16.gmra.mrb[24].mxu0 %v1384_v63 }
  0x53   :  { %737 = vmatprep.mubr.bf16.mxu1 %v1385_v0  ;;  %1278 = vmatprep.mubr.msk.bf16.mxu0 %vm1402_vm0, %v1401_v24 }
  0x5a   :  { %738 = vmatmul.mubr.bf16.gmra.mrb[24].mxu1 %v1387_v1  ;;  %1279 = vmatmul.mubr.bf16.gmra.mrb[28].mxu0 %v1388_v2  ;;  %v34_v1 = vld [vmem:[#allocation2] sm:$0xff] }
  0x5b   :  { %745 = vmatprep.mubr.bf16.mxu1 %v1389_v3  ;;  %1282 = vmatprep.mubr.msk.bf16.mxu0 %vm1402_vm0, %v1401_v24 }
  0x62   :  { %746 = vmatmul.mubr.bf16.gmra.mrb[28].mxu1 %v1391_v4  ;;  %1283 = vmatmul.mubr.bf16.gmra.mrb[32].mxu0 %v1392_v5  ;;  %v35_v4 = vld [vmem:[#allocation2 + $0x8] sm:$0xff] }
  0x63   :  { %753 = vmatprep.mubr.bf16.mxu1 %v1393_v6  ;;  %1286 = vmatprep.mubr.msk.bf16.mxu0 %vm1402_vm0, %v1401_v24 }
  0x6a   :  { %754 = vmatmul.mubr.bf16.gmra.mrb[32].mxu1 %v1395_v7  ;;  %1287 = vmatmul.mubr.bf16.gmra.mrb[36].mxu0 %v1396_v8 }
  0x6b   :  { %761 = vmatprep.mubr.bf16.mxu1 %v1397_v9  ;;  %1290 = vmatprep.mubr.msk.bf16.mxu0 %vm1402_vm0, %v1401_v24 }
  0x72   :  { %762 = vmatmul.mubr.bf16.gmra.mrb[36].mxu1 %v1399_v10  ;;  %1291 = vmatmul.mubr.bf16.gmra.mrb[40].mxu0 %v1400_v11 }
  0xf5   :  { %v1159_v12 = vpop.f32.mrb[0].mxu1  ;;  %v1135_v13 = vpop.f32.mrb[0].mxu0 }
  0xf6   :  { %v1160_v14 = vpop.f32.mrb[1].mxu1  ;;  %v1136_v15 = vpop.f32.mrb[1].mxu0 }
  0xf7   :  { %v1698_v16 = vadd.f32 %v1160_v14, %v1159_v12  ;;  %v1162_v17 = vpop.f32.mrb[2].mxu1  ;;  %v1137_v18 = vadd.f32 %v1136_v15, %v1135_v13  ;;  %v1138_v19 = vpop.f32.mrb[2].mxu0 }
  0xf8   :  { %v1163_v20 = vpop.f32.mrb[3].mxu1  ;;  %v1139_v21 = vpop.f32.mrb[3].mxu0 }
  0xf9   :  { %v1700_v22 = vadd.f32 %v1163_v20, %v1162_v17  ;;  %v1140_v23 = vadd.f32 %v1139_v21, %v1138_v19  ;;  %v36_v20 = vld [vmem:[#allocation2 + $0x10] sm:$0xff] }
  0xfd   :  { %v1141_v25 = vpop.f32.mrb[4].mxu0  ;;  %v1165_v26 = vpop.f32.mrb[4].mxu1 }
  0xfe   :  { %v1142_v27 = vpop.f32.mrb[5].mxu0  ;;  %v1166_v28 = vpop.f32.mrb[5].mxu1 }
  0xff   :  { %v1143_v29 = vadd.f32 %v1142_v27, %v1141_v25  ;;  %v1144_v24 = vpop.f32.mrb[6].mxu0  ;;  %v1702_v30 = vadd.f32 %v1166_v28, %v1165_v26  ;;  %v1168_v31 = vpop.f32.mrb[6].mxu1  ;;  %v1723_v25 = vld [vmem:[%s1819_s2] ss:$0 sm:$0xff]  ;;  %v37_v26 = vld [vmem:[#allocation2 + $0x18] sm:$0xff] }
 0x100   :  { %v1145_v32 = vpop.f32.mrb[7].mxu0  ;;  %v1169_v33 = vpop.f32.mrb[7].mxu1 }
 0x101   :  { %v1146_v34 = vadd.f32 %v1145_v32, %v1144_v24  ;;  %v1704_v35 = vadd.f32 %v1169_v33, %v1168_v31 }
 0x105   :  { %v1147_v36 = vpop.f32.mrb[8].mxu0  ;;  %v1171_v37 = vpop.f32.mrb[8].mxu1 }
 0x106   :  { %v1148_v38 = vpop.f32.mrb[9].mxu0  ;;  %v1172_v39 = vpop.f32.mrb[9].mxu1 }
 0x107   :  { %v1706_v40 = vadd.f32 %v1148_v38, %v1147_v36  ;;  %v1150_v41 = vpop.f32.mrb[10].mxu0  ;;  %v1708_v42 = vadd.f32 %v1172_v39, %v1171_v37  ;;  %v1174_v43 = vpop.f32.mrb[10].mxu1 }
 0x108   :  { %v1151_v44 = vpop.f32.mrb[11].mxu0  ;;  %v1175_v45 = vpop.f32.mrb[11].mxu1 }
 0x109   :  { %v1710_v46 = vadd.f32 %v1151_v44, %v1150_v41  ;;  %v1712_v47 = vadd.f32 %v1175_v45, %v1174_v43 }
 0x10d   :  { %v1153_v48 = vpop.f32.mrb[12].mxu0 }
 0x10e   :  { %v1154_v49 = vpop.f32.mrb[13].mxu0 }
 0x10f   :  { %v1714_v50 = vadd.f32 %v1154_v49, %v1153_v48  ;;  %v1156_v51 = vpop.f32.mrb[14].mxu0 }
 0x110   :  { %v1157_v52 = vpop.f32.mrb[15].mxu0 }
 0x111   :  { %v1716_v53 = vadd.f32 %v1157_v52, %v1156_v51  ;;  %v38_v52 = vld [vmem:[#allocation2 + $0x20] sm:$0xff] }
 0x115   :  { %v1193_v54 = vpop.f32.mrb[12].mxu1  ;;  %v804_v55 = vpop.f32.mrb[16].mxu0 }
 0x116   :  { %v1194_v56 = vpop.f32.mrb[13].mxu1  ;;  %v1268_v57 = vpop.f32.mrb[17].mxu0 }
 0x117   :  { %v1195_v58 = vadd.f32 %v1194_v56, %v1193_v54  ;;  %v1196_v59 = vpop.f32.mrb[14].mxu1  ;;  %v807_v60 = vpop.f32.mrb[18].mxu0 }
 0x118   :  { %v1197_v61 = vpop.f32.mrb[15].mxu1  ;;  %v1269_v62 = vpop.f32.mrb[19].mxu0 }
 0x119   :  { %v716_v63 = vadd.f32 %v1195_v58, %v1137_v18  ;;  %v1198_v0 = vadd.f32 %v1197_v61, %v1196_v59  ;;  %v39_v58 = vld [vmem:[#allocation2 + $0x28] sm:$0xff] }
 0x11b   :  { %v805_v2 = vadd.f32 %v804_v55, %v716_v63  ;;  %v719_v3 = vadd.f32 %v1198_v0, %v1140_v23 }
 0x11d   :  { %v859_v5 = vadd.f32 %v805_v2, %v34_v1  ;;  %v808_v6 = vadd.f32 %v807_v60, %v719_v3  ;;  %v1199_v7 = vpop.f32.mrb[16].mxu1  ;;  %v812_v8 = vpop.f32.mrb[20].mxu0 }
 0x11e   :  { %v1200_v9 = vpop.f32.mrb[17].mxu1  ;;  %v1272_v10 = vpop.f32.mrb[21].mxu0 }
 0x11f   :  { %874 = vst.msk [vmem:[#allocation2] sm:$0xff] %vm19_vm1, %v859_v5  ;;  %v860_v11 = vadd.f32 %v808_v6, %v35_v4  ;;  %v1201_v12 = vadd.f32 %v1200_v9, %v1199_v7  ;;  %v1202_v13 = vpop.f32.mrb[18].mxu1  ;;  %v815_v14 = vpop.f32.mrb[22].mxu0 }
 0x120   :  { %v1203_v15 = vpop.f32.mrb[19].mxu1  ;;  %v1273_v17 = vpop.f32.mrb[23].mxu0 }
 0x121   :  { %875 = vst.msk [vmem:[#allocation2 + $0x8] sm:$0xff] %vm19_vm1, %v860_v11  ;;  %v724_v18 = vadd.f32 %v1201_v12, %v1143_v29  ;;  %v1204_v19 = vadd.f32 %v1203_v15, %v1202_v13  ;;  %v40_v13 = vld [vmem:[#allocation2 + $0x30] sm:$0xff] }
 0x123   :  { %v813_v21 = vadd.f32 %v812_v8, %v724_v18  ;;  %v727_v23 = vadd.f32 %v1204_v19, %v1146_v34  ;;  %v41_v19 = vld [vmem:[#allocation2 + $0x38] sm:$0xff] }
 0x125   :  { %v861_v27 = vadd.f32 %v813_v21, %v36_v20  ;;  %v816_v28 = vadd.f32 %v815_v14, %v727_v23  ;;  %v1205_v24 = vpop.f32.mrb[20].mxu1  ;;  %v820_v31 = vpop.f32.mrb[24].mxu0 }
 0x126   :  { %v891_v32 = vld [vmem:[#allocation2] sm:$0xff]  ;;  %v1206_v33 = vpop.f32.mrb[21].mxu1  ;;  %v1276_v36 = vpop.f32.mrb[25].mxu0 }
 0x127   :  { %v912_v37 = vadd.f32 %v1723_v25, %v891_v32  ;;  %876 = vst.msk [vmem:[#allocation2 + $0x10] sm:$0xff] %vm19_vm1, %v861_v27  ;;  %v862_v29 = vadd.f32 %v816_v28, %v37_v26  ;;  %v1207_v38 = vadd.f32 %v1206_v33, %v1205_v24  ;;  %v1208_v34 = vpop.f32.mrb[22].mxu1  ;;  %v823_v39 = vpop.f32.mrb[26].mxu0 }
 0x128   :  { %v892_v41 = vld [vmem:[#allocation2 + $0x8] sm:$0xff]  ;;  %v1209_v43 = vpop.f32.mrb[23].mxu1  ;;  %v1277_v44 = vpop.f32.mrb[27].mxu0 }
 0x129   :  { %v926_v45 = vmax.f32 %v912_v37, 0.0  ;;  %v913_v48 = vadd.f32 %v1723_v25, %v892_v41  ;;  %877 = vst.msk [vmem:[#allocation2 + $0x18] sm:$0xff] %vm19_vm1, %v862_v29  ;;  %v732_v49 = vadd.f32 %v1207_v38, %v1706_v40  ;;  %v1210_v51 = vadd.f32 %v1209_v43, %v1208_v34  ;;  %v42_v44 = vld [vmem:[#allocation2 + $0x40] sm:$0xff] }
 0x12b   :  { %v1105_v54 = vpack.c.bf16 %v926_v45, %v926_v45  ;;  %v927_v55 = vmax.f32 %v913_v48, 0.0  ;;  %v821_v56 = vadd.f32 %v820_v31, %v732_v49  ;;  %v735_v57 = vadd.f32 %v1210_v51, %v1710_v46 }
 0x12d   :  { %997 = vst.msk [vmem:[%s1820_s3] sm:$0xf] %vm996_vm2, %v1105_v54  ;;  %v1106_v59 = vpack.c.bf16 %v927_v55, %v927_v55  ;;  %v863_v60 = vadd.f32 %v821_v56, %v38_v52  ;;  %v824_v61 = vadd.f32 %v823_v39, %v735_v57  ;;  %v1211_v62 = vpop.f32.mrb[24].mxu1  ;;  %v828_v63 = vpop.f32.mrb[28].mxu0  ;;  %v43_v52 = vld [vmem:[#allocation2 + $0x48] sm:$0xff] }
 0x12e   :  { %v893_v40 = vld [vmem:[#allocation2 + $0x10] sm:$0xff]  ;;  %v1212_v0 = vpop.f32.mrb[25].mxu1  ;;  %v1280_v1 = vpop.f32.mrb[29].mxu0 }
 0x12f   :  { %998 = vst.msk [vmem:[%s1820_s3 + $0x4] sm:$0xf] %vm996_vm2, %v1106_v59  ;;  %v914_v46 = vadd.f32 %v1723_v25, %v893_v40  ;;  %v864_v2 = vadd.f32 %v824_v61, %v39_v58  ;;  %v1213_v3 = vadd.f32 %v1212_v0, %v1211_v62  ;;  %v1214_v4 = vpop.f32.mrb[26].mxu1  ;;  %v831_v5 = vpop.f32.mrb[30].mxu0 }
 0x130   :  { %878 = vst.msk [vmem:[#allocation2 + $0x20] sm:$0xff] %vm19_vm1, %v863_v60  ;;  %v894_v6 = vld [vmem:[#allocation2 + $0x18] sm:$0xff]  ;;  %v1215_v7 = vpop.f32.mrb[27].mxu1  ;;  %v1281_v8 = vpop.f32.mrb[31].mxu0 }
 0x131   :  { %v928_v9 = vmax.f32 %v914_v46, 0.0  ;;  %v915_v10 = vadd.f32 %v1723_v25, %v894_v6  ;;  %879 = vst.msk [vmem:[#allocation2 + $0x28] sm:$0xff] %vm19_vm1, %v864_v2  ;;  %v740_v11 = vadd.f32 %v1213_v3, %v1714_v50  ;;  %v1216_v12 = vadd.f32 %v1215_v7, %v1214_v4  ;;  %v44_v6 = vld [vmem:[#allocation2 + $0x50] sm:$0xff] }
 0x133   :  { %v1107_v14 = vpack.c.bf16 %v928_v9, %v928_v9  ;;  %v929_v15 = vmax.f32 %v915_v10, 0.0  ;;  %v829_v17 = vadd.f32 %v828_v63, %v740_v11  ;;  %v743_v18 = vadd.f32 %v1216_v12, %v1716_v53  ;;  %v45_v11 = vld [vmem:[#allocation2 + $0x58] sm:$0xff] }
 0x135   :  { %999 = vst.msk [vmem:[%s1820_s3 + $0x8] sm:$0xf] %vm996_vm2, %v1107_v14  ;;  %v1108_v20 = vpack.c.bf16 %v929_v15, %v929_v15  ;;  %v865_v21 = vadd.f32 %v829_v17, %v40_v13  ;;  %v832_v23 = vadd.f32 %v831_v5, %v743_v18  ;;  %v1217_v26 = vpop.f32.mrb[28].mxu1  ;;  %v836_v27 = vpop.f32.mrb[32].mxu0 }
 0x136   :  { %v1218_v50 = vpop.f32.mrb[29].mxu1  ;;  %v1284_v24 = vpop.f32.mrb[33].mxu0 }
 0x137   :  { %v895_v28 = vld [vmem:[#allocation2 + $0x20] sm:$0xff]  ;;  %1000 = vst.msk [vmem:[%s1820_s3 + $0xc] sm:$0xf] %vm996_vm2, %v1108_v20  ;;  %v866_v31 = vadd.f32 %v832_v23, %v41_v19  ;;  %v1219_v32 = vadd.f32 %v1218_v50, %v1217_v26  ;;  %v1220_v33 = vpop.f32.mrb[30].mxu1  ;;  %v839_v36 = vpop.f32.mrb[34].mxu0 }
 0x138   :  { %v916_v53 = vadd.f32 %v1723_v25, %v895_v28  ;;  %880 = vst.msk [vmem:[#allocation2 + $0x30] sm:$0xff] %vm19_vm1, %v865_v21  ;;  %v896_v37 = vld [vmem:[#allocation2 + $0x28] sm:$0xff]  ;;  %v1221_v29 = vpop.f32.mrb[31].mxu1  ;;  %v1285_v38 = vpop.f32.mrb[35].mxu0 }
 0x139   :  { %v917_v39 = vadd.f32 %v1723_v25, %v896_v37  ;;  %881 = vst.msk [vmem:[#allocation2 + $0x38] sm:$0xff] %vm19_vm1, %v866_v31  ;;  %v748_v41 = vadd.f32 %v1219_v32, %v1698_v16  ;;  %v1222_v43 = vadd.f32 %v1221_v29, %v1220_v33  ;;  %v46_v33 = vld [vmem:[#allocation2 + $0x60] sm:$0xff] }
 0x13a   :  { %v930_v34 = vmax.f32 %v916_v53, 0.0 }
 0x13b   :  { %v931_v48 = vmax.f32 %v917_v39, 0.0  ;;  %v837_v49 = vadd.f32 %v836_v27, %v748_v41  ;;  %v751_v51 = vadd.f32 %v1222_v43, %v1700_v22 }
 0x13c   :  { %v1109_v45 = vpack.c.bf16 %v930_v34, %v930_v34  ;;  %v47_v34 = vld [vmem:[#allocation2 + $0x68] sm:$0xff] }
 0x13d   :  { %v1110_v54 = vpack.c.bf16 %v931_v48, %v931_v48  ;;  %v867_v55 = vadd.f32 %v837_v49, %v42_v44  ;;  %v840_v56 = vadd.f32 %v839_v36, %v751_v51  ;;  %v1223_v57 = vpop.f32.mrb[32].mxu1  ;;  %v844_v58 = vpop.f32.mrb[36].mxu0 }
 0x13e   :  { %1001 = vst.msk [vmem:[%s1820_s3 + $0x10] sm:$0xf] %vm996_vm2, %v1109_v45  ;;  %v1224_v16 = vpop.f32.mrb[33].mxu1  ;;  %v1288_v60 = vpop.f32.mrb[37].mxu0 }
 0x13f   :  { %v897_v59 = vld [vmem:[#allocation2 + $0x30] sm:$0xff]  ;;  %1002 = vst.msk [vmem:[%s1820_s3 + $0x14] sm:$0xf] %vm996_vm2, %v1110_v54  ;;  %v868_v61 = vadd.f32 %v840_v56, %v43_v52  ;;  %v1225_v62 = vadd.f32 %v1224_v16, %v1223_v57  ;;  %v1226_v63 = vpop.f32.mrb[34].mxu1  ;;  %v847_v40 = vpop.f32.mrb[38].mxu0 }
 0x140   :  { %v918_v22 = vadd.f32 %v1723_v25, %v897_v59  ;;  %882 = vst.msk [vmem:[#allocation2 + $0x40] sm:$0xff] %vm19_vm1, %v867_v55  ;;  %v898_v0 = vld [vmem:[#allocation2 + $0x38] sm:$0xff]  ;;  %v1227_v1 = vpop.f32.mrb[35].mxu1  ;;  %v1289_v46 = vpop.f32.mrb[39].mxu0 }
 0x141   :  { %v919_v3 = vadd.f32 %v1723_v25, %v898_v0  ;;  %883 = vst.msk [vmem:[#allocation2 + $0x48] sm:$0xff] %vm19_vm1, %v868_v61  ;;  %v756_v4 = vadd.f32 %v1225_v62, %v1702_v30  ;;  %v1228_v5 = vadd.f32 %v1227_v1, %v1226_v63 }
 0x142   :  { %v932_v2 = vmax.f32 %v918_v22, 0.0 }
 0x143   :  { %v933_v8 = vmax.f32 %v919_v3, 0.0  ;;  %v845_v9 = vadd.f32 %v844_v58, %v756_v4  ;;  %v759_v10 = vadd.f32 %v1228_v5, %v1704_v35 }
 0x144   :  { %v1111_v7 = vpack.c.bf16 %v932_v2, %v932_v2 }
 0x145   :  { %v1112_v12 = vpack.c.bf16 %v933_v8, %v933_v8  ;;  %v869_v13 = vadd.f32 %v845_v9, %v44_v6  ;;  %v848_v14 = vadd.f32 %v847_v40, %v759_v10  ;;  %v1229_v15 = vpop.f32.mrb[36].mxu1  ;;  %v852_v17 = vpop.f32.mrb[40].mxu0 }
 0x146   :  { %1003 = vst.msk [vmem:[%s1820_s3 + $0x18] sm:$0xf] %vm996_vm2, %v1111_v7  ;;  %v1230_v30 = vpop.f32.mrb[37].mxu1  ;;  %v1292_v19 = vpop.f32.mrb[41].mxu0 }
 0x147   :  { %v899_v18 = vld [vmem:[#allocation2 + $0x40] sm:$0xff]  ;;  %1004 = vst.msk [vmem:[%s1820_s3 + $0x1c] sm:$0xf] %vm996_vm2, %v1112_v12  ;;  %v870_v20 = vadd.f32 %v848_v14, %v45_v11  ;;  %v1231_v21 = vadd.f32 %v1230_v30, %v1229_v15  ;;  %v1232_v23 = vpop.f32.mrb[38].mxu1  ;;  %v855_v26 = vpop.f32.mrb[42].mxu0 }
 0x148   :  { %v920_v35 = vadd.f32 %v1723_v25, %v899_v18  ;;  %884 = vst.msk [vmem:[#allocation2 + $0x50] sm:$0xff] %vm19_vm1, %v869_v13  ;;  %v900_v27 = vld [vmem:[#allocation2 + $0x48] sm:$0xff]  ;;  %v1233_v28 = vpop.f32.mrb[39].mxu1  ;;  %v1293_v50 = vpop.f32.mrb[43].mxu0 }
 0x149   :  { %v921_v53 = vadd.f32 %v1723_v25, %v900_v27  ;;  %885 = vst.msk [vmem:[#allocation2 + $0x58] sm:$0xff] %vm19_vm1, %v870_v20  ;;  %v764_v31 = vadd.f32 %v1231_v21, %v1708_v42  ;;  %v1234_v32 = vadd.f32 %v1233_v28, %v1232_v23 }
 0x14a   :  { %v934_v24 = vmax.f32 %v920_v35, 0.0 }
 0x14b   :  { %v935_v37 = vmax.f32 %v921_v53, 0.0  ;;  %v853_v29 = vadd.f32 %v852_v17, %v764_v31  ;;  %v767_v38 = vadd.f32 %v1234_v32, %v1712_v47 }
 0x14c   :  { %v1113_v36 = vpack.c.bf16 %v934_v24, %v934_v24 }
 0x14d   :  { %v1114_v39 = vpack.c.bf16 %v935_v37, %v935_v37  ;;  %v871_v41 = vadd.f32 %v853_v29, %v46_v33  ;;  %v856_v43 = vadd.f32 %v855_v26, %v767_v38 }
 0x14e   :  { %1005 = vst.msk [vmem:[%s1820_s3 + $0x20] sm:$0xf] %vm996_vm2, %v1113_v36 }
 0x14f   :  { %v901_v44 = vld [vmem:[#allocation2 + $0x50] sm:$0xff]  ;;  %1006 = vst.msk [vmem:[%s1820_s3 + $0x24] sm:$0xf] %vm996_vm2, %v1114_v39  ;;  %v872_v47 = vadd.f32 %v856_v43, %v47_v34 }
 0x150   :  { %v922_v42 = vadd.f32 %v1723_v25, %v901_v44  ;;  %886 = vst.msk [vmem:[#allocation2 + $0x60] sm:$0xff] %vm19_vm1, %v871_v41  ;;  %v902_v45 = vld [vmem:[#allocation2 + $0x58] sm:$0xff] }
 0x151   :  { %v923_v49 = vadd.f32 %v1723_v25, %v902_v45  ;;  %887 = vst.msk [vmem:[#allocation2 + $0x68] sm:$0xff] %vm19_vm1, %v872_v47 }
 0x152   :  { %v936_v48 = vmax.f32 %v922_v42, 0.0 }
 0x153   :  { %v937_v52 = vmax.f32 %v923_v49, 0.0 }
 0x154   :  { %v1115_v51 = vpack.c.bf16 %v936_v48, %v936_v48 }
 0x155   :  { %v1116_v54 = vpack.c.bf16 %v937_v52, %v937_v52 }
 0x156   :  { %1007 = vst.msk [vmem:[%s1820_s3 + $0x28] sm:$0xf] %vm996_vm2, %v1115_v51 }
 0x157   :  { %v903_v55 = vld [vmem:[#allocation2 + $0x60] sm:$0xff]  ;;  %1008 = vst.msk [vmem:[%s1820_s3 + $0x2c] sm:$0xf] %vm996_vm2, %v1116_v54 }
 0x158   :  { %v924_v56 = vadd.f32 %v1723_v25, %v903_v55  ;;  %v904_v57 = vld [vmem:[#allocation2 + $0x68] sm:$0xff] }
 0x159   :  { %v925_v59 = vadd.f32 %v1723_v25, %v904_v57 }
 0x15a   :  { %v938_v58 = vmax.f32 %v924_v56, 0.0 }
 0x15b   :  { %v939_v60 = vmax.f32 %v925_v59, 0.0 }
 0x15c   :  { %v1117_v16 = vpack.c.bf16 %v938_v58, %v938_v58 }
 0x15d   :  { %v1118_v22 = vpack.c.bf16 %v939_v60, %v939_v60 }
 0x15e   :  { %1009 = vst.msk [vmem:[%s1820_s3 + $0x30] sm:$0xf] %vm996_vm2, %v1117_v16 }
 0x15f   :  { %1010 = vst.msk [vmem:[%s1820_s3 + $0x34] sm:$0xf] %vm996_vm2, %v1118_v22 }

// kernel: qnetwork_forward.14
= control target key start
LH: loop header
LB: loop body
LE: loop exit
PB: predicated region body
PF: predicated region fallthrough
CT: control target
= control target key end

     0   :  { %s2931_s12 = smov 0   ;;  %s2933_s13 = smov 0   ;;  %s3248_s0 = inlined_call_operand.vmem [shape: bf16[16,3584], index: 0, kind: input, shape index: {}]   ;;  %s3249_s1 = inlined_call_operand.vmem [shape: bf16[3584,512], index: 1, kind: input, shape index: {}]   ;;  %s3250_s2 = inlined_call_operand.vmem [shape: f32[1,512], index: 2, kind: input, shape index: {}]   ;;  %s3251_s3 = inlined_call_operand.vmem [shape: bf16[16,512], index: 3, kind: output, shape index: {}]  }
   0x1   :  { %s2935_s14 = smov 0   ;;  %s2937_s15 = smov 0  }
   0x2   :  { %s2939_s16 = smov 0  }
   0x3 LB: > { %s22_s17 = sadd.s32 1, %s2903_s15  ;;  %p41_p1 = scmp.ne.s32.totalorder %s2895_s13, %s2891_s12  ;;  %s2907_s16 = sphi %s2939_s16, %s13_s16   ;;  %s2903_s15 = sphi %s2937_s15, %s3255_s15   ;;  %s2899_s14 = sphi %s2935_s14, %s3254_s14   ;;  %s2895_s13 = sphi %s2933_s13, %s3253_s13   ;;  %s2891_s12 = sphi %s2931_s12, %s3252_s12  }
   0x4   : > { %p23_p0 = scmp.ge.s32.totalorder %s22_s17, 4  ;;  %p42_p2 = scmp.eq.s32.totalorder %s2907_s16, 0 }
   0x5   : > { %s34_s19 = sadd.s32 1, %s2895_s13  ;;  %p2199_p5 = scmp.ge.s32.totalorder %s2907_s16, 4 }
   0x6   : > { %s3257_s17 = smov (%p23_p0, %s22_s17), 0  ;;  %p43_p3 = por %p42_p2, %p41_p1 }
   0x7   : > { %s30_s18 = ssub.s32 %s2903_s15, %s3257_s17  ;;  %143 = sbr.rel (%p2199_p5) target bundleno = 23 (0x17), region = 20 }
   0x8   : > { %p32_p4 = scmp.eq.s32.totalorder %s30_s18, 0 }
   0xa   : > { %s2966_s20 = scalar_select %p32_p4, %s2895_s13, %s34_s19  }
   0xe   : > { %146 = sbr.rel (!%p43_p3) target bundleno = 23 (0x17), region = 24  ;;  %s148_s21 = sand.u32 (%p43_p3), 1, %s2895_s13  }
   0xf   : > { %s2449_s22 = smul.u32 (%p43_p3), 28, %s2903_s15 }
  0x10   : > { %s2479_s23 = smul.u32 (%p43_p3), 56, %s148_s21 }
  0x11   : > { %s156_s26 = scalar_lea.vmem (%p43_p3), %s3248_s0, %s2449_s22 }
  0x12   : > { %v171_v0 = vld [vmem:[%s156_s26] sm:$0xff] (%p43_p3)  ;;  %v173_v1 = vld [vmem:[%s156_s26 + $0x8] sm:$0xff] (%p43_p3)  ;;  %v175_v2 = vld [vmem:[%s156_s26 + $0x10] sm:$0xff] (%p43_p3)  ;;  %s150_s27 = scalar_lea.vmem (%p43_p3), [#allocation3], %s2479_s23 }
  0x13   : > { %172 = vst [vmem:[%s150_s27] sm:$0xff] (%p43_p3), %v171_v0  ;;  %174 = vst [vmem:[%s150_s27 + $0x8] sm:$0xff] (%p43_p3), %v173_v1  ;;  %v177_v3 = vld [vmem:[%s156_s26 + $0x70] sm:$0xff] (%p43_p3)  ;;  %v179_v4 = vld [vmem:[%s156_s26 + $0x78] sm:$0xff] (%p43_p3) }
  0x14   : > { %176 = vst [vmem:[%s150_s27 + $0x10] sm:$0xff] (%p43_p3), %v175_v2  ;;  %v181_v5 = vld [vmem:[%s156_s26 + $0x80] sm:$0xff] (%p43_p3)  ;;  %178 = vst [vmem:[%s150_s27 + $0x1c] sm:$0xff] (%p43_p3), %v177_v3  ;;  %v2201_v6 = vld [vmem:[%s156_s26 + $0x18] sm:$0xf] (%p43_p3) }
  0x15   : > { %180 = vst [vmem:[%s150_s27 + $0x24] sm:$0xff] %v179_v4  ;;  %182 = vst [vmem:[%s150_s27 + $0x2c] sm:$0xff] %v181_v5  ;;  %v2203_v7 = vld [vmem:[%s156_s26 + $0x88] sm:$0xf] }
  0x16   : > { %2202 = vst [vmem:[%s150_s27 + $0x18] sm:$0xf] %v2201_v6  ;;  %2204 = vst [vmem:[%s150_s27 + $0x34] sm:$0xf] %v2203_v7 }
  0x17 PF: > { %p2205_p6 = scmp.ge.s32.totalorder %s2907_s16, 1  ;;  %p208_p7 = scmp.lt.s32.totalorder %s2907_s16, 5 }
  0x19   : > { %p209_p8 = pnand %p2205_p6, %p208_p7 }
  0x1a   : > { %s215_s28 = sand.u32 (!%p209_p8), 1, %s2891_s12   ;;  %s247_s29 = smul.u32 (!%p209_p8), 112, %s2899_s14 }
  0x1b   : > { %212 = sbr.rel (%p209_p8) target bundleno = 498 (0x1f2), region = 54  ;;  %p2208_p10 = scmp.ne.s32.totalorder (!%p209_p8), %s2899_s14, 0 }
  0x1c   : > { %s2480_s30 = smul.u32 (!%p209_p8), 56, %s215_s28  ;;  %p248_p9 = scmp.lt.s32.totalorder (!%p209_p8), %s247_s29, 447 }
  0x1e   : > { %s2983_s8 = scalar_lea.vmem (!%p209_p8), [#allocation3], %s2480_s30 }
  0x22   : > { %s3259_s29 = smov (!%p248_p9, %s247_s29), 447  ;;  %265 = sbr.rel (%p2208_p10) target bundleno = 41 (0x29), region = 62 }
  0x23   : > { %s2450_s4 = sshll.u32 %s3259_s29, 4  ;;  %v2909_v8 = vmov (!%p2208_p10), 0.0  }
  0x24   : > { %s2981_s7 = scalar_lea.vmem %s3249_s1, %s2450_s4  ;;  %266 = vst [vmem:[#allocation2] sm:$0xff] (!%p2208_p10), %v2909_v8  ;;  %267 = vst [vmem:[#allocation2 + $0x8] sm:$0xff] (!%p2208_p10), %v2909_v8 }
  0x25   : > { %268 = vst [vmem:[#allocation2 + $0x10] sm:$0xff] (!%p2208_p10), %v2909_v8  ;;  %269 = vst [vmem:[#allocation2 + $0x18] sm:$0xff] (!%p2208_p10), %v2909_v8 }
  0x26   : > { %270 = vst [vmem:[#allocation2 + $0x20] sm:$0xff] (!%p2208_p10), %v2909_v8  ;;  %271 = vst [vmem:[#allocation2 + $0x28] sm:$0xff] (!%p2208_p10), %v2909_v8 }
  0x27   : > { %272 = vst [vmem:[#allocation2 + $0x30] sm:$0xff] (!%p2208_p10), %v2909_v8  ;;  %273 = vst [vmem:[#allocation2 + $0x38] sm:$0xff] (!%p2208_p10), %v2909_v8 }
  0x29 PF: > { %v2523_v9 = vld [vmem:[%s2981_s7 + $0x4] ss:$16 sps:$4 sm:$0xff]   ;;  %v2525_v10 = vld [vmem:[%s2981_s7 + $0xc] ss:$16 sps:$4 sm:$0xff]   ;;  %v2527_v11 = vld [vmem:[%s2981_s7] ss:$16 sps:$4 sm:$0xff]  }
  0x2a   : > { %1670 = vmatprep.subr.bf16.mxu0 %v2523_v9  ;;  %v2528_v12 = vld [vmem:[%s2981_s7 + $0x8] ss:$16 sps:$4 sm:$0xff]   ;;  %1842 = vmatprep.subr.bf16.mxu1 %v2525_v10  ;;  %v2529_v13 = vld [vmem:[%s2981_s7 + $0x24] ss:$16 sps:$4 sm:$0xff]   ;;  %v2531_v14 = vld [vmem:[%s2981_s7 + $0x2c] ss:$16 sps:$4 sm:$0xff]  }
  0x2b   : > { %1671 = vmatpush1.bf16.msra.mxu0 %v2527_v11  ;;  %1843 = vmatpush1.bf16.msra.mxu1 %v2528_v12  ;;  %v2533_v15 = vld [vmem:[%s2981_s7 + $0x20] ss:$16 sps:$4 sm:$0xff]   ;;  %v2534_v16 = vld [vmem:[%s2981_s7 + $0x28] ss:$16 sps:$4 sm:$0xff]   ;;  %v2535_v17 = vld [vmem:[%s2981_s7 + $0x44] ss:$16 sps:$4 sm:$0xff]  }
  0x2c   : > { %1672 = vmatprep.subr.bf16.mxu0 %v2529_v13  ;;  %1844 = vmatprep.subr.bf16.mxu1 %v2531_v14  ;;  %v2537_v18 = vld [vmem:[%s2981_s7 + $0x4c] ss:$16 sps:$4 sm:$0xff]   ;;  %v2539_v19 = vld [vmem:[%s2981_s7 + $0x40] ss:$16 sps:$4 sm:$0xff]   ;;  %v2540_v20 = vld [vmem:[%s2981_s7 + $0x48] ss:$16 sps:$4 sm:$0xff]  }
  0x2d   : > { %v2541_v21 = vld [vmem:[%s2981_s7 + $0x64] ss:$16 sps:$4 sm:$0xff]   ;;  %v2543_v22 = vld [vmem:[%s2981_s7 + $0x6c] ss:$16 sps:$4 sm:$0xff]   ;;  %v2545_v23 = vld [vmem:[%s2981_s7 + $0x60] ss:$16 sps:$4 sm:$0xff]  }
  0x2e   : > { %v2546_v24 = vld [vmem:[%s2981_s7 + $0x68] ss:$16 sps:$4 sm:$0xff]   ;;  %v2547_v25 = vld [vmem:[%s2981_s7 + $0x84] ss:$16 sps:$4 sm:$0xff]   ;;  %v2549_v26 = vld [vmem:[%s2981_s7 + $0x8c] ss:$16 sps:$4 sm:$0xff]  }
  0x2f   : > { %1673 = vmatpush1.bf16.msra.mxu0 %v2533_v15  ;;  %1845 = vmatpush1.bf16.msra.mxu1 %v2534_v16  ;;  %v2551_v27 = vld [vmem:[%s2981_s7 + $0x80] ss:$16 sps:$4 sm:$0xff]   ;;  %v2552_v28 = vld [vmem:[%s2981_s7 + $0x88] ss:$16 sps:$4 sm:$0xff]   ;;  %v2553_v29 = vld [vmem:[%s2981_s7 + $0xa4] ss:$16 sps:$4 sm:$0xff]  }
  0x30   : > { %1674 = vmatprep.subr.bf16.mxu0 %v2535_v17  ;;  %1846 = vmatprep.subr.bf16.mxu1 %v2537_v18  ;;  %v2555_v30 = vld [vmem:[%s2981_s7 + $0xac] ss:$16 sps:$4 sm:$0xff]   ;;  %v2557_v31 = vld [vmem:[%s2981_s7 + $0xa0] ss:$16 sps:$4 sm:$0xff]   ;;  %v2558_v32 = vld [vmem:[%s2981_s7 + $0xa8] ss:$16 sps:$4 sm:$0xff]  }
  0x31   : > { %v2559_v33 = vld [vmem:[%s2981_s7 + $0xc4] ss:$16 sps:$4 sm:$0xff]   ;;  %v2561_v34 = vld [vmem:[%s2981_s7 + $0xcc] ss:$16 sps:$4 sm:$0xff]   ;;  %v2563_v35 = vld [vmem:[%s2981_s7 + $0xc0] ss:$16 sps:$4 sm:$0xff]  }
  0x32   : > { %v2564_v36 = vld [vmem:[%s2981_s7 + $0xc8] ss:$16 sps:$4 sm:$0xff]   ;;  %v2565_v37 = vld [vmem:[%s2981_s7 + $0xe4] ss:$16 sps:$4 sm:$0xff]   ;;  %v2567_v38 = vld [vmem:[%s2981_s7 + $0xec] ss:$16 sps:$4 sm:$0xff]  }
  0x33   : > { %1675 = vmatpush1.bf16.msra.mxu0 %v2539_v19  ;;  %1847 = vmatpush1.bf16.msra.mxu1 %v2540_v20  ;;  %v2569_v39 = vld [vmem:[%s2981_s7 + $0xe0] ss:$16 sps:$4 sm:$0xff]   ;;  %v2570_v40 = vld [vmem:[%s2981_s7 + $0xe8] ss:$16 sps:$4 sm:$0xff]   ;;  %v2571_v41 = vld [vmem:[%s2981_s7 + $0x104] ss:$16 sps:$4 sm:$0xff]  }
  0x34   : > { %1676 = vmatprep.subr.bf16.mxu0 %v2541_v21  ;;  %1848 = vmatprep.subr.bf16.mxu1 %v2543_v22  ;;  %v2573_v42 = vld [vmem:[%s2981_s7 + $0x10c] ss:$16 sps:$4 sm:$0xff]   ;;  %v2575_v43 = vld [vmem:[%s2981_s7 + $0x100] ss:$16 sps:$4 sm:$0xff]   ;;  %v2576_v44 = vld [vmem:[%s2981_s7 + $0x108] ss:$16 sps:$4 sm:$0xff]  }
  0x35   : > { %v2577_v45 = vld [vmem:[%s2981_s7 + $0x124] ss:$16 sps:$4 sm:$0xff]   ;;  %v2579_v46 = vld [vmem:[%s2981_s7 + $0x12c] ss:$16 sps:$4 sm:$0xff]   ;;  %v2581_v47 = vld [vmem:[%s2981_s7 + $0x120] ss:$16 sps:$4 sm:$0xff]  }
  0x36   : > { %v2582_v48 = vld [vmem:[%s2981_s7 + $0x128] ss:$16 sps:$4 sm:$0xff]   ;;  %v2583_v49 = vld [vmem:[%s2981_s7 + $0x144] ss:$16 sps:$4 sm:$0xff]   ;;  %v2585_v50 = vld [vmem:[%s2981_s7 + $0x14c] ss:$16 sps:$4 sm:$0xff]  }
  0x37   : > { %1677 = vmatpush1.bf16.msra.mxu0 %v2545_v23  ;;  %1849 = vmatpush1.bf16.msra.mxu1 %v2546_v24  ;;  %v2587_v51 = vld [vmem:[%s2981_s7 + $0x140] ss:$16 sps:$4 sm:$0xff]   ;;  %v2588_v52 = vld [vmem:[%s2981_s7 + $0x148] ss:$16 sps:$4 sm:$0xff]   ;;  %v2589_v53 = vld [vmem:[%s2981_s7 + $0x164] ss:$16 sps:$4 sm:$0xff]  }
  0x38   : > { %1678 = vmatprep.subr.bf16.mxu0 %v2547_v25  ;;  %1850 = vmatprep.subr.bf16.mxu1 %v2549_v26  ;;  %v2591_v54 = vld [vmem:[%s2981_s7 + $0x16c] ss:$16 sps:$4 sm:$0xff]   ;;  %v2593_v55 = vld [vmem:[%s2981_s7 + $0x160] ss:$16 sps:$4 sm:$0xff]   ;;  %v2594_v56 = vld [vmem:[%s2981_s7 + $0x168] ss:$16 sps:$4 sm:$0xff]  }
  0x39   : > { %v2621_v57 = vld [vmem:[%s2983_s8 + $0x4] ss:$28 sps:$4 sm:$0xff]   ;;  %p2440_p11 = scmp.ne.s32.totalorder %s2899_s14, 3 }
  0x3a   : > { %v2595_v58 = vld [vmem:[%s2981_s7 + $0x184] ss:$16 sps:$4 sm:$0xff]   ;;  %v2597_v59 = vld [vmem:[%s2981_s7 + $0x18c] ss:$16 sps:$4 sm:$0xff]   ;;  %1702 = vmatprep.mubr.bf16.mxu0 %v2621_v57  ;;  %1874 = vmatprep.mubr.bf16.mxu1 %v2621_v57  ;;  %v2599_v60 = vld [vmem:[%s2981_s7 + $0x180] ss:$16 sps:$4 sm:$0xff]  }
  0x3b   : > { %1679 = vmatpush1.bf16.msra.mxu0 %v2551_v27  ;;  %1851 = vmatpush1.bf16.msra.mxu1 %v2552_v28  ;;  %v2600_v61 = vld [vmem:[%s2981_s7 + $0x188] ss:$16 sps:$4 sm:$0xff]   ;;  %v2601_v62 = vld [vmem:[%s2981_s7 + $0x1a4] ss:$16 sps:$4 sm:$0xff]   ;;  %v2603_v63 = vld [vmem:[%s2981_s7 + $0x1ac] ss:$16 sps:$4 sm:$0xff]  }
  0x3c   : > { %1680 = vmatprep.subr.bf16.mxu0 %v2553_v29  ;;  %1852 = vmatprep.subr.bf16.mxu1 %v2555_v30  ;;  %v2605_v0 = vld [vmem:[%s2981_s7 + $0x1a0] ss:$16 sps:$4 sm:$0xff]   ;;  %v2606_v1 = vld [vmem:[%s2981_s7 + $0x1a8] ss:$16 sps:$4 sm:$0xff]   ;;  %v2607_v2 = vld [vmem:[%s2981_s7 + $0x1c4] ss:$16 sps:$4 sm:$0xff]  }
  0x3d   : > { %v2609_v3 = vld [vmem:[%s2981_s7 + $0x1cc] ss:$16 sps:$4 sm:$0xff]   ;;  %v2611_v4 = vld [vmem:[%s2981_s7 + $0x1c0] ss:$16 sps:$4 sm:$0xff]   ;;  %v2612_v5 = vld [vmem:[%s2981_s7 + $0x1c8] ss:$16 sps:$4 sm:$0xff]  }
  0x3e   : > { %v2613_v6 = vld [vmem:[%s2981_s7 + $0x1e4] ss:$16 sps:$4 sm:$0xff]   ;;  %v2615_v7 = vld [vmem:[%s2981_s7 + $0x1ec] ss:$16 sps:$4 sm:$0xff]   ;;  %v2617_v8 = vld [vmem:[%s2981_s7 + $0x1e0] ss:$16 sps:$4 sm:$0xff]  }
  0x3f   : > { %1681 = vmatpush1.bf16.msra.mxu0 %v2557_v31  ;;  %1853 = vmatpush1.bf16.msra.mxu1 %v2558_v32  ;;  %v2618_v9 = vld [vmem:[%s2981_s7 + $0x1e8] ss:$16 sps:$4 sm:$0xff]   ;;  %v2624_v10 = vld [vmem:[%s2981_s7 + $0x204] ss:$16 sps:$4 sm:$0xff]   ;;  %v2627_v11 = vld [vmem:[%s2981_s7 + $0x20c] ss:$16 sps:$4 sm:$0xff]  }
  0x40   : > { %1682 = vmatprep.subr.bf16.mxu0 %v2559_v33  ;;  %1854 = vmatprep.subr.bf16.mxu1 %v2561_v34  ;;  %v2619_v12 = vld [vmem:[%s2983_s8] ss:$28 sps:$4 sm:$0xff]  }
  0x41   : > { %v2622_v13 = vld [vmem:[%s2981_s7 + $0x200] ss:$16 sps:$4 sm:$0xff]   ;;  %v2625_v14 = vld [vmem:[%s2981_s7 + $0x208] ss:$16 sps:$4 sm:$0xff]   ;;  %v2630_v15 = vld [vmem:[%s2981_s7 + $0x224] ss:$16 sps:$4 sm:$0xff]  }
  0x42   : > { %v2633_v16 = vld [vmem:[%s2981_s7 + $0x22c] ss:$16 sps:$4 sm:$0xff]   ;;  %v2628_v17 = vld [vmem:[%s2981_s7 + $0x220] ss:$16 sps:$4 sm:$0xff]   ;;  %v2631_v18 = vld [vmem:[%s2981_s7 + $0x228] ss:$16 sps:$4 sm:$0xff]  }
  0x43   : > { %1683 = vmatpush1.bf16.msra.mxu0 %v2563_v35  ;;  %1855 = vmatpush1.bf16.msra.mxu1 %v2564_v36  ;;  %v2636_v19 = vld [vmem:[%s2981_s7 + $0x244] ss:$16 sps:$4 sm:$0xff]   ;;  %v2639_v20 = vld [vmem:[%s2981_s7 + $0x24c] ss:$16 sps:$4 sm:$0xff]   ;;  %v2634_v21 = vld [vmem:[%s2981_s7 + $0x240] ss:$16 sps:$4 sm:$0xff]  }
  0x44   : > { %1684 = vmatprep.subr.bf16.mxu0 %v2565_v37  ;;  %1856 = vmatprep.subr.bf16.mxu1 %v2567_v38  ;;  %v2637_v22 = vld [vmem:[%s2981_s7 + $0x248] ss:$16 sps:$4 sm:$0xff]   ;;  %v2642_v23 = vld [vmem:[%s2981_s7 + $0x264] ss:$16 sps:$4 sm:$0xff]   ;;  %v2645_v24 = vld [vmem:[%s2981_s7 + $0x26c] ss:$16 sps:$4 sm:$0xff]  }
  0x45   : > { %v2640_v25 = vld [vmem:[%s2981_s7 + $0x260] ss:$16 sps:$4 sm:$0xff]   ;;  %v2643_v26 = vld [vmem:[%s2981_s7 + $0x268] ss:$16 sps:$4 sm:$0xff]   ;;  %v2648_v27 = vld [vmem:[%s2981_s7 + $0x284] ss:$16 sps:$4 sm:$0xff]  }
  0x46   : > { %v2651_v28 = vld [vmem:[%s2981_s7 + $0x28c] ss:$16 sps:$4 sm:$0xff]   ;;  %v2646_v29 = vld [vmem:[%s2981_s7 + $0x280] ss:$16 sps:$4 sm:$0xff]   ;;  %v2649_v30 = vld [vmem:[%s2981_s7 + $0x288] ss:$16 sps:$4 sm:$0xff]  }
  0x47   : > { %1685 = vmatpush1.bf16.msra.mxu0 %v2569_v39  ;;  %1857 = vmatpush1.bf16.msra.mxu1 %v2570_v40  ;;  %v2654_v31 = vld [vmem:[%s2981_s7 + $0x2a4] ss:$16 sps:$4 sm:$0xff]   ;;  %v2657_v32 = vld [vmem:[%s2981_s7 + $0x2ac] ss:$16 sps:$4 sm:$0xff]   ;;  %v2652_v33 = vld [vmem:[%s2981_s7 + $0x2a0] ss:$16 sps:$4 sm:$0xff]  }
  0x48   : > { %1686 = vmatprep.subr.bf16.mxu0 %v2571_v41  ;;  %1858 = vmatprep.subr.bf16.mxu1 %v2573_v42  ;;  %v2655_v34 = vld [vmem:[%s2981_s7 + $0x2a8] ss:$16 sps:$4 sm:$0xff]   ;;  %v2660_v35 = vld [vmem:[%s2981_s7 + $0x2c4] ss:$16 sps:$4 sm:$0xff]   ;;  %v2663_v36 = vld [vmem:[%s2981_s7 + $0x2cc] ss:$16 sps:$4 sm:$0xff]  }
  0x49   : > { %v2658_v37 = vld [vmem:[%s2981_s7 + $0x2c0] ss:$16 sps:$4 sm:$0xff]   ;;  %v2661_v38 = vld [vmem:[%s2981_s7 + $0x2c8] ss:$16 sps:$4 sm:$0xff]   ;;  %v2666_v40 = vld [vmem:[%s2981_s7 + $0x2e4] ss:$16 sps:$4 sm:$0xff]  }
  0x4a   : > { %v2720_v39 = vld [vmem:[%s2983_s8 + $0xc] ss:$28 sps:$4 sm:$0xff]  }
  0x4b   : > { %1687 = vmatpush1.bf16.msra.mxu0 %v2575_v43  ;;  %1859 = vmatpush1.bf16.msra.mxu1 %v2576_v44  ;;  %v2669_v41 = vld [vmem:[%s2981_s7 + $0x2ec] ss:$16 sps:$4 sm:$0xff]   ;;  %v2664_v42 = vld [vmem:[%s2981_s7 + $0x2e0] ss:$16 sps:$4 sm:$0xff]   ;;  %v2667_v43 = vld [vmem:[%s2981_s7 + $0x2e8] ss:$16 sps:$4 sm:$0xff]  }
  0x4c   : > { %1688 = vmatprep.subr.bf16.mxu0 %v2577_v45  ;;  %1860 = vmatprep.subr.bf16.mxu1 %v2579_v46  ;;  %v2672_v44 = vld [vmem:[%s2981_s7 + $0x304] ss:$16 sps:$4 sm:$0xff]   ;;  %v2675_v45 = vld [vmem:[%s2981_s7 + $0x30c] ss:$16 sps:$4 sm:$0xff]   ;;  %v2670_v46 = vld [vmem:[%s2981_s7 + $0x300] ss:$16 sps:$4 sm:$0xff]  }
  0x4d   : > { %v2693_v57 = vld [vmem:[%s2981_s7 + $0x36c] ss:$16 sps:$4 sm:$0xff]  }
  0x4f   : > { %1689 = vmatpush1.bf16.msra.mxu0 %v2581_v47  ;;  %1861 = vmatpush1.bf16.msra.mxu1 %v2582_v48  ;;  %v2673_v47 = vld [vmem:[%s2981_s7 + $0x308] ss:$16 sps:$4 sm:$0xff]   ;;  %v2678_v48 = vld [vmem:[%s2981_s7 + $0x324] ss:$16 sps:$4 sm:$0xff]  }
  0x50   : > { %1690 = vmatprep.subr.bf16.mxu0 %v2583_v49  ;;  %1862 = vmatprep.subr.bf16.mxu1 %v2585_v50  ;;  %v2681_v49 = vld [vmem:[%s2981_s7 + $0x32c] ss:$16 sps:$4 sm:$0xff]   ;;  %v2676_v50 = vld [vmem:[%s2981_s7 + $0x320] ss:$16 sps:$4 sm:$0xff]  }
  0x53   : > { %1691 = vmatpush1.bf16.msra.mxu0 %v2587_v51  ;;  %1863 = vmatpush1.bf16.msra.mxu1 %v2588_v52  ;;  %v2679_v51 = vld [vmem:[%s2981_s7 + $0x328] ss:$16 sps:$4 sm:$0xff]   ;;  %v2684_v52 = vld [vmem:[%s2981_s7 + $0x344] ss:$16 sps:$4 sm:$0xff]  }
  0x54   : > { %1692 = vmatprep.subr.bf16.mxu0 %v2589_v53  ;;  %1864 = vmatprep.subr.bf16.mxu1 %v2591_v54  ;;  %v2687_v53 = vld [vmem:[%s2981_s7 + $0x34c] ss:$16 sps:$4 sm:$0xff]   ;;  %v2682_v54 = vld [vmem:[%s2981_s7 + $0x340] ss:$16 sps:$4 sm:$0xff]  }
  0x57   : > { %1693 = vmatpush1.bf16.msra.mxu0 %v2593_v55  ;;  %1865 = vmatpush1.bf16.msra.mxu1 %v2594_v56  ;;  %v2685_v55 = vld [vmem:[%s2981_s7 + $0x348] ss:$16 sps:$4 sm:$0xff]   ;;  %v2690_v56 = vld [vmem:[%s2981_s7 + $0x364] ss:$16 sps:$4 sm:$0xff]  }
  0x58   : > { %1694 = vmatprep.subr.bf16.mxu0 %v2595_v58  ;;  %1866 = vmatprep.subr.bf16.mxu1 %v2597_v59  ;;  %v2688_v58 = vld [vmem:[%s2981_s7 + $0x360] ss:$16 sps:$4 sm:$0xff]   ;;  %v2691_v59 = vld [vmem:[%s2981_s7 + $0x368] ss:$16 sps:$4 sm:$0xff]  }
  0x5b   : > { %1695 = vmatpush1.bf16.msra.mxu0 %v2599_v60  ;;  %1867 = vmatpush1.bf16.msra.mxu1 %v2600_v61  ;;  %v2696_v60 = vld [vmem:[%s2981_s7 + $0x384] ss:$16 sps:$4 sm:$0xff]   ;;  %v2699_v61 = vld [vmem:[%s2981_s7 + $0x38c] ss:$16 sps:$4 sm:$0xff]  }
  0x5c   : > { %1696 = vmatprep.subr.bf16.mxu0 %v2601_v62  ;;  %1868 = vmatprep.subr.bf16.mxu1 %v2603_v63  ;;  %v2694_v62 = vld [vmem:[%s2981_s7 + $0x380] ss:$16 sps:$4 sm:$0xff]   ;;  %v2697_v63 = vld [vmem:[%s2981_s7 + $0x388] ss:$16 sps:$4 sm:$0xff]  }
  0x5f   : > { %1697 = vmatpush1.bf16.msra.mxu0 %v2605_v0  ;;  %1869 = vmatpush1.bf16.msra.mxu1 %v2606_v1  ;;  %v2702_v0 = vld [vmem:[%s2981_s7 + $0x3a4] ss:$16 sps:$4 sm:$0xff]   ;;  %v2705_v1 = vld [vmem:[%s2981_s7 + $0x3ac] ss:$16 sps:$4 sm:$0xff]  }
  0x60   : > { %1698 = vmatprep.subr.bf16.mxu0 %v2607_v2  ;;  %1870 = vmatprep.subr.bf16.mxu1 %v2609_v3  ;;  %v2700_v2 = vld [vmem:[%s2981_s7 + $0x3a0] ss:$16 sps:$4 sm:$0xff]   ;;  %v2703_v3 = vld [vmem:[%s2981_s7 + $0x3a8] ss:$16 sps:$4 sm:$0xff]  }
  0x63   : > { %1699 = vmatpush1.bf16.msra.mxu0 %v2611_v4  ;;  %1871 = vmatpush1.bf16.msra.mxu1 %v2612_v5  ;;  %v2708_v4 = vld [vmem:[%s2981_s7 + $0x3c4] ss:$16 sps:$4 sm:$0xff]   ;;  %v2711_v5 = vld [vmem:[%s2981_s7 + $0x3cc] ss:$16 sps:$4 sm:$0xff]  }
  0x64   : > { %1700 = vmatprep.subr.bf16.mxu0 %v2613_v6  ;;  %1872 = vmatprep.subr.bf16.mxu1 %v2615_v7  ;;  %v2706_v6 = vld [vmem:[%s2981_s7 + $0x3c0] ss:$16 sps:$4 sm:$0xff]   ;;  %v2709_v7 = vld [vmem:[%s2981_s7 + $0x3c8] ss:$16 sps:$4 sm:$0xff]  }
  0x67   : > { %1701 = vmatpush1.bf16.msra.mxu0 %v2617_v8  ;;  %1873 = vmatpush1.bf16.msra.mxu1 %v2618_v9  ;;  %v2714_v8 = vld [vmem:[%s2981_s7 + $0x3e4] ss:$16 sps:$4 sm:$0xff]   ;;  %v2717_v9 = vld [vmem:[%s2981_s7 + $0x3ec] ss:$16 sps:$4 sm:$0xff]  }
  0x68   : > { %1713 = vmatprep.subr.bf16.mxu0 %v2624_v10  ;;  %1885 = vmatprep.subr.bf16.mxu1 %v2627_v11  ;;  %v2712_v10 = vld [vmem:[%s2981_s7 + $0x3e0] ss:$16 sps:$4 sm:$0xff]   ;;  %v2715_v11 = vld [vmem:[%s2981_s7 + $0x3e8] ss:$16 sps:$4 sm:$0xff]  }
  0x6a   : > { %1703 = vmatmul.mubr.bf16.vlgmr.msra.gmra.mrb[0].mxu0 %v2619_v12  ;;  %1875 = vmatmul.mubr.bf16.vlgmr.msra.gmra.mrb[0].mxu1 %v2619_v12  ;;  %v2723_v12 = vld [vmem:[%s2981_s7 + $0x404] ss:$16 sps:$4 sm:$0xff]  }
  0x6b   : > { %1714 = vmatpush1.bf16.msra.mxu0 %v2622_v13  ;;  %1886 = vmatpush1.bf16.msra.mxu1 %v2625_v14  ;;  %v2726_v13 = vld [vmem:[%s2981_s7 + $0x40c] ss:$16 sps:$4 sm:$0xff]  }
  0x6c   : > { %1715 = vmatprep.subr.bf16.mxu0 %v2630_v15  ;;  %1887 = vmatprep.subr.bf16.mxu1 %v2633_v16  ;;  %v2718_v14 = vld [vmem:[%s2983_s8 + $0x8] ss:$28 sps:$4 sm:$0xff]  }
  0x6d   : > { %1745 = vmatprep.mubr.bf16.mxu0 %v2720_v39  ;;  %1917 = vmatprep.mubr.bf16.mxu1 %v2720_v39  ;;  %v2721_v15 = vld [vmem:[%s2981_s7 + $0x400] ss:$16 sps:$4 sm:$0xff]   ;;  %v2724_v16 = vld [vmem:[%s2981_s7 + $0x408] ss:$16 sps:$4 sm:$0xff]   ;;  %v2762_v39 = vld [vmem:[%s2981_s7 + $0x4cc] ss:$16 sps:$4 sm:$0xff]  }
  0x6f   : > { %1716 = vmatpush1.bf16.msra.mxu0 %v2628_v17  ;;  %1888 = vmatpush1.bf16.msra.mxu1 %v2631_v18  ;;  %v2729_v17 = vld [vmem:[%s2981_s7 + $0x424] ss:$16 sps:$4 sm:$0xff]   ;;  %v2732_v18 = vld [vmem:[%s2981_s7 + $0x42c] ss:$16 sps:$4 sm:$0xff]  }
  0x70   : > { %1717 = vmatprep.subr.bf16.mxu0 %v2636_v19  ;;  %1889 = vmatprep.subr.bf16.mxu1 %v2639_v20  ;;  %v2727_v19 = vld [vmem:[%s2981_s7 + $0x420] ss:$16 sps:$4 sm:$0xff]   ;;  %v2730_v20 = vld [vmem:[%s2981_s7 + $0x428] ss:$16 sps:$4 sm:$0xff]  }
  0x73   : > { %1718 = vmatpush1.bf16.msra.mxu0 %v2634_v21  ;;  %1890 = vmatpush1.bf16.msra.mxu1 %v2637_v22  ;;  %v2819_v21 = vld [vmem:[%s2983_s8 + $0x14] ss:$28 sps:$4 sm:$0xff]  }
  0x74   : > { %1719 = vmatprep.subr.bf16.mxu0 %v2642_v23  ;;  %1891 = vmatprep.subr.bf16.mxu1 %v2645_v24  ;;  %v2735_v22 = vld [vmem:[%s2981_s7 + $0x444] ss:$16 sps:$4 sm:$0xff]   ;;  %v2738_v23 = vld [vmem:[%s2981_s7 + $0x44c] ss:$16 sps:$4 sm:$0xff]   ;;  %v2733_v24 = vld [vmem:[%s2981_s7 + $0x440] ss:$16 sps:$4 sm:$0xff]  }
  0x77   : > { %1720 = vmatpush1.bf16.msra.mxu0 %v2640_v25  ;;  %1892 = vmatpush1.bf16.msra.mxu1 %v2643_v26  ;;  %v2736_v25 = vld [vmem:[%s2981_s7 + $0x448] ss:$16 sps:$4 sm:$0xff]   ;;  %v2741_v26 = vld [vmem:[%s2981_s7 + $0x464] ss:$16 sps:$4 sm:$0xff]  }
  0x78   : > { %1721 = vmatprep.subr.bf16.mxu0 %v2648_v27  ;;  %1893 = vmatprep.subr.bf16.mxu1 %v2651_v28  ;;  %v2744_v27 = vld [vmem:[%s2981_s7 + $0x46c] ss:$16 sps:$4 sm:$0xff]   ;;  %v2739_v28 = vld [vmem:[%s2981_s7 + $0x460] ss:$16 sps:$4 sm:$0xff]  }
  0x7b   : > { %1722 = vmatpush1.bf16.msra.mxu0 %v2646_v29  ;;  %1894 = vmatpush1.bf16.msra.mxu1 %v2649_v30  ;;  %v2742_v29 = vld [vmem:[%s2981_s7 + $0x468] ss:$16 sps:$4 sm:$0xff]   ;;  %v2747_v30 = vld [vmem:[%s2981_s7 + $0x484] ss:$16 sps:$4 sm:$0xff]  }
  0x7c   : > { %1723 = vmatprep.subr.bf16.mxu0 %v2654_v31  ;;  %1895 = vmatprep.subr.bf16.mxu1 %v2657_v32  ;;  %v2750_v31 = vld [vmem:[%s2981_s7 + $0x48c] ss:$16 sps:$4 sm:$0xff]   ;;  %v2745_v32 = vld [vmem:[%s2981_s7 + $0x480] ss:$16 sps:$4 sm:$0xff]  }
  0x7f   : > { %1724 = vmatpush1.bf16.msra.mxu0 %v2652_v33  ;;  %1896 = vmatpush1.bf16.msra.mxu1 %v2655_v34  ;;  %v2748_v33 = vld [vmem:[%s2981_s7 + $0x488] ss:$16 sps:$4 sm:$0xff]   ;;  %v2753_v34 = vld [vmem:[%s2981_s7 + $0x4a4] ss:$16 sps:$4 sm:$0xff]  }
  0x80   : > { %1725 = vmatprep.subr.bf16.mxu0 %v2660_v35  ;;  %1897 = vmatprep.subr.bf16.mxu1 %v2663_v36  ;;  %v2756_v35 = vld [vmem:[%s2981_s7 + $0x4ac] ss:$16 sps:$4 sm:$0xff]   ;;  %v2751_v36 = vld [vmem:[%s2981_s7 + $0x4a0] ss:$16 sps:$4 sm:$0xff]  }
  0x83   : > { %1726 = vmatpush1.bf16.msra.mxu0 %v2658_v37  ;;  %1898 = vmatpush1.bf16.msra.mxu1 %v2661_v38  ;;  %v2754_v37 = vld [vmem:[%s2981_s7 + $0x4a8] ss:$16 sps:$4 sm:$0xff]   ;;  %v2759_v38 = vld [vmem:[%s2981_s7 + $0x4c4] ss:$16 sps:$4 sm:$0xff]  }
  0x84   : > { %1727 = vmatprep.subr.bf16.mxu0 %v2666_v40  ;;  %1899 = vmatprep.subr.bf16.mxu1 %v2669_v41  ;;  %v2757_v40 = vld [vmem:[%s2981_s7 + $0x4c0] ss:$16 sps:$4 sm:$0xff]   ;;  %v2760_v41 = vld [vmem:[%s2981_s7 + $0x4c8] ss:$16 sps:$4 sm:$0xff]  }
  0x87   : > { %1728 = vmatpush1.bf16.msra.mxu0 %v2664_v42  ;;  %1900 = vmatpush1.bf16.msra.mxu1 %v2667_v43  ;;  %v2765_v42 = vld [vmem:[%s2981_s7 + $0x4e4] ss:$16 sps:$4 sm:$0xff]   ;;  %v2768_v43 = vld [vmem:[%s2981_s7 + $0x4ec] ss:$16 sps:$4 sm:$0xff]  }
  0x88   : > { %1729 = vmatprep.subr.bf16.mxu0 %v2672_v44  ;;  %1901 = vmatprep.subr.bf16.mxu1 %v2675_v45  ;;  %v2763_v44 = vld [vmem:[%s2981_s7 + $0x4e0] ss:$16 sps:$4 sm:$0xff]   ;;  %v2766_v45 = vld [vmem:[%s2981_s7 + $0x4e8] ss:$16 sps:$4 sm:$0xff]  }
  0x8b   : > { %1730 = vmatpush1.bf16.msra.mxu0 %v2670_v46  ;;  %1902 = vmatpush1.bf16.msra.mxu1 %v2673_v47  ;;  %v2771_v46 = vld [vmem:[%s2981_s7 + $0x504] ss:$16 sps:$4 sm:$0xff]   ;;  %v2774_v47 = vld [vmem:[%s2981_s7 + $0x50c] ss:$16 sps:$4 sm:$0xff]  }
  0x8c   : > { %1731 = vmatprep.subr.bf16.mxu0 %v2678_v48  ;;  %1903 = vmatprep.subr.bf16.mxu1 %v2681_v49  ;;  %v2769_v48 = vld [vmem:[%s2981_s7 + $0x500] ss:$16 sps:$4 sm:$0xff]   ;;  %v2772_v49 = vld [vmem:[%s2981_s7 + $0x508] ss:$16 sps:$4 sm:$0xff]  }
  0x8f   : > { %1732 = vmatpush1.bf16.msra.mxu0 %v2676_v50  ;;  %1904 = vmatpush1.bf16.msra.mxu1 %v2679_v51  ;;  %v2777_v50 = vld [vmem:[%s2981_s7 + $0x524] ss:$16 sps:$4 sm:$0xff]   ;;  %v2780_v51 = vld [vmem:[%s2981_s7 + $0x52c] ss:$16 sps:$4 sm:$0xff]  }
  0x90   : > { %1733 = vmatprep.subr.bf16.mxu0 %v2684_v52  ;;  %1905 = vmatprep.subr.bf16.mxu1 %v2687_v53  ;;  %v2775_v52 = vld [vmem:[%s2981_s7 + $0x520] ss:$16 sps:$4 sm:$0xff]   ;;  %v2778_v53 = vld [vmem:[%s2981_s7 + $0x528] ss:$16 sps:$4 sm:$0xff]  }
  0x93   : > { %1734 = vmatpush1.bf16.msra.mxu0 %v2682_v54  ;;  %1906 = vmatpush1.bf16.msra.mxu1 %v2685_v55  ;;  %v2783_v54 = vld [vmem:[%s2981_s7 + $0x544] ss:$16 sps:$4 sm:$0xff]   ;;  %v2786_v55 = vld [vmem:[%s2981_s7 + $0x54c] ss:$16 sps:$4 sm:$0xff]  }
  0x94   : > { %1735 = vmatprep.subr.bf16.mxu0 %v2690_v56  ;;  %1907 = vmatprep.subr.bf16.mxu1 %v2693_v57  ;;  %v2781_v56 = vld [vmem:[%s2981_s7 + $0x540] ss:$16 sps:$4 sm:$0xff]   ;;  %v2784_v57 = vld [vmem:[%s2981_s7 + $0x548] ss:$16 sps:$4 sm:$0xff]  }
  0x97   : > { %1736 = vmatpush1.bf16.msra.mxu0 %v2688_v58  ;;  %1908 = vmatpush1.bf16.msra.mxu1 %v2691_v59  ;;  %v2789_v58 = vld [vmem:[%s2981_s7 + $0x564] ss:$16 sps:$4 sm:$0xff]   ;;  %v2792_v59 = vld [vmem:[%s2981_s7 + $0x56c] ss:$16 sps:$4 sm:$0xff]  }
  0x98   : > { %1737 = vmatprep.subr.bf16.mxu0 %v2696_v60  ;;  %1909 = vmatprep.subr.bf16.mxu1 %v2699_v61  ;;  %v2787_v60 = vld [vmem:[%s2981_s7 + $0x560] ss:$16 sps:$4 sm:$0xff]   ;;  %v2790_v61 = vld [vmem:[%s2981_s7 + $0x568] ss:$16 sps:$4 sm:$0xff]  }
  0x9b   : > { %1738 = vmatpush1.bf16.msra.mxu0 %v2694_v62  ;;  %1910 = vmatpush1.bf16.msra.mxu1 %v2697_v63  ;;  %v2795_v62 = vld [vmem:[%s2981_s7 + $0x584] ss:$16 sps:$4 sm:$0xff]   ;;  %v2798_v63 = vld [vmem:[%s2981_s7 + $0x58c] ss:$16 sps:$4 sm:$0xff]  }
  0x9c   : > { %1739 = vmatprep.subr.bf16.mxu0 %v2702_v0  ;;  %1911 = vmatprep.subr.bf16.mxu1 %v2705_v1  ;;  %v2793_v0 = vld [vmem:[%s2981_s7 + $0x580] ss:$16 sps:$4 sm:$0xff]   ;;  %v2796_v1 = vld [vmem:[%s2981_s7 + $0x588] ss:$16 sps:$4 sm:$0xff]  }
  0x9f   : > { %1740 = vmatpush1.bf16.msra.mxu0 %v2700_v2  ;;  %1912 = vmatpush1.bf16.msra.mxu1 %v2703_v3  ;;  %v2801_v2 = vld [vmem:[%s2981_s7 + $0x5a4] ss:$16 sps:$4 sm:$0xff]   ;;  %v2804_v3 = vld [vmem:[%s2981_s7 + $0x5ac] ss:$16 sps:$4 sm:$0xff]  }
  0xa0   : > { %1741 = vmatprep.subr.bf16.mxu0 %v2708_v4  ;;  %1913 = vmatprep.subr.bf16.mxu1 %v2711_v5  ;;  %v2799_v4 = vld [vmem:[%s2981_s7 + $0x5a0] ss:$16 sps:$4 sm:$0xff]   ;;  %v2802_v5 = vld [vmem:[%s2981_s7 + $0x5a8] ss:$16 sps:$4 sm:$0xff]  }
  0xa3   : > { %1742 = vmatpush1.bf16.msra.mxu0 %v2706_v6  ;;  %1914 = vmatpush1.bf16.msra.mxu1 %v2709_v7  ;;  %v2807_v6 = vld [vmem:[%s2981_s7 + $0x5c4] ss:$16 sps:$4 sm:$0xff]   ;;  %v2810_v7 = vld [vmem:[%s2981_s7 + $0x5cc] ss:$16 sps:$4 sm:$0xff]  }
  0xa4   : > { %1743 = vmatprep.subr.bf16.mxu0 %v2714_v8  ;;  %1915 = vmatprep.subr.bf16.mxu1 %v2717_v9  ;;  %v2805_v8 = vld [vmem:[%s2981_s7 + $0x5c0] ss:$16 sps:$4 sm:$0xff]   ;;  %v2808_v9 = vld [vmem:[%s2981_s7 + $0x5c8] ss:$16 sps:$4 sm:$0xff]  }
  0xa7   : > { %1744 = vmatpush1.bf16.msra.mxu0 %v2712_v10  ;;  %1916 = vmatpush1.bf16.msra.mxu1 %v2715_v11  ;;  %v2813_v10 = vld [vmem:[%s2981_s7 + $0x5e4] ss:$16 sps:$4 sm:$0xff]   ;;  %v2816_v11 = vld [vmem:[%s2981_s7 + $0x5ec] ss:$16 sps:$4 sm:$0xff]  }
  0xa8   : > { %1756 = vmatprep.subr.bf16.mxu0 %v2723_v12  ;;  %1928 = vmatprep.subr.bf16.mxu1 %v2726_v13  ;;  %v2811_v12 = vld [vmem:[%s2981_s7 + $0x5e0] ss:$16 sps:$4 sm:$0xff]   ;;  %v2814_v13 = vld [vmem:[%s2981_s7 + $0x5e8] ss:$16 sps:$4 sm:$0xff]  }
  0xaa   : > { %1746 = vmatmul.mubr.bf16.vlgmr.msra.gmra.mrb[0].mxu0 %v2718_v14  ;;  %1918 = vmatmul.mubr.bf16.vlgmr.msra.gmra.mrb[0].mxu1 %v2718_v14  ;;  %v2822_v14 = vld [vmem:[%s2981_s7 + $0x604] ss:$16 sps:$4 sm:$0xff]  }
  0xab   : > { %1757 = vmatpush1.bf16.msra.mxu0 %v2721_v15  ;;  %1929 = vmatpush1.bf16.msra.mxu1 %v2724_v16  ;;  %v2825_v15 = vld [vmem:[%s2981_s7 + $0x60c] ss:$16 sps:$4 sm:$0xff]  }
  0xac   : > { %1758 = vmatprep.subr.bf16.mxu0 %v2729_v17  ;;  %1930 = vmatprep.subr.bf16.mxu1 %v2732_v18  ;;  %v2817_v16 = vld [vmem:[%s2983_s8 + $0x10] ss:$28 sps:$4 sm:$0xff]  }
  0xad   : > { %1788 = vmatprep.mubr.bf16.mxu0 %v2819_v21  ;;  %1960 = vmatprep.mubr.bf16.mxu1 %v2819_v21  ;;  %v2820_v17 = vld [vmem:[%s2981_s7 + $0x600] ss:$16 sps:$4 sm:$0xff]   ;;  %v2823_v18 = vld [vmem:[%s2981_s7 + $0x608] ss:$16 sps:$4 sm:$0xff]  }
  0xae   : > { %v2826_v21 = vld [vmem:[%s2981_s7 + $0x620] ss:$16 sps:$4 sm:$0xff]  }
  0xaf   : > { %1759 = vmatpush1.bf16.msra.mxu0 %v2727_v19  ;;  %1931 = vmatpush1.bf16.msra.mxu1 %v2730_v20  ;;  %v2828_v19 = vld [vmem:[%s2981_s7 + $0x624] ss:$16 sps:$4 sm:$0xff]   ;;  %v2831_v20 = vld [vmem:[%s2981_s7 + $0x62c] ss:$16 sps:$4 sm:$0xff]  }
  0xb0   : > { %1760 = vmatprep.subr.bf16.mxu0 %v2735_v22  ;;  %1932 = vmatprep.subr.bf16.mxu1 %v2738_v23  ;;  %v2829_v22 = vld [vmem:[%s2981_s7 + $0x628] ss:$16 sps:$4 sm:$0xff]   ;;  %v2834_v23 = vld [vmem:[%s2981_s7 + $0x644] ss:$16 sps:$4 sm:$0xff]  }
  0xb3   : > { %1761 = vmatpush1.bf16.msra.mxu0 %v2733_v24  ;;  %1933 = vmatpush1.bf16.msra.mxu1 %v2736_v25  ;;  %v2837_v24 = vld [vmem:[%s2981_s7 + $0x64c] ss:$16 sps:$4 sm:$0xff]   ;;  %v2910_v25 = vmov 0  }
  0xb4   : > { %1762 = vmatprep.subr.bf16.mxu0 %v2741_v26  ;;  %1934 = vmatprep.subr.bf16.mxu1 %v2744_v27  ;;  %v2832_v26 = vld [vmem:[%s2981_s7 + $0x640] ss:$16 sps:$4 sm:$0xff]   ;;  %v2835_v27 = vld [vmem:[%s2981_s7 + $0x648] ss:$16 sps:$4 sm:$0xff]  }
  0xb7   : > { %1763 = vmatpush1.bf16.msra.mxu0 %v2739_v28  ;;  %1935 = vmatpush1.bf16.msra.mxu1 %v2742_v29  ;;  %v2840_v28 = vld [vmem:[%s2981_s7 + $0x664] ss:$16 sps:$4 sm:$0xff]   ;;  %v2843_v29 = vld [vmem:[%s2981_s7 + $0x66c] ss:$16 sps:$4 sm:$0xff]  }
  0xb8   : > { %1764 = vmatprep.subr.bf16.mxu0 %v2747_v30  ;;  %1936 = vmatprep.subr.bf16.mxu1 %v2750_v31  ;;  %v2838_v30 = vld [vmem:[%s2981_s7 + $0x660] ss:$16 sps:$4 sm:$0xff]   ;;  %v2841_v31 = vld [vmem:[%s2981_s7 + $0x668] ss:$16 sps:$4 sm:$0xff]  }
  0xbb   : > { %1765 = vmatpush1.bf16.msra.mxu0 %v2745_v32  ;;  %1937 = vmatpush1.bf16.msra.mxu1 %v2748_v33  ;;  %v2846_v32 = vld [vmem:[%s2981_s7 + $0x684] ss:$16 sps:$4 sm:$0xff]   ;;  %v2849_v33 = vld [vmem:[%s2981_s7 + $0x68c] ss:$16 sps:$4 sm:$0xff]  }
  0xbc   : > { %1766 = vmatprep.subr.bf16.mxu0 %v2753_v34  ;;  %1938 = vmatprep.subr.bf16.mxu1 %v2756_v35  ;;  %v2844_v34 = vld [vmem:[%s2981_s7 + $0x680] ss:$16 sps:$4 sm:$0xff]   ;;  %v2847_v35 = vld [vmem:[%s2981_s7 + $0x688] ss:$16 sps:$4 sm:$0xff]  }
  0xbf   : > { %1767 = vmatpush1.bf16.msra.mxu0 %v2751_v36  ;;  %1939 = vmatpush1.bf16.msra.mxu1 %v2754_v37  ;;  %v2852_v36 = vld [vmem:[%s2981_s7 + $0x6a4] ss:$16 sps:$4 sm:$0xff]   ;;  %v2855_v37 = vld [vmem:[%s2981_s7 + $0x6ac] ss:$16 sps:$4 sm:$0xff]  }
  0xc0   : > { %1768 = vmatprep.subr.bf16.mxu0 %v2759_v38  ;;  %1940 = vmatprep.subr.bf16.mxu1 %v2762_v39  ;;  %v2850_v38 = vld [vmem:[%s2981_s7 + $0x6a0] ss:$16 sps:$4 sm:$0xff]   ;;  %v2853_v39 = vld [vmem:[%s2981_s7 + $0x6a8] ss:$16 sps:$4 sm:$0xff]  }
  0xc3   : > { %1769 = vmatpush1.bf16.msra.mxu0 %v2757_v40  ;;  %1941 = vmatpush1.bf16.msra.mxu1 %v2760_v41  ;;  %v2858_v40 = vld [vmem:[%s2981_s7 + $0x6c4] ss:$16 sps:$4 sm:$0xff]   ;;  %v2861_v41 = vld [vmem:[%s2981_s7 + $0x6cc] ss:$16 sps:$4 sm:$0xff]  }
  0xc4   : > { %1770 = vmatprep.subr.bf16.mxu0 %v2765_v42  ;;  %1942 = vmatprep.subr.bf16.mxu1 %v2768_v43  ;;  %v2856_v42 = vld [vmem:[%s2981_s7 + $0x6c0] ss:$16 sps:$4 sm:$0xff]   ;;  %v2859_v43 = vld [vmem:[%s2981_s7 + $0x6c8] ss:$16 sps:$4 sm:$0xff]  }
  0xc7   : > { %1771 = vmatpush1.bf16.msra.mxu0 %v2763_v44  ;;  %1943 = vmatpush1.bf16.msra.mxu1 %v2766_v45  ;;  %v2864_v44 = vld [vmem:[%s2981_s7 + $0x6e4] ss:$16 sps:$4 sm:$0xff]   ;;  %v2867_v45 = vld [vmem:[%s2981_s7 + $0x6ec] ss:$16 sps:$4 sm:$0xff]  }
  0xc8   : > { %1772 = vmatprep.subr.bf16.mxu0 %v2771_v46  ;;  %1944 = vmatprep.subr.bf16.mxu1 %v2774_v47  ;;  %v2862_v46 = vld [vmem:[%s2981_s7 + $0x6e0] ss:$16 sps:$4 sm:$0xff]   ;;  %v2865_v47 = vld [vmem:[%s2981_s7 + $0x6e8] ss:$16 sps:$4 sm:$0xff]  }
  0xcb   : > { %1773 = vmatpush1.bf16.msra.mxu0 %v2769_v48  ;;  %1945 = vmatpush1.bf16.msra.mxu1 %v2772_v49  ;;  %v2868_v48 = vld [vmem:[%s2983_s8 + $0x18] ss:$28 sps:$4 sm:$0xff]   ;;  %v274_v49 = vld [vmem:[#allocation2] sm:$0xff] }
  0xcc   : > { %1774 = vmatprep.subr.bf16.mxu0 %v2777_v50  ;;  %1946 = vmatprep.subr.bf16.mxu1 %v2780_v51  ;;  %v276_v50 = vld [vmem:[#allocation2 + $0x10] sm:$0xff]  ;;  %v275_v51 = vld [vmem:[#allocation2 + $0x8] sm:$0xff] }
  0xcf   : > { %1775 = vmatpush1.bf16.msra.mxu0 %v2775_v52  ;;  %1947 = vmatpush1.bf16.msra.mxu1 %v2778_v53  ;;  %v277_v52 = vld [vmem:[#allocation2 + $0x18] sm:$0xff] }
  0xd0   : > { %1776 = vmatprep.subr.bf16.mxu0 %v2783_v54  ;;  %1948 = vmatprep.subr.bf16.mxu1 %v2786_v55  ;;  %v278_v55 = vld [vmem:[#allocation2 + $0x20] sm:$0xff] }
  0xd3   : > { %1777 = vmatpush1.bf16.msra.mxu0 %v2781_v56  ;;  %1949 = vmatpush1.bf16.msra.mxu1 %v2784_v57  ;;  %v280_v56 = vld [vmem:[#allocation2 + $0x30] sm:$0xff] }
  0xd4   : > { %1778 = vmatprep.subr.bf16.mxu0 %v2789_v58  ;;  %1950 = vmatprep.subr.bf16.mxu1 %v2792_v59 }
  0xd7   : > { %1779 = vmatpush1.bf16.msra.mxu0 %v2787_v60  ;;  %1951 = vmatpush1.bf16.msra.mxu1 %v2790_v61  ;;  %v279_v61 = vld [vmem:[#allocation2 + $0x28] sm:$0xff] }
  0xd8   : > { %1780 = vmatprep.subr.bf16.mxu0 %v2795_v62  ;;  %1952 = vmatprep.subr.bf16.mxu1 %v2798_v63  ;;  %v281_v62 = vld [vmem:[#allocation2 + $0x38] sm:$0xff] }
  0xdb   : > { %1781 = vmatpush1.bf16.msra.mxu0 %v2793_v0  ;;  %1953 = vmatpush1.bf16.msra.mxu1 %v2796_v1 }
  0xdc   : > { %1782 = vmatprep.subr.bf16.mxu0 %v2801_v2  ;;  %1954 = vmatprep.subr.bf16.mxu1 %v2804_v3 }
  0xdf   : > { %1783 = vmatpush1.bf16.msra.mxu0 %v2799_v4  ;;  %1955 = vmatpush1.bf16.msra.mxu1 %v2802_v5 }
  0xe0   : > { %1784 = vmatprep.subr.bf16.mxu0 %v2807_v6  ;;  %1956 = vmatprep.subr.bf16.mxu1 %v2810_v7 }
  0xe3   : > { %1785 = vmatpush1.bf16.msra.mxu0 %v2805_v8  ;;  %1957 = vmatpush1.bf16.msra.mxu1 %v2808_v9  ;;  %v2044_v9 = vlaneseq (!%p2440_p11) }
  0xe4   : > { %1786 = vmatprep.subr.bf16.mxu0 %v2813_v10  ;;  %1958 = vmatprep.subr.bf16.mxu1 %v2816_v11  ;;  %v2042_v11 = vld [vmem:[%s3250_s2] sm:$0xf] (!%p2440_p11) }
  0xe5   : > { %v2045_v10 = vshrl.u32 (!%p2440_p11), %v2044_v9, 7 }
  0xe7   : > { %1787 = vmatpush1.bf16.msra.mxu0 %v2811_v12  ;;  %1959 = vmatpush1.bf16.msra.mxu1 %v2814_v13 }
  0xe8   : > { %1799 = vmatprep.subr.bf16.mxu0 %v2822_v14  ;;  %1971 = vmatprep.subr.bf16.mxu1 %v2825_v15  ;;  %v2046_v14 = vsub.s32 (!%p2440_p11), 0, %v2045_v10  ;;  %v2050_v15 = vsub.s32 (!%p2440_p11), 1, %v2045_v10 }
  0xea   : > { %1789 = vmatmul.mubr.bf16.vlgmr.msra.gmra.mrb[0].mxu0 %v2817_v16  ;;  %1961 = vmatmul.mubr.bf16.vlgmr.msra.gmra.mrb[0].mxu1 %v2817_v16  ;;  %v2054_v16 = vsub.s32 (!%p2440_p11), 2, %v2045_v10 }
  0xeb   : > { %1800 = vmatpush1.bf16.msra.mxu0 %v2820_v17  ;;  %1972 = vmatpush1.bf16.msra.mxu1 %v2823_v18  ;;  %v2058_v17 = vsub.s32 (!%p2440_p11), 3, %v2045_v10 }
  0xec   : > { %1801 = vmatprep.subr.bf16.mxu0 %v2828_v19  ;;  %1973 = vmatprep.subr.bf16.mxu1 %v2831_v20 }
  0xed   : > { %1831 = vmatprep.mubr.bf16.mxu0 %v2910_v25  ;;  %2003 = vmatprep.mubr.bf16.mxu1 %v2910_v25 }
  0xef   : > { %1802 = vmatpush1.bf16.msra.mxu0 %v2826_v21  ;;  %1974 = vmatpush1.bf16.msra.mxu1 %v2829_v22  ;;  %v2047_v21 = vrot.slane (!%p2440_p11), %v2042_v11, %v2046_v14  ;;  %v2051_v22 = vrot.slane (!%p2440_p11), %v2042_v11, %v2050_v15 }
  0xf0   : > { %1803 = vmatprep.subr.bf16.mxu0 %v2834_v23  ;;  %1975 = vmatprep.subr.bf16.mxu1 %v2837_v24  ;;  %v2055_v23 = vrot.slane (!%p2440_p11), %v2042_v11, %v2054_v16  ;;  %v2059_v24 = vrot.slane (!%p2440_p11), %v2042_v11, %v2058_v17 }
  0xf3   : > { %1804 = vmatpush1.bf16.msra.mxu0 %v2832_v26  ;;  %1976 = vmatpush1.bf16.msra.mxu1 %v2835_v27 }
  0xf4   : > { %1805 = vmatprep.subr.bf16.mxu0 %v2840_v28  ;;  %1977 = vmatprep.subr.bf16.mxu1 %v2843_v29 }
  0xf7   : > { %1806 = vmatpush1.bf16.msra.mxu0 %v2838_v30  ;;  %1978 = vmatpush1.bf16.msra.mxu1 %v2841_v31 }
  0xf8   : > { %1807 = vmatprep.subr.bf16.mxu0 %v2846_v32  ;;  %1979 = vmatprep.subr.bf16.mxu1 %v2849_v33 }
  0xfb   : > { %1808 = vmatpush1.bf16.msra.mxu0 %v2844_v34  ;;  %1980 = vmatpush1.bf16.msra.mxu1 %v2847_v35 }
  0xfc   : > { %1809 = vmatprep.subr.bf16.mxu0 %v2852_v36  ;;  %1981 = vmatprep.subr.bf16.mxu1 %v2855_v37 }
  0xff   : > { %1810 = vmatpush1.bf16.msra.mxu0 %v2850_v38  ;;  %1982 = vmatpush1.bf16.msra.mxu1 %v2853_v39 }
 0x100   : > { %1811 = vmatprep.subr.bf16.mxu0 %v2858_v40  ;;  %1983 = vmatprep.subr.bf16.mxu1 %v2861_v41 }
 0x103   : > { %1812 = vmatpush1.bf16.msra.mxu0 %v2856_v42  ;;  %1984 = vmatpush1.bf16.msra.mxu1 %v2859_v43 }
 0x104   : > { %1813 = vmatprep.subr.bf16.mxu0 %v2864_v44  ;;  %1985 = vmatprep.subr.bf16.mxu1 %v2867_v45 }
 0x107   : > { %1814 = vmatpush1.bf16.msra.mxu0 %v2862_v46  ;;  %1986 = vmatpush1.bf16.msra.mxu1 %v2865_v47 }
 0x10a   : > { %1832 = vmatmul.mubr.bf16.vlgmr.msra.gmra.mrb[0].mxu0 %v2868_v48  ;;  %2004 = vmatmul.mubr.bf16.vlgmr.msra.gmra.mrb[0].mxu1 %v2868_v48 }
 0x1dd   : > { %v1833_v53 = vpop.f32.mrb[0].mxu0  ;;  %v2005_v54 = vpop.f32.mrb[0].mxu1  ;;  %2033 = sbr.rel (%p2440_p11) target bundleno = 498 (0x1f2), region = 66 }
 0x1de   : > { %v2014_v57 = vadd.f32 %v1833_v53, %v274_v49  ;;  %v2016_v58 = vadd.f32 %v2005_v54, %v276_v50  ;;  %v1835_v59 = vpop.f32.mrb[1].mxu0  ;;  %v2007_v60 = vpop.f32.mrb[1].mxu1 }
 0x1df   : > { %v2015_v63 = vadd.f32 %v1835_v59, %v275_v51  ;;  %v2017_v0 = vadd.f32 %v2007_v60, %v277_v52  ;;  %v1837_v1 = vpop.f32.mrb[2].mxu0  ;;  %v2009_v2 = vpop.f32.mrb[2].mxu1 }
 0x1e0   : > { %2022 = vst [vmem:[#allocation2] sm:$0xff] %v2014_v57  ;;  %2024 = vst [vmem:[#allocation2 + $0x10] sm:$0xff] %v2016_v58  ;;  %v2018_v3 = vadd.f32 %v1837_v1, %v278_v55  ;;  %v2020_v4 = vadd.f32 %v2009_v2, %v280_v56  ;;  %v1839_v5 = vpop.f32.mrb[3].mxu0  ;;  %v2011_v6 = vpop.f32.mrb[3].mxu1 }
 0x1e1   : > { %2023 = vst [vmem:[#allocation2 + $0x8] sm:$0xff] %v2015_v63  ;;  %2025 = vst [vmem:[#allocation2 + $0x18] sm:$0xff] %v2017_v0  ;;  %v2019_v7 = vadd.f32 %v1839_v5, %v279_v61  ;;  %v2021_v8 = vadd.f32 %v2011_v6, %v281_v62 }
 0x1e2   : > { %2026 = vst [vmem:[#allocation2 + $0x20] sm:$0xff] %v2018_v3  ;;  %2028 = vst [vmem:[#allocation2 + $0x30] sm:$0xff] %v2020_v4 }
 0x1e3   : > { %2027 = vst [vmem:[#allocation2 + $0x28] sm:$0xff] %v2019_v7  ;;  %2029 = vst [vmem:[#allocation2 + $0x38] sm:$0xff] %v2021_v8 }
 0x1e7   : > { %v2034_v12 = vld [vmem:[#allocation2] sm:$0xff]  ;;  %v2036_v18 = vld [vmem:[#allocation2 + $0x10] sm:$0xff] }
 0x1e8   : > { %v2035_v13 = vld [vmem:[#allocation2 + $0x8] sm:$0xff]  ;;  %v2037_v19 = vld [vmem:[#allocation2 + $0x18] sm:$0xff]  ;;  %v2064_v28 = vadd.f32 %v2047_v21, %v2034_v12  ;;  %v2066_v30 = vadd.f32 %v2055_v23, %v2036_v18 }
 0x1e9   : > { %v2038_v20 = vld [vmem:[#allocation2 + $0x20] sm:$0xff]  ;;  %v2040_v26 = vld [vmem:[#allocation2 + $0x30] sm:$0xff]  ;;  %v2065_v29 = vadd.f32 %v2051_v22, %v2035_v13  ;;  %v2067_v31 = vadd.f32 %v2059_v24, %v2037_v19 }
 0x1ea   : > { %v2039_v25 = vld [vmem:[#allocation2 + $0x28] sm:$0xff]  ;;  %v2041_v27 = vld [vmem:[#allocation2 + $0x38] sm:$0xff]  ;;  %v2068_v32 = vadd.f32 %v2047_v21, %v2038_v20  ;;  %v2070_v34 = vadd.f32 %v2055_v23, %v2040_v26  ;;  %v2072_v36 = vmax.f32 %v2064_v28, 0.0  ;;  %v2074_v38 = vmax.f32 %v2066_v30, 0.0 }
 0x1eb   : > { %v2069_v33 = vadd.f32 %v2051_v22, %v2039_v25  ;;  %v2071_v35 = vadd.f32 %v2059_v24, %v2041_v27  ;;  %v2073_v37 = vmax.f32 %v2065_v29, 0.0  ;;  %v2075_v39 = vmax.f32 %v2067_v31, 0.0 }
 0x1ec   : > { %v2076_v40 = vmax.f32 %v2068_v32, 0.0  ;;  %v2078_v42 = vmax.f32 %v2070_v34, 0.0 }
 0x1ed   : > { %v2077_v41 = vmax.f32 %v2069_v33, 0.0  ;;  %v2079_v43 = vmax.f32 %v2071_v35, 0.0  ;;  %v2451_v44 = vpack.c.bf16 %v2073_v37, %v2072_v36  ;;  %v2452_v45 = vpack.c.bf16 %v2075_v39, %v2074_v38 }
 0x1ef   : > { %v2453_v46 = vpack.c.bf16 %v2077_v41, %v2076_v40  ;;  %v2454_v47 = vpack.c.bf16 %v2079_v43, %v2078_v42  ;;  %2104 = vst [vmem:[%s3251_s3] sm:$0xff] %v2451_v44  ;;  %2105 = vst [vmem:[%s3251_s3 + $0x8] sm:$0xff] %v2452_v45 }
 0x1f1   : > { %2106 = vst [vmem:[%s3251_s3 + $0x10] sm:$0xff] %v2453_v46  ;;  %2107 = vst [vmem:[%s3251_s3 + $0x18] sm:$0xff] %v2454_v47 }
 0x1f2 PF: > { %s13_s16 = sadd.s32 1, %s2907_s16   ;;  %s3252_s12 = smov %s2895_s13 }
 0x1f3   : > { %p10_p12 = scmp.ge.s32.totalorder %s13_s16, 6   ;;  %s3253_s13 = smov %s2966_s20 }
 0x1f4   : > { %s3254_s14 = smov %s2903_s15  ;;  %s3255_s15 = smov %s3257_s17 }
 0x1f5   :  { %12 = sbr.rel (!%p10_p12) target bundleno = 3 (0x3), region = 110 }

// kernel: qnetwork_forward.15
= control target key start
LH: loop header
LB: loop body
LE: loop exit
PB: predicated region body
PF: predicated region fallthrough
CT: control target
= control target key end

     0   :  { %s1311_s0 = inlined_call_operand.vmem [shape: bf16[2,512], index: 0, kind: input, shape index: {}]   ;;  %s1312_s1 = inlined_call_operand.vmem [shape: bf16[2,512], index: 1, kind: input, shape index: {}]   ;;  %s1313_s2 = inlined_call_operand.vmem [shape: bf16[512,6], index: 2, kind: input, shape index: {}]   ;;  %s1314_s3 = inlined_call_operand.vmem [shape: f32[1,6], index: 3, kind: input, shape index: {}]   ;;  %s1315_s4 = inlined_call_operand.vmem [shape: bf16[512,1], index: 4, kind: input, shape index: {}]   ;;  %s1316_s5 = inlined_call_operand.<no memory space> [shape: f32[1,1], index: 5, kind: input, shape index: {}]   ;;  %s1317_s6 = inlined_call_operand.hbm [shape: f32[2,6], index: 6, kind: output, shape index: {}]  }
   0x1   :  { %v11_v0 = vstv %s1316_s5 }
   0x2   :  { %12 = vst [vmem:[#allocation2] sm:$0x1] %v11_v0 }
   0x3   :  { %v961_v1 = vld [vmem:[%s1313_s2 + $0x40] sm:$0xff]   ;;  %v965_v5 = vld [vmem:[%s1313_s2 + $0x48] sm:$0xff]   ;;  %v969_v9 = vld [vmem:[%s1313_s2 + $0x50] sm:$0xff]   ;;  %v111_v31 = vlaneseq  ;;  %v1049_v35 = vmov 1966171168  }
   0x4   :  { %v962_v2 = vld [vmem:[%s1313_s2 + $0xc0] sm:$0xff]   ;;  %869 = vmatprep.subr.bf16.mxu0 %v961_v1  ;;  %v966_v6 = vld [vmem:[%s1313_s2 + $0xc8] sm:$0xff]   ;;  %v970_v10 = vld [vmem:[%s1313_s2 + $0xd0] sm:$0xff]   ;;  %v109_v36 = vunpack.c.l.s4 %v1049_v35 }
   0x5   :  { %v963_v3 = vld [vmem:[%s1313_s2] sm:$0xff]   ;;  %891 = vmatprep.subr.bf16.mxu1 %v962_v2  ;;  %v967_v7 = vld [vmem:[%s1313_s2 + $0x8] sm:$0xff]   ;;  %v971_v11 = vld [vmem:[%s1313_s2 + $0x10] sm:$0xff]   ;;  %v112_v37 = vshrl.u32 %v111_v31, 7 }
   0x6   :  { %v964_v4 = vld [vmem:[%s1313_s2 + $0x80] sm:$0xff]   ;;  %870 = vmatpush3.bf16.msra.mxu0 %v963_v3  ;;  %v968_v8 = vld [vmem:[%s1313_s2 + $0x88] sm:$0xff]   ;;  %v972_v12 = vld [vmem:[%s1313_s2 + $0x90] sm:$0xff]   ;;  %v110_v41 = vunpack.c.0.s8 %v109_v36 }
   0x7   :  { %892 = vmatpush3.bf16.msra.mxu1 %v964_v4  ;;  %871 = vmatprep.subr.bf16.mxu0 %v965_v5  ;;  %v973_v13 = vld [vmem:[%s1313_s2 + $0x58] sm:$0xff]   ;;  %v977_v17 = vld [vmem:[%s1313_s2 + $0x60] sm:$0xff]   ;;  %v981_v21 = vld [vmem:[%s1313_s2 + $0x68] sm:$0xff]  }
   0x8   :  { %893 = vmatprep.subr.bf16.mxu1 %v966_v6  ;;  %v974_v14 = vld [vmem:[%s1313_s2 + $0xd8] sm:$0xff]   ;;  %v978_v18 = vld [vmem:[%s1313_s2 + $0xe0] sm:$0xff]   ;;  %v982_v22 = vld [vmem:[%s1313_s2 + $0xe8] sm:$0xff]   ;;  %v1195_v42 = vsub.s32 %v110_v41, %v112_v37 }
   0x9   :  { %v975_v15 = vld [vmem:[%s1313_s2 + $0x18] sm:$0xff]   ;;  %v979_v19 = vld [vmem:[%s1313_s2 + $0x20] sm:$0xff]   ;;  %v983_v23 = vld [vmem:[%s1313_s2 + $0x28] sm:$0xff]  }
   0xa   :  { %872 = vmatpush3.bf16.msra.mxu0 %v967_v7  ;;  %v976_v16 = vld [vmem:[%s1313_s2 + $0x98] sm:$0xff]   ;;  %v980_v20 = vld [vmem:[%s1313_s2 + $0xa0] sm:$0xff]   ;;  %v984_v24 = vld [vmem:[%s1313_s2 + $0xa8] sm:$0xff]  }
   0xb   :  { %894 = vmatpush3.bf16.msra.mxu1 %v968_v8  ;;  %873 = vmatprep.subr.bf16.mxu0 %v969_v9  ;;  %v985_v25 = vld [vmem:[%s1313_s2 + $0x70] sm:$0xff]   ;;  %v989_v29 = vld [vmem:[%s1313_s2 + $0x78] sm:$0xff]   ;;  %v802_v34 = vld.sshfl [vmem:[%s1311_s0] sm:$0x33 pattern:$0x75316420] }
   0xc   :  { %895 = vmatprep.subr.bf16.mxu1 %v970_v10  ;;  %v986_v26 = vld [vmem:[%s1313_s2 + $0xf0] sm:$0xff]   ;;  %v990_v30 = vld [vmem:[%s1313_s2 + $0xf8] sm:$0xff]   ;;  %v993_v38 = vld [vmem:[%s1315_s4 + $0x40] sm:$0xff]   ;;  %v107_v40 = vcombine.high %v802_v34, %v802_v34  ;;  %v114_v45 = vrot.slane %v802_v34, %v1195_v42 }
   0xd   :  { %v987_v27 = vld [vmem:[%s1313_s2 + $0x30] sm:$0xff]   ;;  %v991_v32 = vld [vmem:[%s1313_s2 + $0x38] sm:$0xff]   ;;  %v994_v39 = vld [vmem:[%s1315_s4 + $0xc0] sm:$0xff]  }
   0xe   :  { %874 = vmatpush3.bf16.msra.mxu0 %v971_v11  ;;  %v988_v28 = vld [vmem:[%s1313_s2 + $0xb0] sm:$0xff]   ;;  %v992_v33 = vld [vmem:[%s1313_s2 + $0xb8] sm:$0xff]   ;;  %v995_v43 = vld [vmem:[%s1315_s4] sm:$0xff]   ;;  %v121_v44 = vrot.slane %v107_v40, %v1195_v42  ;;  %v122_v49 = vcombine.high %v114_v45, %v114_v45 }
   0xf   :  { %896 = vmatpush3.bf16.msra.mxu1 %v972_v12  ;;  %875 = vmatprep.subr.bf16.mxu0 %v973_v13  ;;  %v996_v46 = vld [vmem:[%s1315_s4 + $0x80] sm:$0xff]   ;;  %v997_v47 = vld [vmem:[%s1315_s4 + $0x48] sm:$0xff]   ;;  %v1001_v53 = vld [vmem:[%s1315_s4 + $0x50] sm:$0xff]  }
  0x10   :  { %897 = vmatprep.subr.bf16.mxu1 %v974_v14  ;;  %352 = vmatprep.mubr.bf16.mxu0 %v121_v44  ;;  %v123_v48 = vcombine.high %v121_v44, %v121_v44  ;;  %v998_v50 = vld [vmem:[%s1315_s4 + $0xc8] sm:$0xff]   ;;  %v1002_v54 = vld [vmem:[%s1315_s4 + $0xd0] sm:$0xff]   ;;  %v1005_v57 = vld [vmem:[%s1315_s4 + $0x58] sm:$0xff]  }
  0x11   :  { %v999_v51 = vld [vmem:[%s1315_s4 + $0x8] sm:$0xff]   ;;  %v1003_v55 = vld [vmem:[%s1315_s4 + $0x10] sm:$0xff]   ;;  %v1006_v58 = vld [vmem:[%s1315_s4 + $0xd8] sm:$0xff]  }
  0x12   :  { %876 = vmatpush3.bf16.msra.mxu0 %v975_v15  ;;  %392 = vmatprep.mubr.bf16.mxu1 %v123_v48  ;;  %v1000_v52 = vld [vmem:[%s1315_s4 + $0x88] sm:$0xff]   ;;  %v1004_v56 = vld [vmem:[%s1315_s4 + $0x90] sm:$0xff]   ;;  %v1007_v59 = vld [vmem:[%s1315_s4 + $0x18] sm:$0xff]  }
  0x13   :  { %898 = vmatpush3.bf16.msra.mxu1 %v976_v16  ;;  %877 = vmatprep.subr.bf16.mxu0 %v977_v17  ;;  %v1008_v60 = vld [vmem:[%s1315_s4 + $0x98] sm:$0xff]   ;;  %v1009_v61 = vld [vmem:[%s1315_s4 + $0x60] sm:$0xff]   ;;  %v1013_v1 = vld [vmem:[%s1315_s4 + $0x68] sm:$0xff]  }
  0x14   :  { %899 = vmatprep.subr.bf16.mxu1 %v978_v18  ;;  %v1010_v62 = vld [vmem:[%s1315_s4 + $0xe0] sm:$0xff]   ;;  %v1014_v2 = vld [vmem:[%s1315_s4 + $0xe8] sm:$0xff]   ;;  %v1017_v5 = vld [vmem:[%s1315_s4 + $0x70] sm:$0xff]  }
  0x15   :  { %v1011_v63 = vld [vmem:[%s1315_s4 + $0x20] sm:$0xff]   ;;  %v1015_v3 = vld [vmem:[%s1315_s4 + $0x28] sm:$0xff]   ;;  %v1018_v6 = vld [vmem:[%s1315_s4 + $0xf0] sm:$0xff]  }
  0x16   :  { %878 = vmatpush3.bf16.msra.mxu0 %v979_v19  ;;  %v1012_v0 = vld [vmem:[%s1315_s4 + $0xa0] sm:$0xff]   ;;  %v1016_v4 = vld [vmem:[%s1315_s4 + $0xa8] sm:$0xff]   ;;  %v1019_v7 = vld [vmem:[%s1315_s4 + $0x30] sm:$0xff]  }
  0x17   :  { %900 = vmatpush3.bf16.msra.mxu1 %v980_v20  ;;  %879 = vmatprep.subr.bf16.mxu0 %v981_v21  ;;  %v1020_v8 = vld [vmem:[%s1315_s4 + $0xb0] sm:$0xff]   ;;  %v1021_v9 = vld [vmem:[%s1315_s4 + $0x78] sm:$0xff]   ;;  %v836_v10 = vld.sshfl [vmem:[%s1312_s1] sm:$0x33 pattern:$0x75316420] }
  0x18   :  { %901 = vmatprep.subr.bf16.mxu1 %v982_v22 }
  0x1a   :  { %880 = vmatpush3.bf16.msra.mxu0 %v983_v23 }
  0x1b   :  { %902 = vmatpush3.bf16.msra.mxu1 %v984_v24  ;;  %881 = vmatprep.subr.bf16.mxu0 %v985_v25 }
  0x1c   :  { %903 = vmatprep.subr.bf16.mxu1 %v986_v26 }
  0x1e   :  { %882 = vmatpush3.bf16.msra.mxu0 %v987_v27 }
  0x1f   :  { %904 = vmatpush3.bf16.msra.mxu1 %v988_v28  ;;  %883 = vmatprep.subr.bf16.mxu0 %v989_v29 }
  0x20   :  { %905 = vmatprep.subr.bf16.mxu1 %v990_v30 }
  0x22   :  { %884 = vmatpush3.bf16.msra.mxu0 %v991_v32 }
  0x23   :  { %906 = vmatpush3.bf16.msra.mxu1 %v992_v33  ;;  %913 = vmatprep.subr.bf16.mxu0 %v993_v38 }
  0x24   :  { %935 = vmatprep.subr.bf16.mxu1 %v994_v39 }
  0x25   :  { %353 = vmatmul.mubr.bf16.vlgmr.msra.gmra.mrb[0].mxu0 %v114_v45 }
  0x26   :  { %914 = vmatpush3.bf16.msra.mxu0 %v995_v43  ;;  %393 = vmatmul.mubr.bf16.vlgmr.msra.gmra.mrb[0].mxu1 %v122_v49 }
  0x27   :  { %915 = vmatprep.subr.bf16.mxu0 %v997_v47  ;;  %936 = vmatpush3.bf16.msra.mxu1 %v996_v46 }
  0x28   :  { %937 = vmatprep.subr.bf16.mxu1 %v998_v50 }
  0x2a   :  { %916 = vmatpush3.bf16.msra.mxu0 %v999_v51 }
  0x2b   :  { %917 = vmatprep.subr.bf16.mxu0 %v1001_v53  ;;  %938 = vmatpush3.bf16.msra.mxu1 %v1000_v52 }
  0x2c   :  { %939 = vmatprep.subr.bf16.mxu1 %v1002_v54 }
  0x2e   :  { %918 = vmatpush3.bf16.msra.mxu0 %v1003_v55 }
  0x2f   :  { %919 = vmatprep.subr.bf16.mxu0 %v1005_v57  ;;  %940 = vmatpush3.bf16.msra.mxu1 %v1004_v56 }
  0x30   :  { %941 = vmatprep.subr.bf16.mxu1 %v1006_v58 }
  0x32   :  { %920 = vmatpush3.bf16.msra.mxu0 %v1007_v59 }
  0x33   :  { %921 = vmatprep.subr.bf16.mxu0 %v1009_v61  ;;  %942 = vmatpush3.bf16.msra.mxu1 %v1008_v60 }
  0x34   :  { %943 = vmatprep.subr.bf16.mxu1 %v1010_v62 }
  0x36   :  { %922 = vmatpush3.bf16.msra.mxu0 %v1011_v63 }
  0x37   :  { %923 = vmatprep.subr.bf16.mxu0 %v1013_v1  ;;  %944 = vmatpush3.bf16.msra.mxu1 %v1012_v0 }
  0x38   :  { %945 = vmatprep.subr.bf16.mxu1 %v1014_v2 }
  0x3a   :  { %924 = vmatpush3.bf16.msra.mxu0 %v1015_v3 }
  0x3b   :  { %925 = vmatprep.subr.bf16.mxu0 %v1017_v5  ;;  %946 = vmatpush3.bf16.msra.mxu1 %v1016_v4 }
  0x3c   :  { %13 = vsyncpa [#allocation4], 0  ;;  %947 = vmatprep.subr.bf16.mxu1 %v1018_v6  ;;  %v1022_v11 = vld [vmem:[%s1315_s4 + $0xf8] sm:$0xff]   ;;  %v480_v12 = vcombine.high %v836_v10, %v836_v10  ;;  %v487_v15 = vrot.slane %v836_v10, %v1195_v42  ;;  %v1050_v19 = vmov 0   ;;  %v801_v21 = vld [vmem:[%s1314_s3] ss:$0 sm:$0xff] }
  0x3d   :  { %v1023_v13 = vld [vmem:[%s1315_s4 + $0x38] sm:$0xff]   ;;  %960 = vset.pattern.permute.xlu0 %v1050_v19  ;;  %vm779_vm0 = vcmask 41984   ;;  %v835_v35 = vld [vmem:[#allocation2] ss:$0 sm:$0xff]  ;;  %s1051_s3 = smov [#allocation3]  }
  0x3e   :  { %926 = vmatpush3.bf16.msra.mxu0 %v1019_v7  ;;  %v494_v14 = vrot.slane %v480_v12, %v1195_v42  ;;  %v1024_v16 = vld [vmem:[%s1315_s4 + $0xb8] sm:$0xff]   ;;  %v495_v18 = vcombine.high %v487_v15, %v487_v15  ;;  %s793_s4 = sshll.u32 %s1051_s3, 4  ;;  %s794_s4 = int_to_ptr.vmem [resolvable:$true] %s793_s4 }
  0x3f   :  { %927 = vmatprep.subr.bf16.mxu0 %v1021_v9  ;;  %948 = vmatpush3.bf16.msra.mxu1 %v1020_v8  ;;  %s1025_s25 = scalar_lea.vmem %s794_s4, 32  ;;  %p1030_p1 = scmp.lt.s32.totalorder %s794_s4, %s794_s4 }
  0x40   :  { %949 = vmatprep.subr.bf16.mxu1 %v1022_v11  ;;  %725 = vmatprep.mubr.bf16.mxu0 %v494_v14  ;;  %v496_v17 = vcombine.high %v494_v14, %v494_v14  ;;  %p1026_p0 = scmp.ne.s32.totalorder %s794_s4, %s1025_s25  ;;  %p1031_p2 = scmp.lt.s32.totalorder %s1025_s25, %s1025_s25 }
  0x42   :  { %928 = vmatpush3.bf16.msra.mxu0 %v1023_v13  ;;  %765 = vmatprep.mubr.bf16.mxu1 %v496_v17  ;;  %p1032_p3 = por %p1031_p2, %p1030_p1 }
  0x43   :  { %950 = vmatpush3.bf16.msra.mxu1 %v1024_v16 }
  0x44   :  { %p1033_p4 = pnand %p1032_p3, %p1026_p0 }
  0x45   :  { %726 = vmatmul.mubr.bf16.vlgmr.msra.gmra.mrb[4].mxu0 %v487_v15 }
  0x46   :  { %766 = vmatmul.mubr.bf16.vlgmr.msra.gmra.mrb[4].mxu1 %v495_v18 }
  0xf8   :  { %v885_v20 = vpop.f32.mrb[0].mxu0 }
  0xf9   :  { %v886_v22 = vpop.f32.mrb[1].mxu0  ;;  %v907_v23 = vpop.f32.mrb[0].mxu1 }
  0xfa   :  { %v887_v24 = vadd.f32 %v886_v22, %v885_v20  ;;  %v888_v25 = vpop.f32.mrb[2].mxu0  ;;  %v908_v26 = vpop.f32.mrb[1].mxu1 }
  0xfb   :  { %v889_v27 = vpop.f32.mrb[3].mxu0  ;;  %v909_v29 = vadd.f32 %v908_v26, %v907_v23  ;;  %v910_v30 = vpop.f32.mrb[2].mxu1 }
  0xfc   :  { %v355_v28 = vadd.f32 %v887_v24, %v801_v21  ;;  %v911_v31 = vpop.f32.mrb[3].mxu1 }
  0xfe   :  { %v395_v32 = vadd.f32 %v909_v29, %v355_v28 }
 0x100   :  { %v780_v33 = vsel %vm779_vm0, %v395_v32, 0.0 }
 0x101   :  { %781 = vadd.xlane.f32.xlu0 %v780_v33 }
 0x118   :  { %v929_v34 = vpop.f32.mrb[4].mxu0 }
 0x119   :  { %v930_v36 = vpop.f32.mrb[5].mxu0  ;;  %v951_v37 = vpop.f32.mrb[4].mxu1 }
 0x11a   :  { %v931_v38 = vadd.f32 %v930_v36, %v929_v34  ;;  %v932_v39 = vpop.f32.mrb[6].mxu0  ;;  %v952_v40 = vpop.f32.mrb[5].mxu1 }
 0x11b   :  { %v933_v41 = vpop.f32.mrb[7].mxu0  ;;  %v953_v43 = vadd.f32 %v952_v40, %v951_v37  ;;  %v954_v44 = vpop.f32.mrb[6].mxu1 }
 0x11c   :  { %v728_v42 = vadd.f32 %v931_v38, %v835_v35  ;;  %v955_v45 = vpop.f32.mrb[7].mxu1 }
 0x11e   :  { %v768_v46 = vadd.f32 %v953_v43, %v728_v42 }
 0x120   :  { %775 = vperm.xlu0 %960, %v768_v46  }
 0x18e   :  { %v782_v47 = vpop.xlane.xlu0 %781 }
 0x18f   :  { %v784_v49 = vmul.f32 0.16666667, %v782_v47 }
 0x19f   :  { %v776_v48 = vpop.permute.xlu0 %775 }
 0x1a0   :  { %v778_v50 = vadd.f32 %v776_v48, %v395_v32 }
 0x1a2   :  { %v785_v51 = vsub.f32 %v778_v50, %v784_v49 }
 0x1a4   :  { %786 = vst.msk [vmem:[#allocation3] sm:$0x3] %vm779_vm0, %v785_v51 }
 0x1a5   :  { %1036 = shalt.err (!%p1033_p4)
}
 0x1a6   :  { %s1037_s28 = scalar_lea.hbm %s1317_s6, 32 }
 0x1a7   :  { %p1038_p5 = scmp.ne.s32.totalorder %s1317_s6, %s1037_s28  ;;  %p1041_p6 = scmp.lt.u32.totalorder %s1037_s28, %s1317_s6 }
 0x1a9   :  { %p1043_p7 = pnand %p1041_p6, %p1038_p5 }
 0x1ab   :  { %1046 = shalt.err (!%p1043_p7)
}
 0x1ac   :  { %796 = dma.vmem_to_hbm [thread:$0]  %s794_s4, 32, %s1317_s6, [#allocation4]  }
 0x1ad   :  { %1047 = dma.done.wait [#allocation4], 32  }
 0x1ae   :  { %1048 = vsyncadd [#allocation4], 4294967264 }
 0x1af   :  { %800 = vsyncpa [#allocation4], 1 }

</bundles_post_ra>
